<compile_context>
chip_gen: v6e
topology: v6e:2x2x1
jax: 0.10.0
libtpu: 0.0.40
codegen_flags: <defaults>
</compile_context>

<pallas_src>
import functools

import jax
import jax.numpy as jnp
from jax.experimental import pallas as pl
from jax.experimental.pallas import tpu as pltpu


def _vmem_limit_bytes():
    """Generation-aware scoped-VMEM limit (~70% of physical, clamped)."""
    try:
        cap = pltpu.get_tpu_info().vmem_capacity_bytes
        return int(min(cap * 0.7, 100 * 1024 * 1024))
    except Exception:
        return 48 * 1024 * 1024  # safe on v5e/v6e (128 MiB) and v7x (64 MiB)


# ---------------------------------------------------------------------------
# Fused kernel: one grid step == one batch sample, activation shape (C, HW).
# ---------------------------------------------------------------------------
def _fused_attn_block_kernel(
        x_ref,                              # (C, HW) f32   input sample
        gmask_ref,                          # (C, C)  f32   group-averaging matrix
        gn_g_ref, gn_b_ref,                 # (C, 1)  f32   GroupNorm affine
        win_ref, bin_ref,                   # (C, C) bf16, (C, 1) f32  conv_input
        ln1_g_ref, ln1_b_ref,               # (C, 1)  f32
        ln2_g_ref, ln2_b_ref,               # (C, 1)  f32
        ln3_g_ref, ln3_b_ref,               # (C, 1)  f32
        w1_ref, b1_ref,                     # (8C, C) bf16, (8C, 1) f32  geglu_1
        w2_ref, b2_ref,                     # (C, 4C) bf16, (C, 1)  f32  geglu_2
        wo_ref, bo_ref,                     # (C, C) bf16, (C, 1) f32  conv_output
        o_ref,                              # (C, HW) f32   output sample
        *, gn_eps, ln_eps, half):
    x0 = x_ref[...].astype(jnp.float32)                       # residue_long, (C, HW)

    # ---- GroupNorm(32, C, eps=1e-6): stats per (group), normalize per channel ----
    # gmask[c, c'] = 1/cg if c' in group(c) else 0  (constant, DMA'd once).
    # Row c of gmask @ x0 is the group-of-c channel average per spatial pos;
    # a lane-mean then yields the per-group mean broadcast to every channel.
    gm_sp = jnp.dot(gmask_ref[...], x0, preferred_element_type=jnp.float32)
    gm2_sp = jnp.dot(gmask_ref[...], x0 * x0, preferred_element_type=jnp.float32)
    gmean = jnp.mean(gm_sp, axis=1, keepdims=True)             # (C, 1)
    gvar = jnp.mean(gm2_sp, axis=1, keepdims=True) - gmean * gmean
    y = (x0 - gmean) * jax.lax.rsqrt(gvar + gn_eps)
    y = y * gn_g_ref[...] + gn_b_ref[...]

    # ---- conv_input (1x1):  (C_out, C_in) @ (C_in, HW) on the MXU ----
    h0 = jnp.dot(win_ref[...], y.astype(jnp.bfloat16),
                 preferred_element_type=jnp.float32) + bin_ref[...]

    # ---- LayerNorm over channels (sublane axis), per spatial position ----
    def layernorm(v, g_ref, b_ref):
        mu = jnp.mean(v, axis=0, keepdims=True)                 # (1, HW)
        var = jnp.mean(v * v, axis=0, keepdims=True) - mu * mu
        vn = (v - mu) * jax.lax.rsqrt(var + ln_eps)
        return vn * g_ref[...] + b_ref[...]

    # TODO(synk): SelfAttention / CrossAttention outputs are discarded in the
    # reference forward and the classes are not provided -> attention omitted.
    h1 = layernorm(h0, ln1_g_ref, ln1_b_ref) + h0               # LN1 + residue (f32)
    h2 = layernorm(h1, ln2_g_ref, ln2_b_ref) + h1               # LN2 + residue (f32)

    # ---- LN3 + GEGLU + residue ----
    h3 = layernorm(h2, ln3_g_ref, ln3_b_ref)
    g1 = jnp.dot(w1_ref[...], h3.astype(jnp.bfloat16),
                 preferred_element_type=jnp.float32) + b1_ref[...]   # (8C, HW)
    a, gate = g1[:half, :], g1[half:, :]
    # TODO(synk): torch F.gelu default is exact erf GELU; tanh approximation used here.
    gg = a * jax.nn.gelu(gate, approximate=True)
    g2 = jnp.dot(w2_ref[...], gg.astype(jnp.bfloat16),
                 preferred_element_type=jnp.float32) + b2_ref[...]
    h4 = g2 + h2                                                # (C, HW) f32

    # ---- conv_output (1x1) + long residual ----
    out = jnp.dot(wo_ref[...], h4.astype(jnp.bfloat16),
                  preferred_element_type=jnp.float32)
    out = out + bo_ref[...] + x0
    o_ref[...] = out.astype(o_ref.dtype)                        # lane-dense (HW=256)


# ------------------------------- forward -----------------------------------

def unet_attention_block(p, x, context):
    """Forward pass of UNET_AttentionBlock. x: (N, C, H, W) f32."""
    del context  # cross-attention output is discarded in the reference forward
    n, c, h, w = x.shape
    hw = h * w
    half = 4 * c

    # NCHW -> (N, C, HW) is a free (contiguous) reshape; no transposes anywhere.
    x_seq = x.reshape(n, c, hw)
    col = lambda v: v.reshape(-1, 1)   # per-channel params as (C, 1) columns

    kernel = functools.partial(_fused_attn_block_kernel,
                               gn_eps=1e-6, ln_eps=1e-5, half=half)

    const = lambda bs: pl.BlockSpec(bs, lambda i: (0, 0))       # resident block

    # TODO(synk): for real SD sizes (HW=4096, C>=320) on v7x this whole-sample
    # block + fully resident GEGLU weights should switch to a two-pass GroupNorm
    # and a K-tiled GEGLU; at these shapes everything fits VMEM comfortably.
    out = pl.pallas_call(
        kernel,
        out_shape=jax.ShapeDtypeStruct((n, c, hw), jnp.float32),
        grid=(n,),
        in_specs=[
            pl.BlockSpec((None, c, hw), lambda i: (i, 0, 0)),   # x  (per sample)
            const((c, c)),                                      # gmask
            const((c, 1)), const((c, 1)),                       # gn gamma/beta
            const((c, c)), const((c, 1)),                       # conv_input w/b
            const((c, 1)), const((c, 1)),                       # ln1 gamma/beta
            const((c, 1)), const((c, 1)),                       # ln2 gamma/beta
            const((c, 1)), const((c, 1)),                       # ln3 gamma/beta
            const((8 * c, c)), const((8 * c, 1)),               # geglu_1 w/b
            const((c, 4 * c)), const((c, 1)),                   # geglu_2 w/b
            const((c, c)), const((c, 1)),                       # conv_output w/b
        ],
        out_specs=pl.BlockSpec((None, c, hw), lambda i: (i, 0, 0)),
        compiler_params=pltpu.CompilerParams(
            dimension_semantics=("parallel",),
            vmem_limit_bytes=_vmem_limit_bytes()),
    )(x_seq,
      p["gmask"],
      col(p["gn_g"]), col(p["gn_b"]),
      p["conv_in_w"], col(p["conv_in_b"]),
      col(p["ln1_g"]), col(p["ln1_b"]),
      col(p["ln2_g"]), col(p["ln2_b"]),
      col(p["ln3_g"]), col(p["ln3_b"]),
      p["geglu1_w"], col(p["geglu1_b"]),
      p["geglu2_w"], col(p["geglu2_b"]),
      p["conv_out_w"], col(p["conv_out_b"]))

    return out.reshape(n, c, h, w)   # free reshape back to NCHW


# ------------------------------ parameters ----------------------------------

def _uniform(key, shape, bound):
    return jax.random.uniform(key, shape, jnp.float32, -bound, bound)


def make_params(key, n_head=8, d_context=768, groups=32):
    del d_context  # cross-attention weights unused (outputs discarded)
    c = n_head * n_head
    cg = c // groups
    ks = iter(jax.random.split(key, 8))
    ones = jnp.ones((c,), jnp.float32)
    zeros = jnp.zeros((c,), jnp.float32)

    p = {}
    # Constant group-averaging matrix: block-diag of (cg x cg) ones / cg.
    p["gmask"] = (jnp.kron(jnp.eye(groups, dtype=jnp.float32),
                           jnp.ones((cg, cg), jnp.float32)) / float(cg))

    p["gn_g"], p["gn_b"] = ones, zeros                           # GroupNorm(32, C)

    b_in = 1.0 / float(c) ** 0.5                                 # Conv2d(k=1) init
    p["conv_in_w"] = _uniform(next(ks), (c, c), b_in).astype(jnp.bfloat16)   # (out, in)
    p["conv_in_b"] = _uniform(next(ks), (c,), b_in)

    p["ln1_g"], p["ln1_b"] = ones, zeros
    p["ln2_g"], p["ln2_b"] = ones, zeros
    # TODO(synk): layernorm_3 is referenced in forward but never constructed in
    # the source __init__; default-initialized LayerNorm parameters synthesized.
    p["ln3_g"], p["ln3_b"] = ones, zeros

    b1 = 1.0 / float(c) ** 0.5                                   # Linear(C, 8C)
    p["geglu1_w"] = _uniform(next(ks), (8 * c, c), b1).astype(jnp.bfloat16)  # (out, in)
    p["geglu1_b"] = _uniform(next(ks), (8 * c,), b1)

    b2 = 1.0 / float(4 * c) ** 0.5                               # Linear(4C, C)
    p["geglu2_w"] = _uniform(next(ks), (c, 4 * c), b2).astype(jnp.bfloat16)
    p["geglu2_b"] = _uniform(next(ks), (c,), b2)

    bo = 1.0 / float(c) ** 0.5                                   # Conv2d(k=1)
    p["conv_out_w"] = _uniform(next(ks), (c, c), bo).astype(jnp.bfloat16)
    p["conv_out_b"] = _uniform(next(ks), (c,), bo)
    return p


# --------------------------------- main --------------------------------------

if __name__ == "__main__":
    key = jax.random.PRNGKey(0)
    kp, kx, kc = jax.random.split(key, 3)

    n_head = 8
    channels = n_head * n_head                 # 64, as in the reference __init__
    params = make_params(kp, n_head=n_head)

    x = jax.random.normal(kx, (2, channels, 16, 16), jnp.float32)   # NCHW
    context = jax.random.normal(kc, (2, 8, 768), jnp.float32)       # unused

    out = jax.jit(unet_attention_block)(params, x, context)
    out = jax.block_until_ready(out)
    assert out.shape == (2, channels, 16, 16) and out.dtype == jnp.float32
    print("KERNEL_OK")
</pallas_src>

<mosaic_0001>
module attributes {stable_mosaic.version = 11 : i64} {
  func.func @_fused_attn_block_kernel(%arg0: i32, %arg1: memref<1x64x256xf32, #tpu.memory_space<vmem>>, %arg2: memref<64x64xf32, #tpu.memory_space<vmem>>, %arg3: memref<64x1xf32, #tpu.memory_space<vmem>>, %arg4: memref<64x1xf32, #tpu.memory_space<vmem>>, %arg5: memref<64x64xbf16, #tpu.memory_space<vmem>>, %arg6: memref<64x1xf32, #tpu.memory_space<vmem>>, %arg7: memref<64x1xf32, #tpu.memory_space<vmem>>, %arg8: memref<64x1xf32, #tpu.memory_space<vmem>>, %arg9: memref<64x1xf32, #tpu.memory_space<vmem>>, %arg10: memref<64x1xf32, #tpu.memory_space<vmem>>, %arg11: memref<64x1xf32, #tpu.memory_space<vmem>>, %arg12: memref<64x1xf32, #tpu.memory_space<vmem>>, %arg13: memref<512x64xbf16, #tpu.memory_space<vmem>>, %arg14: memref<512x1xf32, #tpu.memory_space<vmem>>, %arg15: memref<64x256xbf16, #tpu.memory_space<vmem>>, %arg16: memref<64x1xf32, #tpu.memory_space<vmem>>, %arg17: memref<64x64xbf16, #tpu.memory_space<vmem>>, %arg18: memref<64x1xf32, #tpu.memory_space<vmem>>, %arg19: memref<1x64x256xf32, #tpu.memory_space<vmem>>) attributes {dimension_semantics = [#tpu.dimension_semantics<parallel>], iteration_bounds = array<i64: 2>, scalar_prefetch = 0 : i64, scratch_operands = 0 : i64, tpu.core_type = #tpu.core_type<tc>, window_params = [{transform_indices = @transform_0, window_bounds = array<i64: 1, 64, 256>}, {pipeline_mode = #tpu.pipeline_mode<synchronous>, transform_indices = @transform_1, window_bounds = array<i64: 64, 64>}, {pipeline_mode = #tpu.pipeline_mode<synchronous>, transform_indices = @transform_2, window_bounds = array<i64: 64, 1>}, {pipeline_mode = #tpu.pipeline_mode<synchronous>, transform_indices = @transform_3, window_bounds = array<i64: 64, 1>}, {pipeline_mode = #tpu.pipeline_mode<synchronous>, transform_indices = @transform_4, window_bounds = array<i64: 64, 64>}, {pipeline_mode = #tpu.pipeline_mode<synchronous>, transform_indices = @transform_5, window_bounds = array<i64: 64, 1>}, {pipeline_mode = #tpu.pipeline_mode<synchronous>, transform_indices = @transform_6, window_bounds = array<i64: 64, 1>}, {pipeline_mode = #tpu.pipeline_mode<synchronous>, transform_indices = @transform_7, window_bounds = array<i64: 64, 1>}, {pipeline_mode = #tpu.pipeline_mode<synchronous>, transform_indices = @transform_8, window_bounds = array<i64: 64, 1>}, {pipeline_mode = #tpu.pipeline_mode<synchronous>, transform_indices = @transform_9, window_bounds = array<i64: 64, 1>}, {pipeline_mode = #tpu.pipeline_mode<synchronous>, transform_indices = @transform_10, window_bounds = array<i64: 64, 1>}, {pipeline_mode = #tpu.pipeline_mode<synchronous>, transform_indices = @transform_11, window_bounds = array<i64: 64, 1>}, {pipeline_mode = #tpu.pipeline_mode<synchronous>, transform_indices = @transform_12, window_bounds = array<i64: 512, 64>}, {pipeline_mode = #tpu.pipeline_mode<synchronous>, transform_indices = @transform_13, window_bounds = array<i64: 512, 1>}, {pipeline_mode = #tpu.pipeline_mode<synchronous>, transform_indices = @transform_14, window_bounds = array<i64: 64, 256>}, {pipeline_mode = #tpu.pipeline_mode<synchronous>, transform_indices = @transform_15, window_bounds = array<i64: 64, 1>}, {pipeline_mode = #tpu.pipeline_mode<synchronous>, transform_indices = @transform_16, window_bounds = array<i64: 64, 64>}, {pipeline_mode = #tpu.pipeline_mode<synchronous>, transform_indices = @transform_17, window_bounds = array<i64: 64, 1>}, {transform_indices = @transform_18, window_bounds = array<i64: 1, 64, 256>}]} {
    %c0 = arith.constant 0 : index
    %c0_0 = arith.constant 0 : index
    %c0_1 = arith.constant 0 : index
    %0 = vector.load %arg1[%c0, %c0_0, %c0_1] : memref<1x64x256xf32, #tpu.memory_space<vmem>>, vector<1x64x256xf32>
    %1 = vector.shape_cast %0 : vector<1x64x256xf32> to vector<64x256xf32>
    %c0_2 = arith.constant 0 : index
    %c0_3 = arith.constant 0 : index
    %2 = vector.load %arg2[%c0_2, %c0_3] : memref<64x64xf32, #tpu.memory_space<vmem>>, vector<64x64xf32>
    %cst = arith.constant dense<0.000000e+00> : vector<64x256xf32>
    %3 = tpu.matmul %2, %1, %cst {dimension_numbers = #tpu.dot_dimension_numbers<[1], [0], [0], [1], [0, 0, 1, 1], [], []>} : vector<64x64xf32>, vector<64x256xf32>, vector<64x256xf32> -> vector<64x256xf32>
    %c0_4 = arith.constant 0 : index
    %c0_5 = arith.constant 0 : index
    %4 = vector.load %arg2[%c0_4, %c0_5] : memref<64x64xf32, #tpu.memory_space<vmem>>, vector<64x64xf32>
    %5 = arith.mulf %1, %1 : vector<64x256xf32>
    %cst_6 = arith.constant dense<0.000000e+00> : vector<64x256xf32>
    %6 = tpu.matmul %4, %5, %cst_6 {dimension_numbers = #tpu.dot_dimension_numbers<[1], [0], [0], [1], [0, 0, 1, 1], [], []>} : vector<64x64xf32>, vector<64x256xf32>, vector<64x256xf32> -> vector<64x256xf32>
    %cst_7 = arith.constant dense<0.000000e+00> : vector<64xf32>
    %7 = vector.multi_reduction <add>, %3, %cst_7 [1] : vector<64x256xf32> to vector<64xf32>
    %8 = vector.shape_cast %7 : vector<64xf32> to vector<64x1xf32>
    %cst_8 = arith.constant 2.560000e+02 : f32
    %9 = vector.broadcast %cst_8 : f32 to vector<64x1xf32>
    %10 = arith.divf %8, %9 : vector<64x1xf32>
    %cst_9 = arith.constant dense<0.000000e+00> : vector<64xf32>
    %11 = vector.multi_reduction <add>, %6, %cst_9 [1] : vector<64x256xf32> to vector<64xf32>
    %12 = vector.shape_cast %11 : vector<64xf32> to vector<64x1xf32>
    %cst_10 = arith.constant 2.560000e+02 : f32
    %13 = vector.broadcast %cst_10 : f32 to vector<64x1xf32>
    %14 = arith.divf %12, %13 : vector<64x1xf32>
    %15 = arith.mulf %10, %10 : vector<64x1xf32>
    %16 = arith.subf %14, %15 : vector<64x1xf32>
    %17 = vector.broadcast %10 : vector<64x1xf32> to vector<64x256xf32>
    %18 = arith.subf %1, %17 : vector<64x256xf32>
    %cst_11 = arith.constant 9.99999997E-7 : f32
    %19 = vector.broadcast %cst_11 : f32 to vector<64x1xf32>
    %20 = arith.addf %16, %19 : vector<64x1xf32>
    %21 = math.rsqrt %20 : vector<64x1xf32>
    %22 = vector.broadcast %21 : vector<64x1xf32> to vector<64x256xf32>
    %23 = arith.mulf %18, %22 : vector<64x256xf32>
    %c0_12 = arith.constant 0 : index
    %c0_13 = arith.constant 0 : index
    %24 = vector.load %arg3[%c0_12, %c0_13] : memref<64x1xf32, #tpu.memory_space<vmem>>, vector<64x1xf32>
    %25 = vector.broadcast %24 : vector<64x1xf32> to vector<64x256xf32>
    %26 = arith.mulf %23, %25 : vector<64x256xf32>
    %c0_14 = arith.constant 0 : index
    %c0_15 = arith.constant 0 : index
    %27 = vector.load %arg4[%c0_14, %c0_15] : memref<64x1xf32, #tpu.memory_space<vmem>>, vector<64x1xf32>
    %28 = vector.broadcast %27 : vector<64x1xf32> to vector<64x256xf32>
    %29 = arith.addf %26, %28 : vector<64x256xf32>
    %c0_16 = arith.constant 0 : index
    %c0_17 = arith.constant 0 : index
    %30 = vector.load %arg5[%c0_16, %c0_17] : memref<64x64xbf16, #tpu.memory_space<vmem>>, vector<64x64xbf16>
    %31 = arith.truncf %29 : vector<64x256xf32> to vector<64x256xbf16>
    %cst_18 = arith.constant dense<0.000000e+00> : vector<64x256xf32>
    %32 = tpu.matmul %30, %31, %cst_18 {dimension_numbers = #tpu.dot_dimension_numbers<[1], [0], [0], [1], [0, 0, 1, 1], [], []>} : vector<64x64xbf16>, vector<64x256xbf16>, vector<64x256xf32> -> vector<64x256xf32>
    %c0_19 = arith.constant 0 : index
    %c0_20 = arith.constant 0 : index
    %33 = vector.load %arg6[%c0_19, %c0_20] : memref<64x1xf32, #tpu.memory_space<vmem>>, vector<64x1xf32>
    %34 = vector.broadcast %33 : vector<64x1xf32> to vector<64x256xf32>
    %35 = arith.addf %32, %34 : vector<64x256xf32>
    %cst_21 = arith.constant dense<0.000000e+00> : vector<256xf32>
    %36 = vector.multi_reduction <add>, %35, %cst_21 [0] : vector<64x256xf32> to vector<256xf32>
    %37 = vector.shape_cast %36 : vector<256xf32> to vector<1x256xf32>
    %cst_22 = arith.constant 6.400000e+01 : f32
    %38 = vector.broadcast %cst_22 : f32 to vector<1x256xf32>
    %39 = arith.divf %37, %38 : vector<1x256xf32>
    %40 = arith.mulf %35, %35 : vector<64x256xf32>
    %cst_23 = arith.constant dense<0.000000e+00> : vector<256xf32>
    %41 = vector.multi_reduction <add>, %40, %cst_23 [0] : vector<64x256xf32> to vector<256xf32>
    %42 = vector.shape_cast %41 : vector<256xf32> to vector<1x256xf32>
    %cst_24 = arith.constant 6.400000e+01 : f32
    %43 = vector.broadcast %cst_24 : f32 to vector<1x256xf32>
    %44 = arith.divf %42, %43 : vector<1x256xf32>
    %45 = arith.mulf %39, %39 : vector<1x256xf32>
    %46 = arith.subf %44, %45 : vector<1x256xf32>
    %47 = vector.broadcast %39 : vector<1x256xf32> to vector<64x256xf32>
    %48 = arith.subf %35, %47 : vector<64x256xf32>
    %cst_25 = arith.constant 9.99999974E-6 : f32
    %49 = vector.broadcast %cst_25 : f32 to vector<1x256xf32>
    %50 = arith.addf %46, %49 : vector<1x256xf32>
    %51 = math.rsqrt %50 : vector<1x256xf32>
    %52 = vector.broadcast %51 : vector<1x256xf32> to vector<64x256xf32>
    %53 = arith.mulf %48, %52 : vector<64x256xf32>
    %c0_26 = arith.constant 0 : index
    %c0_27 = arith.constant 0 : index
    %54 = vector.load %arg7[%c0_26, %c0_27] : memref<64x1xf32, #tpu.memory_space<vmem>>, vector<64x1xf32>
    %55 = vector.broadcast %54 : vector<64x1xf32> to vector<64x256xf32>
    %56 = arith.mulf %53, %55 : vector<64x256xf32>
    %c0_28 = arith.constant 0 : index
    %c0_29 = arith.constant 0 : index
    %57 = vector.load %arg8[%c0_28, %c0_29] : memref<64x1xf32, #tpu.memory_space<vmem>>, vector<64x1xf32>
    %58 = vector.broadcast %57 : vector<64x1xf32> to vector<64x256xf32>
    %59 = arith.addf %56, %58 : vector<64x256xf32>
    %60 = arith.addf %59, %35 : vector<64x256xf32>
    %cst_30 = arith.constant dense<0.000000e+00> : vector<256xf32>
    %61 = vector.multi_reduction <add>, %60, %cst_30 [0] : vector<64x256xf32> to vector<256xf32>
    %62 = vector.shape_cast %61 : vector<256xf32> to vector<1x256xf32>
    %cst_31 = arith.constant 6.400000e+01 : f32
    %63 = vector.broadcast %cst_31 : f32 to vector<1x256xf32>
    %64 = arith.divf %62, %63 : vector<1x256xf32>
    %65 = arith.mulf %60, %60 : vector<64x256xf32>
    %cst_32 = arith.constant dense<0.000000e+00> : vector<256xf32>
    %66 = vector.multi_reduction <add>, %65, %cst_32 [0] : vector<64x256xf32> to vector<256xf32>
    %67 = vector.shape_cast %66 : vector<256xf32> to vector<1x256xf32>
    %cst_33 = arith.constant 6.400000e+01 : f32
    %68 = vector.broadcast %cst_33 : f32 to vector<1x256xf32>
    %69 = arith.divf %67, %68 : vector<1x256xf32>
    %70 = arith.mulf %64, %64 : vector<1x256xf32>
    %71 = arith.subf %69, %70 : vector<1x256xf32>
    %72 = vector.broadcast %64 : vector<1x256xf32> to vector<64x256xf32>
    %73 = arith.subf %60, %72 : vector<64x256xf32>
    %cst_34 = arith.constant 9.99999974E-6 : f32
    %74 = vector.broadcast %cst_34 : f32 to vector<1x256xf32>
    %75 = arith.addf %71, %74 : vector<1x256xf32>
    %76 = math.rsqrt %75 : vector<1x256xf32>
    %77 = vector.broadcast %76 : vector<1x256xf32> to vector<64x256xf32>
    %78 = arith.mulf %73, %77 : vector<64x256xf32>
    %c0_35 = arith.constant 0 : index
    %c0_36 = arith.constant 0 : index
    %79 = vector.load %arg9[%c0_35, %c0_36] : memref<64x1xf32, #tpu.memory_space<vmem>>, vector<64x1xf32>
    %80 = vector.broadcast %79 : vector<64x1xf32> to vector<64x256xf32>
    %81 = arith.mulf %78, %80 : vector<64x256xf32>
    %c0_37 = arith.constant 0 : index
    %c0_38 = arith.constant 0 : index
    %82 = vector.load %arg10[%c0_37, %c0_38] : memref<64x1xf32, #tpu.memory_space<vmem>>, vector<64x1xf32>
    %83 = vector.broadcast %82 : vector<64x1xf32> to vector<64x256xf32>
    %84 = arith.addf %81, %83 : vector<64x256xf32>
    %85 = arith.addf %84, %60 : vector<64x256xf32>
    %cst_39 = arith.constant dense<0.000000e+00> : vector<256xf32>
    %86 = vector.multi_reduction <add>, %85, %cst_39 [0] : vector<64x256xf32> to vector<256xf32>
    %87 = vector.shape_cast %86 : vector<256xf32> to vector<1x256xf32>
    %cst_40 = arith.constant 6.400000e+01 : f32
    %88 = vector.broadcast %cst_40 : f32 to vector<1x256xf32>
    %89 = arith.divf %87, %88 : vector<1x256xf32>
    %90 = arith.mulf %85, %85 : vector<64x256xf32>
    %cst_41 = arith.constant dense<0.000000e+00> : vector<256xf32>
    %91 = vector.multi_reduction <add>, %90, %cst_41 [0] : vector<64x256xf32> to vector<256xf32>
    %92 = vector.shape_cast %91 : vector<256xf32> to vector<1x256xf32>
    %cst_42 = arith.constant 6.400000e+01 : f32
    %93 = vector.broadcast %cst_42 : f32 to vector<1x256xf32>
    %94 = arith.divf %92, %93 : vector<1x256xf32>
    %95 = arith.mulf %89, %89 : vector<1x256xf32>
    %96 = arith.subf %94, %95 : vector<1x256xf32>
    %97 = vector.broadcast %89 : vector<1x256xf32> to vector<64x256xf32>
    %98 = arith.subf %85, %97 : vector<64x256xf32>
    %cst_43 = arith.constant 9.99999974E-6 : f32
    %99 = vector.broadcast %cst_43 : f32 to vector<1x256xf32>
    %100 = arith.addf %96, %99 : vector<1x256xf32>
    %101 = math.rsqrt %100 : vector<1x256xf32>
    %102 = vector.broadcast %101 : vector<1x256xf32> to vector<64x256xf32>
    %103 = arith.mulf %98, %102 : vector<64x256xf32>
    %c0_44 = arith.constant 0 : index
    %c0_45 = arith.constant 0 : index
    %104 = vector.load %arg11[%c0_44, %c0_45] : memref<64x1xf32, #tpu.memory_space<vmem>>, vector<64x1xf32>
    %105 = vector.broadcast %104 : vector<64x1xf32> to vector<64x256xf32>
    %106 = arith.mulf %103, %105 : vector<64x256xf32>
    %c0_46 = arith.constant 0 : index
    %c0_47 = arith.constant 0 : index
    %107 = vector.load %arg12[%c0_46, %c0_47] : memref<64x1xf32, #tpu.memory_space<vmem>>, vector<64x1xf32>
    %108 = vector.broadcast %107 : vector<64x1xf32> to vector<64x256xf32>
    %109 = arith.addf %106, %108 : vector<64x256xf32>
    %c0_48 = arith.constant 0 : index
    %c0_49 = arith.constant 0 : index
    %110 = vector.load %arg13[%c0_48, %c0_49] : memref<512x64xbf16, #tpu.memory_space<vmem>>, vector<512x64xbf16>
    %111 = arith.truncf %109 : vector<64x256xf32> to vector<64x256xbf16>
    %cst_50 = arith.constant dense<0.000000e+00> : vector<512x256xf32>
    %112 = tpu.matmul %110, %111, %cst_50 {dimension_numbers = #tpu.dot_dimension_numbers<[1], [0], [0], [1], [0, 0, 1, 1], [], []>} : vector<512x64xbf16>, vector<64x256xbf16>, vector<512x256xf32> -> vector<512x256xf32>
    %c0_51 = arith.constant 0 : index
    %c0_52 = arith.constant 0 : index
    %113 = vector.load %arg14[%c0_51, %c0_52] : memref<512x1xf32, #tpu.memory_space<vmem>>, vector<512x1xf32>
    %114 = vector.broadcast %113 : vector<512x1xf32> to vector<512x256xf32>
    %115 = arith.addf %112, %114 : vector<512x256xf32>
    %116 = vector.extract_strided_slice %115 {offsets = [0, 0], sizes = [256, 256], strides = [1, 1]} : vector<512x256xf32> to vector<256x256xf32>
    %117 = vector.extract_strided_slice %115 {offsets = [256, 0], sizes = [256, 256], strides = [1, 1]} : vector<512x256xf32> to vector<256x256xf32>
    %118 = arith.mulf %117, %117 : vector<256x256xf32>
    %119 = arith.mulf %117, %118 : vector<256x256xf32>
    %cst_53 = arith.constant 4.471500e-02 : f32
    %120 = vector.broadcast %cst_53 : f32 to vector<256x256xf32>
    %121 = arith.mulf %120, %119 : vector<256x256xf32>
    %122 = arith.addf %117, %121 : vector<256x256xf32>
    %cst_54 = arith.constant 0.797884583 : f32
    %123 = vector.broadcast %cst_54 : f32 to vector<256x256xf32>
    %124 = arith.mulf %123, %122 : vector<256x256xf32>
    %125 = math.tanh %124 : vector<256x256xf32>
    %cst_55 = arith.constant 1.000000e+00 : f32
    %126 = vector.broadcast %cst_55 : f32 to vector<256x256xf32>
    %127 = arith.addf %126, %125 : vector<256x256xf32>
    %cst_56 = arith.constant 5.000000e-01 : f32
    %128 = vector.broadcast %cst_56 : f32 to vector<256x256xf32>
    %129 = arith.mulf %128, %127 : vector<256x256xf32>
    %130 = arith.mulf %117, %129 : vector<256x256xf32>
    %131 = arith.mulf %116, %130 : vector<256x256xf32>
    %c0_57 = arith.constant 0 : index
    %c0_58 = arith.constant 0 : index
    %132 = vector.load %arg15[%c0_57, %c0_58] : memref<64x256xbf16, #tpu.memory_space<vmem>>, vector<64x256xbf16>
    %133 = arith.truncf %131 : vector<256x256xf32> to vector<256x256xbf16>
    %cst_59 = arith.constant dense<0.000000e+00> : vector<64x256xf32>
    %134 = tpu.matmul %132, %133, %cst_59 {dimension_numbers = #tpu.dot_dimension_numbers<[1], [0], [0], [1], [0, 0, 1, 1], [], []>} : vector<64x256xbf16>, vector<256x256xbf16>, vector<64x256xf32> -> vector<64x256xf32>
    %c0_60 = arith.constant 0 : index
    %c0_61 = arith.constant 0 : index
    %135 = vector.load %arg16[%c0_60, %c0_61] : memref<64x1xf32, #tpu.memory_space<vmem>>, vector<64x1xf32>
    %136 = vector.broadcast %135 : vector<64x1xf32> to vector<64x256xf32>
    %137 = arith.addf %134, %136 : vector<64x256xf32>
    %138 = arith.addf %137, %85 : vector<64x256xf32>
    %c0_62 = arith.constant 0 : index
    %c0_63 = arith.constant 0 : index
    %139 = vector.load %arg17[%c0_62, %c0_63] : memref<64x64xbf16, #tpu.memory_space<vmem>>, vector<64x64xbf16>
    %140 = arith.truncf %138 : vector<64x256xf32> to vector<64x256xbf16>
    %cst_64 = arith.constant dense<0.000000e+00> : vector<64x256xf32>
    %141 = tpu.matmul %139, %140, %cst_64 {dimension_numbers = #tpu.dot_dimension_numbers<[1], [0], [0], [1], [0, 0, 1, 1], [], []>} : vector<64x64xbf16>, vector<64x256xbf16>, vector<64x256xf32> -> vector<64x256xf32>
    %c0_65 = arith.constant 0 : index
    %c0_66 = arith.constant 0 : index
    %142 = vector.load %arg18[%c0_65, %c0_66] : memref<64x1xf32, #tpu.memory_space<vmem>>, vector<64x1xf32>
    %143 = vector.broadcast %142 : vector<64x1xf32> to vector<64x256xf32>
    %144 = arith.addf %141, %143 : vector<64x256xf32>
    %145 = arith.addf %144, %1 : vector<64x256xf32>
    %c0_67 = arith.constant 0 : index
    %c0_68 = arith.constant 0 : index
    %c0_69 = arith.constant 0 : index
    %146 = vector.load %arg19[%c0_67, %c0_68, %c0_69] : memref<1x64x256xf32, #tpu.memory_space<vmem>>, vector<1x64x256xf32>
    %147 = vector.shape_cast %146 : vector<1x64x256xf32> to vector<64x256xf32>
    %148 = vector.shape_cast %145 : vector<64x256xf32> to vector<1x64x256xf32>
    tpu.vector_store %arg19[%c0_67, %c0_68, %c0_69], %148 {strides = array<i32>} : memref<1x64x256xf32, #tpu.memory_space<vmem>>, vector<1x64x256xf32>,
    return
  }
  func.func @transform_0(%arg0: i32) -> (i32, i32, i32) {
    %c0_i32 = arith.constant 0 : i32
    %c0_i32_0 = arith.constant 0 : i32
    %c0_i32_1 = arith.constant 0 : i32
    return %arg0, %c0_i32, %c0_i32_0 : i32, i32, i32
  }
  func.func @transform_1(%arg0: i32) -> (i32, i32) {
    %c0_i32 = arith.constant 0 : i32
    %c0_i32_0 = arith.constant 0 : i32
    %c0_i32_1 = arith.constant 0 : i32
    return %c0_i32, %c0_i32_0 : i32, i32
  }
  func.func @transform_2(%arg0: i32) -> (i32, i32) {
    %c0_i32 = arith.constant 0 : i32
    %c0_i32_0 = arith.constant 0 : i32
    %c0_i32_1 = arith.constant 0 : i32
    return %c0_i32, %c0_i32_0 : i32, i32
  }
  func.func @transform_3(%arg0: i32) -> (i32, i32) {
    %c0_i32 = arith.constant 0 : i32
    %c0_i32_0 = arith.constant 0 : i32
    %c0_i32_1 = arith.constant 0 : i32
    return %c0_i32, %c0_i32_0 : i32, i32
  }
  func.func @transform_4(%arg0: i32) -> (i32, i32) {
    %c0_i32 = arith.constant 0 : i32
    %c0_i32_0 = arith.constant 0 : i32
    %c0_i32_1 = arith.constant 0 : i32
    return %c0_i32, %c0_i32_0 : i32, i32
  }
  func.func @transform_5(%arg0: i32) -> (i32, i32) {
    %c0_i32 = arith.constant 0 : i32
    %c0_i32_0 = arith.constant 0 : i32
    %c0_i32_1 = arith.constant 0 : i32
    return %c0_i32, %c0_i32_0 : i32, i32
  }
  func.func @transform_6(%arg0: i32) -> (i32, i32) {
    %c0_i32 = arith.constant 0 : i32
    %c0_i32_0 = arith.constant 0 : i32
    %c0_i32_1 = arith.constant 0 : i32
    return %c0_i32, %c0_i32_0 : i32, i32
  }
  func.func @transform_7(%arg0: i32) -> (i32, i32) {
    %c0_i32 = arith.constant 0 : i32
    %c0_i32_0 = arith.constant 0 : i32
    %c0_i32_1 = arith.constant 0 : i32
    return %c0_i32, %c0_i32_0 : i32, i32
  }
  func.func @transform_8(%arg0: i32) -> (i32, i32) {
    %c0_i32 = arith.constant 0 : i32
    %c0_i32_0 = arith.constant 0 : i32
    %c0_i32_1 = arith.constant 0 : i32
    return %c0_i32, %c0_i32_0 : i32, i32
  }
  func.func @transform_9(%arg0: i32) -> (i32, i32) {
    %c0_i32 = arith.constant 0 : i32
    %c0_i32_0 = arith.constant 0 : i32
    %c0_i32_1 = arith.constant 0 : i32
    return %c0_i32, %c0_i32_0 : i32, i32
  }
  func.func @transform_10(%arg0: i32) -> (i32, i32) {
    %c0_i32 = arith.constant 0 : i32
    %c0_i32_0 = arith.constant 0 : i32
    %c0_i32_1 = arith.constant 0 : i32
    return %c0_i32, %c0_i32_0 : i32, i32
  }
  func.func @transform_11(%arg0: i32) -> (i32, i32) {
    %c0_i32 = arith.constant 0 : i32
    %c0_i32_0 = arith.constant 0 : i32
    %c0_i32_1 = arith.constant 0 : i32
    return %c0_i32, %c0_i32_0 : i32, i32
  }
  func.func @transform_12(%arg0: i32) -> (i32, i32) {
    %c0_i32 = arith.constant 0 : i32
    %c0_i32_0 = arith.constant 0 : i32
    %c0_i32_1 = arith.constant 0 : i32
    return %c0_i32, %c0_i32_0 : i32, i32
  }
  func.func @transform_13(%arg0: i32) -> (i32, i32) {
    %c0_i32 = arith.constant 0 : i32
    %c0_i32_0 = arith.constant 0 : i32
    %c0_i32_1 = arith.constant 0 : i32
    return %c0_i32, %c0_i32_0 : i32, i32
  }
  func.func @transform_14(%arg0: i32) -> (i32, i32) {
    %c0_i32 = arith.constant 0 : i32
    %c0_i32_0 = arith.constant 0 : i32
    %c0_i32_1 = arith.constant 0 : i32
    return %c0_i32, %c0_i32_0 : i32, i32
  }
  func.func @transform_15(%arg0: i32) -> (i32, i32) {
    %c0_i32 = arith.constant 0 : i32
    %c0_i32_0 = arith.constant 0 : i32
    %c0_i32_1 = arith.constant 0 : i32
    return %c0_i32, %c0_i32_0 : i32, i32
  }
  func.func @transform_16(%arg0: i32) -> (i32, i32) {
    %c0_i32 = arith.constant 0 : i32
    %c0_i32_0 = arith.constant 0 : i32
    %c0_i32_1 = arith.constant 0 : i32
    return %c0_i32, %c0_i32_0 : i32, i32
  }
  func.func @transform_17(%arg0: i32) -> (i32, i32) {
    %c0_i32 = arith.constant 0 : i32
    %c0_i32_0 = arith.constant 0 : i32
    %c0_i32_1 = arith.constant 0 : i32
    return %c0_i32, %c0_i32_0 : i32, i32
  }
  func.func @transform_18(%arg0: i32) -> (i32, i32, i32) {
    %c0_i32 = arith.constant 0 : i32
    %c0_i32_0 = arith.constant 0 : i32
    %c0_i32_1 = arith.constant 0 : i32
    return %arg0, %c0_i32, %c0_i32_0 : i32, i32, i32
  }
}

</mosaic_0001>

<bundles_post_ra>
// kernel: unet_attention_block.1
= control target key start
LH: loop header
LB: loop body
LE: loop exit
PB: predicated region body
PF: predicated region fallthrough
CT: control target
= control target key end

     0   :  { %s4705_s27 = smov 0   ;;  %s7342_s0 = inlined_call_operand.vmem [shape: f32[2,64,256], index: 0, kind: input, shape index: {}]   ;;  %s7343_s1 = inlined_call_operand.vmem [shape: f32[64,64], index: 1, kind: input, shape index: {}]   ;;  %s7344_s2 = inlined_call_operand.vmem [shape: f32[64,1], index: 2, kind: input, shape index: {}]   ;;  %s7345_s3 = inlined_call_operand.vmem [shape: f32[64,1], index: 3, kind: input, shape index: {}]   ;;  %s7346_s4 = inlined_call_operand.vmem [shape: bf16[64,64], index: 4, kind: input, shape index: {}]   ;;  %s7347_s5 = inlined_call_operand.vmem [shape: f32[64,1], index: 5, kind: input, shape index: {}]   ;;  %s7348_s6 = inlined_call_operand.vmem [shape: f32[64,1], index: 6, kind: input, shape index: {}]   ;;  %s7349_s7 = inlined_call_operand.vmem [shape: f32[64,1], index: 7, kind: input, shape index: {}]   ;;  %s7350_s8 = inlined_call_operand.vmem [shape: f32[64,1], index: 8, kind: input, shape index: {}]   ;;  %s7351_s9 = inlined_call_operand.vmem [shape: f32[64,1], index: 9, kind: input, shape index: {}]   ;;  %s7352_s10 = inlined_call_operand.vmem [shape: f32[64,1], index: 10, kind: input, shape index: {}]   ;;  %s7353_s11 = inlined_call_operand.vmem [shape: f32[64,1], index: 11, kind: input, shape index: {}]   ;;  %s7354_s12 = inlined_call_operand.vmem [shape: bf16[512,64], index: 12, kind: input, shape index: {}]   ;;  %s7355_s13 = inlined_call_operand.vmem [shape: f32[512,1], index: 13, kind: input, shape index: {}]   ;;  %s7356_s14 = inlined_call_operand.vmem [shape: bf16[64,256], index: 14, kind: input, shape index: {}]   ;;  %s7357_s15 = inlined_call_operand.vmem [shape: f32[64,1], index: 15, kind: input, shape index: {}]   ;;  %s7358_s16 = inlined_call_operand.vmem [shape: bf16[64,64], index: 16, kind: input, shape index: {}]   ;;  %s7359_s17 = inlined_call_operand.vmem [shape: f32[64,1], index: 17, kind: input, shape index: {}]   ;;  %s7360_s18 = inlined_call_operand.vmem [shape: f32[2,64,256], index: 18, kind: output, shape index: {}]  }
   0x1   :  { %7454 = sst [smem:[#allocation120_spill]] %s7342_s0 }
   0x2   :  { %7455 = sst [smem:[#allocation121_spill]] %s7343_s1 }
   0x3   :  { %7456 = sst [smem:[#allocation122_spill]] %s7344_s2 }
   0x4 LB: > { %s4225_s28 = sadd.s32 4294967295, %s4606_s27   ;;  %p4229_p0 = scmp.ge.s32.totalorder %s4606_s27, 1  ;;  %s4606_s27 = sphi %s4705_s27, %s28_s27  }
   0x5   : > { %p512_p1 = scmp.lt.s32.totalorder %s4606_s27, 3 }
   0x7   : > { %p513_p2 = pnand %p4229_p0, %p512_p1 }
   0x9   : > { %516 = sbr.rel (%p513_p2) target bundleno = 1878 (0x756), region = 92 }
   0xe   : > { %p566_p3 = scmp.lt.s32.totalorder %s4225_s28, 1  ;;  %v4608_v0 = vmov 0.0   ;;  %s7457_s19 = sld [smem:[#allocation120_spill]]  ;;  %vm601_vm0 = vcmask 523264   ;;  %v7364_v41 = vmov 0  }
   0xf   : > { %690 = vmatprep.mubr.f32.mxu0 %v4608_v0  ;;  %819 = vmatprep.mubr.f32.mxu1 %v4608_v0  ;;  %s7458_s22 = sld [smem:[#allocation121_spill]] }
  0x10   : > { %s7800_s28 = smov (!%p566_p3, %s4225_s28), 1  ;;  %4361 = vset.pattern.permute.xlu1 %v7364_v41  ;;  %4360 = vset.pattern.permute.xlu0 %v7364_v41  ;;  %s7459_s0 = sld [smem:[#allocation122_spill]] }
  0x11   : > { %s7363_s29 = sshll.u32 %s7800_s28, 7  ;;  %s7798_s26 = sshll.u32 %s7800_s28, 7 }
  0x12   : > { %s7305_s20 = scalar_lea.vmem %s7360_s18, %s7798_s26 }
  0x14   : > { %s4723_s1 = scalar_lea.vmem %s7457_s19, %s7363_s29 }
  0x15   : > { %v592_v1 = vld [vmem:[%s4723_s1 + $0x78] sm:$0xff]  ;;  %v591_v2 = vld [vmem:[%s4723_s1 + $0x70] sm:$0xff]  ;;  %v590_v3 = vld [vmem:[%s4723_s1 + $0x68] sm:$0xff] }
  0x16   : > { %642 = vmatprep.subr.mxu0 %v592_v1  ;;  %v754_v4 = vmul.f32 %v592_v1, %v592_v1  ;;  %v589_v5 = vld [vmem:[%s4723_s1 + $0x60] sm:$0xff]  ;;  %v753_v6 = vmul.f32 %v591_v2, %v591_v2  ;;  %v588_v7 = vld [vmem:[%s4723_s1 + $0x58] sm:$0xff]  ;;  %v752_v8 = vmul.f32 %v590_v3, %v590_v3  ;;  %v587_v9 = vld [vmem:[%s4723_s1 + $0x50] sm:$0xff] }
  0x17   : > { %643 = vmatpush1.msra.mxu0 %v591_v2  ;;  %v751_v10 = vmul.f32 %v589_v5, %v589_v5  ;;  %v586_v11 = vld [vmem:[%s4723_s1 + $0x48] sm:$0xff]  ;;  %v750_v12 = vmul.f32 %v588_v7, %v588_v7  ;;  %v585_v13 = vld [vmem:[%s4723_s1 + $0x40] sm:$0xff]  ;;  %v749_v14 = vmul.f32 %v587_v9, %v587_v9  ;;  %v584_v15 = vld [vmem:[%s4723_s1 + $0x38] sm:$0xff] }
  0x18   : > { %644 = vmatprep.subr.mxu0 %v590_v3  ;;  %771 = vmatprep.subr.mxu1 %v754_v4  ;;  %v583_v16 = vld [vmem:[%s4723_s1 + $0x30] sm:$0xff]  ;;  %v582_v17 = vld [vmem:[%s4723_s1 + $0x28] sm:$0xff]  ;;  %v748_v18 = vmul.f32 %v586_v11, %v586_v11  ;;  %v581_v19 = vld [vmem:[%s4723_s1 + $0x20] sm:$0xff]  ;;  %v747_v20 = vmul.f32 %v585_v13, %v585_v13  ;;  %v746_v22 = vmul.f32 %v584_v15, %v584_v15 }
  0x19   : > { %645 = vmatpush1.msra.mxu0 %v589_v5  ;;  %772 = vmatpush1.msra.mxu1 %v753_v6  ;;  %v4738_v21 = vld [vmem:[%s4723_s1 + $0x18] sm:$0xff]  ;;  %v579_v23 = vld [vmem:[%s4723_s1 + $0x10] sm:$0xff]  ;;  %v745_v24 = vmul.f32 %v583_v16, %v583_v16  ;;  %v4742_v25 = vld [vmem:[%s4723_s1 + $0x8] sm:$0xff]  ;;  %v744_v26 = vmul.f32 %v582_v17, %v582_v17  ;;  %v743_v28 = vmul.f32 %v581_v19, %v581_v19 }
  0x1a   : > { %646 = vmatprep.subr.mxu0 %v588_v7  ;;  %773 = vmatprep.subr.mxu1 %v752_v8  ;;  %v577_v27 = vld [vmem:[%s4723_s1] sm:$0xff]  ;;  %v742_v29 = vmul.f32 %v4738_v21, %v4738_v21  ;;  %v741_v30 = vmul.f32 %v579_v23, %v579_v23  ;;  %v740_v32 = vmul.f32 %v4742_v25, %v4742_v25  ;;  %v594_v34 = vld [vmem:[%s7458_s22 + $0x8] sm:$0xff]  ;;  %v595_v35 = vld [vmem:[%s7458_s22 + $0x10] sm:$0xff] }
  0x1b   : > { %647 = vmatpush1.msra.mxu0 %v587_v9  ;;  %774 = vmatpush1.msra.mxu1 %v751_v10  ;;  %v593_v31 = vld [vmem:[%s7458_s22] sm:$0xff]  ;;  %v739_v33 = vmul.f32 %v577_v27, %v577_v27  ;;  %v596_v36 = vld [vmem:[%s7458_s22 + $0x18] sm:$0xff]  ;;  %v598_v38 = vld [vmem:[%s7458_s22 + $0x28] sm:$0xff] }
  0x1c   : > { %648 = vmatprep.subr.mxu0 %v586_v11  ;;  %775 = vmatprep.subr.mxu1 %v750_v12  ;;  %v597_v37 = vld [vmem:[%s7458_s22 + $0x20] sm:$0xff]  ;;  %v599_v39 = vld [vmem:[%s7458_s22 + $0x30] sm:$0xff]  ;;  %v600_v40 = vld [vmem:[%s7458_s22 + $0x38] sm:$0xff] }
  0x1d   : > { %649 = vmatpush1.msra.mxu0 %v585_v13  ;;  %776 = vmatpush1.msra.mxu1 %v749_v14 }
  0x1e   : > { %650 = vmatprep.subr.mxu0 %v584_v15  ;;  %777 = vmatprep.subr.mxu1 %v748_v18 }
  0x1f   : > { %651 = vmatpush1.msra.mxu0 %v583_v16  ;;  %778 = vmatpush1.msra.mxu1 %v747_v20 }
  0x20   : > { %652 = vmatprep.subr.mxu0 %v582_v17  ;;  %779 = vmatprep.subr.mxu1 %v746_v22 }
  0x21   : > { %653 = vmatpush1.msra.mxu0 %v581_v19  ;;  %780 = vmatpush1.msra.mxu1 %v745_v24  ;;  %v1004_v24 = vld [vmem:[%s7459_s0 + $0x38] sm:$0xff] }
  0x22   : > { %654 = vmatprep.subr.mxu0 %v4738_v21  ;;  %781 = vmatprep.subr.mxu1 %v744_v26  ;;  %v1067_v26 = vld [vmem:[%s7345_s3 + $0x30] sm:$0xff] }
  0x23   : > { %655 = vmatpush1.msra.mxu0 %v579_v23  ;;  %782 = vmatpush1.msra.mxu1 %v743_v28  ;;  %v1068_v28 = vld [vmem:[%s7345_s3 + $0x38] sm:$0xff] }
  0x24   : > { %656 = vmatprep.subr.mxu0 %v4742_v25  ;;  %783 = vmatprep.subr.mxu1 %v742_v29  ;;  %v1000_v29 = vld [vmem:[%s7459_s0 + $0x18] sm:$0xff] }
  0x25   : > { %657 = vmatpush1.msra.mxu0 %v577_v27  ;;  %784 = vmatpush1.msra.mxu1 %v741_v30  ;;  %v1003_v27 = vld [vmem:[%s7459_s0 + $0x30] sm:$0xff]  ;;  %v1001_v30 = vld [vmem:[%s7459_s0 + $0x20] sm:$0xff] }
  0x26   : > { %4234 = vmatmul.mubr.msk.f32.vlgmr.msra.gmra.mxu0 %vm601_vm0, %v593_v31  ;;  %785 = vmatprep.subr.mxu1 %v740_v32  ;;  %v1002_v32 = vld [vmem:[%s7459_s0 + $0x28] sm:$0xff] }
  0x27   : > { %786 = vmatpush1.msra.mxu1 %v739_v33  ;;  %696 = vmatprep.mubr.f32.mxu0 %v4608_v0  ;;  %v998_v33 = vld [vmem:[%s7459_s0 + $0x8] sm:$0xff] }
  0x28   : > { %4242 = vmatmul.mubr.msk.f32.vlgmr.msra.gmra.mxu1 %vm601_vm0, %v593_v31  ;;  %v1064_v31 = vld [vmem:[%s7345_s3 + $0x18] sm:$0xff] }
  0x29   : > { %825 = vmatprep.mubr.f32.mxu1 %v4608_v0 }
  0x2a   : > { %4235 = vmatmul.mubr.msk.f32.gmra.mxu0 %vm601_vm0, %v594_v34 }
  0x2b   : > { %702 = vmatprep.mubr.f32.mxu0 %v4608_v0 }
  0x2c   : > { %4243 = vmatmul.mubr.msk.f32.gmra.mxu1 %vm601_vm0, %v594_v34  ;;  %v1065_v34 = vld [vmem:[%s7345_s3 + $0x20] sm:$0xff] }
  0x2d   : > { %831 = vmatprep.mubr.f32.mxu1 %v4608_v0 }
  0x2e   : > { %4236 = vmatmul.mubr.msk.f32.gmra.mxu0 %vm601_vm0, %v595_v35 }
  0x2f   : > { %708 = vmatprep.mubr.f32.mxu0 %v4608_v0 }
  0x30   : > { %4244 = vmatmul.mubr.msk.f32.gmra.mxu1 %vm601_vm0, %v595_v35  ;;  %v1062_v35 = vld [vmem:[%s7345_s3 + $0x8] sm:$0xff] }
  0x31   : > { %837 = vmatprep.mubr.f32.mxu1 %v4608_v0 }
  0x32   : > { %4237 = vmatmul.mubr.msk.f32.gmra.mxu0 %vm601_vm0, %v596_v36 }
  0x33   : > { %714 = vmatprep.mubr.f32.mxu0 %v4608_v0 }
  0x34   : > { %4245 = vmatmul.mubr.msk.f32.gmra.mxu1 %vm601_vm0, %v596_v36  ;;  %v1066_v36 = vld [vmem:[%s7345_s3 + $0x28] sm:$0xff] }
  0x35   : > { %843 = vmatprep.mubr.f32.mxu1 %v4608_v0 }
  0x36   : > { %4238 = vmatmul.mubr.msk.f32.gmra.mxu0 %vm601_vm0, %v597_v37 }
  0x37   : > { %720 = vmatprep.mubr.f32.mxu0 %v4608_v0 }
  0x38   : > { %4246 = vmatmul.mubr.msk.f32.gmra.mxu1 %vm601_vm0, %v597_v37  ;;  %v1142_v37 = vld [vmem:[%s7347_s5 + $0x8] sm:$0xff] }
  0x39   : > { %849 = vmatprep.mubr.f32.mxu1 %v4608_v0 }
  0x3a   : > { %4239 = vmatmul.mubr.msk.f32.gmra.mxu0 %vm601_vm0, %v598_v38 }
  0x3b   : > { %726 = vmatprep.mubr.f32.mxu0 %v4608_v0 }
  0x3c   : > { %4247 = vmatmul.mubr.msk.f32.gmra.mxu1 %vm601_vm0, %v598_v38  ;;  %v999_v38 = vld [vmem:[%s7459_s0 + $0x10] sm:$0xff] }
  0x3d   : > { %855 = vmatprep.mubr.f32.mxu1 %v4608_v0 }
  0x3e   : > { %4240 = vmatmul.mubr.msk.f32.gmra.mxu0 %vm601_vm0, %v599_v39 }
  0x3f   : > { %732 = vmatprep.mubr.f32.mxu0 %v4608_v0 }
  0x40   : > { %4248 = vmatmul.mubr.msk.f32.gmra.mxu1 %vm601_vm0, %v599_v39  ;;  %v1144_v39 = vld [vmem:[%s7347_s5 + $0x18] sm:$0xff] }
  0x41   : > { %861 = vmatprep.mubr.f32.mxu1 %v4608_v0 }
  0x42   : > { %4241 = vmatmul.mubr.msk.f32.gmra.mxu0 %vm601_vm0, %v600_v40 }
  0x43   : > { %1253 = vmatprep.mubr.bf16.mxu0 %v7364_v41 }
  0x44   : > { %4249 = vmatmul.mubr.msk.f32.gmra.mxu1 %vm601_vm0, %v600_v40  ;;  %v1146_v40 = vld [vmem:[%s7347_s5 + $0x28] sm:$0xff] }
  0x45   : > { %2891 = vmatprep.mubr.bf16.mxu1 %v7364_v41 }
  0xe6   : > { %v692_v42 = vpop.f32.mrf.mxu0 }
  0xe8   : > { %v694_v43 = vpop.f32.mrf.mxu0  ;;  %v821_v44 = vpop.f32.mrf.mxu1 }
  0xe9   : > { %v868_v45 = vadd.f32 %v694_v43, %v692_v42  ;;  %v1148_v42 = vld [vmem:[%s7347_s5 + $0x38] sm:$0xff]  ;;  %v1408_v43 = vld [vmem:[%s7348_s6 + $0x8] sm:$0xff] }
  0xea   : > { %v698_v46 = vpop.f32.mrf.mxu0  ;;  %v823_v47 = vpop.f32.mrf.mxu1 }
  0xeb   : > { %869 = vadd.xlane.f32.xlu0 %v868_v45  ;;  %v901_v50 = vadd.f32 %v823_v47, %v821_v44  ;;  %v1471_v44 = vld [vmem:[%s7349_s7] sm:$0xff]  ;;  %v1410_v45 = vld [vmem:[%s7348_s6 + $0x18] sm:$0xff]  ;;  %v1412_v47 = vld [vmem:[%s7348_s6 + $0x28] sm:$0xff] }
  0xec   : > { %v700_v48 = vpop.f32.mrf.mxu0  ;;  %v827_v49 = vpop.f32.mrf.mxu1 }
  0xed   : > { %v871_v51 = vadd.f32 %v700_v48, %v698_v46  ;;  %v1411_v46 = vld [vmem:[%s7348_s6 + $0x20] sm:$0xff] }
  0xee   : > { %v704_v52 = vpop.f32.mrf.mxu0  ;;  %v829_v53 = vpop.f32.mrf.mxu1 }
  0xef   : > { %902 = vadd.xlane.f32.xlu0 %v901_v50  ;;  %872 = vadd.xlane.f32.xlu1 %v871_v51  ;;  %v904_v56 = vadd.f32 %v829_v53, %v827_v49  ;;  %v1413_v49 = vld [vmem:[%s7348_s6 + $0x30] sm:$0xff]  ;;  %v1478_v53 = vld [vmem:[%s7349_s7 + $0x38] sm:$0xff] }
  0xf0   : > { %v706_v54 = vpop.f32.mrf.mxu0  ;;  %v833_v55 = vpop.f32.mrf.mxu1 }
  0xf1   : > { %v874_v57 = vadd.f32 %v706_v54, %v704_v52  ;;  %v1414_v52 = vld [vmem:[%s7348_s6 + $0x38] sm:$0xff]  ;;  %v1664_v54 = vld [vmem:[%s7350_s8 + $0x8] sm:$0xff] }
  0xf2   : > { %v710_v58 = vpop.f32.mrf.mxu0  ;;  %v835_v59 = vpop.f32.mrf.mxu1 }
  0xf3   : > { %905 = vadd.xlane.f32.xlu1 %v904_v56  ;;  %875 = vadd.xlane.f32.xlu0 %v874_v57  ;;  %v907_v62 = vadd.f32 %v835_v59, %v833_v55  ;;  %v1727_v55 = vld [vmem:[%s7351_s9] sm:$0xff]  ;;  %v1063_v56 = vld [vmem:[%s7345_s3 + $0x10] sm:$0xff]  ;;  %v1666_v57 = vld [vmem:[%s7350_s8 + $0x18] sm:$0xff] }
  0xf4   : > { %v712_v60 = vpop.f32.mrf.mxu0  ;;  %v839_v61 = vpop.f32.mrf.mxu1  ;;  %v1667_v59 = vld [vmem:[%s7350_s8 + $0x20] sm:$0xff] }
  0xf5   : > { %v877_v63 = vadd.f32 %v712_v60, %v710_v58  ;;  %v997_v58 = vld [vmem:[%s7459_s0] sm:$0xff] }
  0xf6   : > { %v716_v0 = vpop.f32.mrf.mxu0  ;;  %v841_v1 = vpop.f32.mrf.mxu1  ;;  %v1061_v60 = vld [vmem:[%s7345_s3] sm:$0xff] }
  0xf7   : > { %908 = vadd.xlane.f32.xlu0 %v907_v62  ;;  %878 = vadd.xlane.f32.xlu1 %v877_v63  ;;  %v910_v4 = vadd.f32 %v841_v1, %v839_v61  ;;  %v1668_v61 = vld [vmem:[%s7350_s8 + $0x28] sm:$0xff]  ;;  %v1141_v62 = vld [vmem:[%s7347_s5] sm:$0xff]  ;;  %v1669_v63 = vld [vmem:[%s7350_s8 + $0x30] sm:$0xff] }
  0xf8   : > { %v718_v2 = vpop.f32.mrf.mxu0  ;;  %v845_v3 = vpop.f32.mrf.mxu1  ;;  %v1670_v1 = vld [vmem:[%s7350_s8 + $0x38] sm:$0xff] }
  0xf9   : > { %v880_v5 = vadd.f32 %v718_v2, %v716_v0  ;;  %v1143_v0 = vld [vmem:[%s7347_s5 + $0x10] sm:$0xff]  ;;  %v1145_v2 = vld [vmem:[%s7347_s5 + $0x20] sm:$0xff] }
  0xfa   : > { %v722_v6 = vpop.f32.mrf.mxu0  ;;  %v847_v7 = vpop.f32.mrf.mxu1 }
  0xfb   : > { %911 = vadd.xlane.f32.xlu1 %v910_v4  ;;  %881 = vadd.xlane.f32.xlu0 %v880_v5  ;;  %v913_v10 = vadd.f32 %v847_v7, %v845_v3  ;;  %v1734_v3 = vld [vmem:[%s7351_s9 + $0x38] sm:$0xff]  ;;  %v1147_v4 = vld [vmem:[%s7347_s5 + $0x30] sm:$0xff] }
  0xfc   : > { %v724_v8 = vpop.f32.mrf.mxu0  ;;  %v851_v9 = vpop.f32.mrf.mxu1  ;;  %v1926_v5 = vld [vmem:[%s7352_s10 + $0x38] sm:$0xff] }
  0xfd   : > { %v883_v11 = vadd.f32 %v724_v8, %v722_v6  ;;  %v1407_v6 = vld [vmem:[%s7348_s6] sm:$0xff]  ;;  %v1990_v7 = vld [vmem:[%s7353_s11 + $0x38] sm:$0xff]  ;;  %v1409_v8 = vld [vmem:[%s7348_s6 + $0x10] sm:$0xff] }
  0xfe   : > { %v728_v12 = vpop.f32.mrf.mxu0  ;;  %v853_v13 = vpop.f32.mrf.mxu1 }
  0xff   : > { %914 = vadd.xlane.f32.xlu0 %v913_v10  ;;  %884 = vadd.xlane.f32.xlu1 %v883_v11  ;;  %v916_v16 = vadd.f32 %v853_v13, %v851_v9  ;;  %v1924_v9 = vld [vmem:[%s7352_s10 + $0x28] sm:$0xff] }
 0x100   : > { %v730_v14 = vpop.f32.mrf.mxu0  ;;  %v857_v15 = vpop.f32.mrf.mxu1  ;;  %v1988_v13 = vld [vmem:[%s7353_s11 + $0x28] sm:$0xff] }
 0x101   : > { %v886_v17 = vadd.f32 %v730_v14, %v728_v12  ;;  %v1472_v12 = vld [vmem:[%s7349_s7 + $0x8] sm:$0xff] }
 0x102   : > { %v734_v18 = vpop.f32.mrf.mxu0  ;;  %v859_v19 = vpop.f32.mrf.mxu1 }
 0x103   : > { %917 = vadd.xlane.f32.xlu1 %v916_v16  ;;  %887 = vadd.xlane.f32.xlu0 %v886_v17  ;;  %v919_v22 = vadd.f32 %v859_v19, %v857_v15  ;;  %v1473_v15 = vld [vmem:[%s7349_s7 + $0x10] sm:$0xff]  ;;  %v1922_v16 = vld [vmem:[%s7352_s10 + $0x18] sm:$0xff] }
 0x104   : > { %v736_v20 = vpop.f32.mrf.mxu0  ;;  %v863_v48 = vpop.f32.mrf.mxu1  ;;  %v1986_v19 = vld [vmem:[%s7353_s11 + $0x18] sm:$0xff] }
 0x105   : > { %v889_v23 = vadd.f32 %v736_v20, %v734_v18  ;;  %v1474_v18 = vld [vmem:[%s7349_s7 + $0x18] sm:$0xff] }
 0x106   : > { %v865_v50 = vpop.f32.mrf.mxu1 }
 0x107   : > { %920 = vadd.xlane.f32.xlu1 %v919_v22  ;;  %890 = vadd.xlane.f32.xlu0 %v889_v23  ;;  %v922_v51 = vadd.f32 %v865_v50, %v863_v48  ;;  %v1475_v23 = vld [vmem:[%s7349_s7 + $0x20] sm:$0xff]  ;;  %v1730_v48 = vld [vmem:[%s7351_s9 + $0x18] sm:$0xff]  ;;  %v2156_v50 = vld [vmem:[%s7355_s13 + $0x128] sm:$0xff] }
 0x118   : > { %1042 = vperm.xlu1 %4361, %v1004_v24   ;;  %v1920_v24 = vld [vmem:[%s7352_s10 + $0x8] sm:$0xff] }
 0x11c   : > { %1101 = vperm.xlu1 %4361, %v1067_v26  }
 0x11d   : > { %1037 = vperm.xlu0 %4360, %v1003_v27   ;;  %v1476_v27 = vld [vmem:[%s7349_s7 + $0x28] sm:$0xff] }
 0x120   : > { %1106 = vperm.xlu1 %4361, %v1068_v28   ;;  %v1984_v28 = vld [vmem:[%s7353_s11 + $0x8] sm:$0xff] }
 0x121   : > { %1022 = vperm.xlu0 %4360, %v1000_v29  }
 0x124   : > { %1027 = vperm.xlu1 %4361, %v1001_v30   ;;  %v1477_v30 = vld [vmem:[%s7349_s7 + $0x30] sm:$0xff] }
 0x125   : > { %1086 = vperm.xlu0 %4360, %v1064_v31   ;;  %v2166_v31 = vld [vmem:[%s7355_s13 + $0x178] sm:$0xff] }
 0x128   : > { %1032 = vperm.xlu1 %4361, %v1002_v32  }
 0x129   : > { %1012 = vperm.xlu0 %4360, %v998_v33  }
 0x12c   : > { %1091 = vperm.xlu1 %4361, %v1065_v34   ;;  %v1663_v34 = vld [vmem:[%s7350_s8] sm:$0xff] }
 0x12d   : > { %1076 = vperm.xlu0 %4360, %v1062_v35   ;;  %v2164_v35 = vld [vmem:[%s7355_s13 + $0x168] sm:$0xff] }
 0x130   : > { %1096 = vperm.xlu1 %4361, %v1066_v36  }
 0x131   : > { %1156 = vperm.xlu0 %4360, %v1142_v37   ;;  %v1665_v37 = vld [vmem:[%s7350_s8 + $0x10] sm:$0xff] }
 0x134   : > { %1017 = vperm.xlu1 %4361, %v999_v38  }
 0x135   : > { %1166 = vperm.xlu0 %4360, %v1144_v39   ;;  %v2162_v39 = vld [vmem:[%s7355_s13 + $0x158] sm:$0xff] }
 0x139   : > { %1176 = vperm.xlu0 %4360, %v1146_v40  }
 0x13d   : > { %1186 = vperm.xlu0 %4360, %v1148_v42   ;;  %v1728_v42 = vld [vmem:[%s7351_s9 + $0x8] sm:$0xff] }
 0x141   : > { %1422 = vperm.xlu0 %4360, %v1408_v43   ;;  %v2160_v43 = vld [vmem:[%s7355_s13 + $0x148] sm:$0xff] }
 0x145   : > { %1481 = vperm.xlu0 %4360, %v1471_v44  }
 0x149   : > { %1432 = vperm.xlu0 %4360, %v1410_v45  }
 0x14d   : > { %1437 = vperm.xlu0 %4360, %v1411_v46   ;;  %v1729_v46 = vld [vmem:[%s7351_s9 + $0x10] sm:$0xff] }
 0x151   : > { %1442 = vperm.xlu0 %4360, %v1412_v47   ;;  %v2158_v47 = vld [vmem:[%s7355_s13 + $0x138] sm:$0xff] }
 0x155   : > { %1447 = vperm.xlu0 %4360, %v1413_v49  }
 0x158   : > { %923 = vadd.xlane.f32.xlu1 %v922_v51 }
 0x159   : > { %1452 = vperm.xlu0 %4360, %v1414_v52   ;;  %v1731_v52 = vld [vmem:[%s7351_s9 + $0x20] sm:$0xff] }
 0x15d   : > { %1516 = vperm.xlu0 %4360, %v1478_v53   ;;  %v2154_v53 = vld [vmem:[%s7355_s13 + $0x118] sm:$0xff] }
 0x161   : > { %1678 = vperm.xlu0 %4360, %v1664_v54  }
 0x165   : > { %1737 = vperm.xlu0 %4360, %v1727_v55  }
 0x169   : > { %1081 = vperm.xlu1 %4361, %v1063_v56   ;;  %1688 = vperm.xlu0 %4360, %v1666_v57   ;;  %v1732_v56 = vld [vmem:[%s7351_s9 + $0x28] sm:$0xff] }
 0x16a   : > { %v2152_v57 = vld [vmem:[%s7355_s13 + $0x108] sm:$0xff] }
 0x16d   : > { %1007 = vperm.xlu1 %4361, %v997_v58   ;;  %1693 = vperm.xlu0 %4360, %v1667_v59   ;;  %v1733_v58 = vld [vmem:[%s7351_s9 + $0x30] sm:$0xff] }
 0x171   : > { %1071 = vperm.xlu1 %4361, %v1061_v60   ;;  %1698 = vperm.xlu0 %4360, %v1668_v61   ;;  %v2134_v60 = vld [vmem:[%s7355_s13 + $0x78] sm:$0xff] }
 0x174   : > { %v4944_v10 = vpop.xlane.xlu0 %869 }
 0x175   : > { %1151 = vperm.xlu1 %4361, %v1141_v62   ;;  %1703 = vperm.xlu0 %4360, %v1669_v63   ;;  %v1925_v62 = vld [vmem:[%s7352_s10 + $0x30] sm:$0xff]  ;;  %v2182_v63 = vld [vmem:[%s7355_s13 + $0x1f8] sm:$0xff] }
 0x178   : > { %v4946_v11 = vpop.xlane.xlu1 %872  ;;  %v4954_v14 = vpop.xlane.xlu0 %902 }
 0x179   : > { %1161 = vperm.xlu1 %4361, %v1143_v0   ;;  %1708 = vperm.xlu0 %4360, %v1670_v1  }
 0x17c   : > { %v4962_v17 = vpop.xlane.xlu1 %905  ;;  %v4970_v20 = vpop.xlane.xlu0 %875 }
 0x17d   : > { %1171 = vperm.xlu1 %4361, %v1145_v2   ;;  %1772 = vperm.xlu0 %4360, %v1734_v3   ;;  %v1989_v2 = vld [vmem:[%s7353_s11 + $0x30] sm:$0xff]  ;;  %v2132_v3 = vld [vmem:[%s7355_s13 + $0x68] sm:$0xff] }
 0x180   : > { %v4972_v22 = vpop.xlane.xlu1 %878  ;;  %v4980_v26 = vpop.xlane.xlu0 %908 }
 0x181   : > { %1181 = vperm.xlu1 %4361, %v1147_v4   ;;  %1964 = vperm.xlu0 %4360, %v1926_v5   ;;  %v1923_v4 = vld [vmem:[%s7352_s10 + $0x20] sm:$0xff] }
 0x184   : > { %v4988_v29 = vpop.xlane.xlu1 %911  ;;  %v4996_v32 = vpop.xlane.xlu0 %881 }
 0x185   : > { %1417 = vperm.xlu1 %4361, %v1407_v6   ;;  %2028 = vperm.xlu0 %4360, %v1990_v7   ;;  %v2180_v6 = vld [vmem:[%s7355_s13 + $0x1e8] sm:$0xff] }
 0x188   : > { %v4998_v33 = vpop.xlane.xlu1 %884  ;;  %v5006_v36 = vpop.xlane.xlu0 %914 }
 0x189   : > { %1427 = vperm.xlu1 %4361, %v1409_v8   ;;  %1954 = vperm.xlu0 %4360, %v1924_v9   ;;  %v1987_v8 = vld [vmem:[%s7353_s11 + $0x20] sm:$0xff]  ;;  %v2130_v9 = vld [vmem:[%s7355_s13 + $0x58] sm:$0xff] }
 0x18c   : > { %v5011_v38 = vpop.xlane.xlu1 %917  ;;  %v888_v40 = vpop.xlane.xlu0 %887 }
 0x18d   : > { %1486 = vperm.xlu1 %4361, %v1472_v12   ;;  %2018 = vperm.xlu0 %4360, %v1988_v13   ;;  %v5098_v12 = vmul.f32 0.00390625, %v888_v40  ;;  %v5133_v40 = vmul.f32 0.00390625, %v4970_v20 }
 0x190   : > { %v921_v44 = vpop.xlane.xlu1 %920  ;;  %v5022_v45 = vpop.xlane.xlu0 %890 }
 0x191   : > { %1491 = vperm.xlu1 %4361, %v1473_v15   ;;  %1944 = vperm.xlu0 %4360, %v1922_v16   ;;  %v1921_v16 = vld [vmem:[%s7352_s10 + $0x10] sm:$0xff] }
 0x194   : > { %v5033_v49 = vpop.permute.xlu1 %1042 }
 0x195   : > { %1496 = vperm.xlu1 %4361, %v1474_v18   ;;  %2008 = vperm.xlu0 %4360, %v1986_v19   ;;  %v2178_v18 = vld [vmem:[%s7355_s13 + $0x1d8] sm:$0xff]  ;;  %v931_v19 = vmul.f32 0.00390625, %v921_v44 }
 0x198   : > { %v5038_v51 = vpop.permute.xlu0 %1037  ;;  %v5046_v54 = vpop.permute.xlu1 %1101 }
 0x199   : > { %1501 = vperm.xlu1 %4361, %v1475_v23   ;;  %1934 = vperm.xlu0 %4360, %v1920_v24   ;;  %v939_v23 = vmul.f32 %v5098_v12, %v5098_v12  ;;  %v1985_v24 = vld [vmem:[%s7353_s11 + $0x10] sm:$0xff] }
 0x19c   : > { %v5048_v55 = vpop.permute.xlu0 %1022  ;;  %v5059_v59 = vpop.permute.xlu1 %1106 }
 0x19d   : > { %1506 = vperm.xlu1 %4361, %v1476_v27   ;;  %1998 = vperm.xlu0 %4360, %v1984_v28   ;;  %v2128_v28 = vld [vmem:[%s7355_s13 + $0x48] sm:$0xff] }
 0x1a0   : > { %v5064_v61 = vpop.permute.xlu0 %1086  ;;  %v5072_v0 = vpop.permute.xlu1 %1027 }
 0x1a1   : > { %1511 = vperm.xlu1 %4361, %v1477_v30   ;;  %2420 = vperm.xlu0 %4360, %v2166_v31   ;;  %v5121_v30 = vmul.f32 0.00390625, %v4998_v33  ;;  %v929_v33 = vmul.f32 0.00390625, %v5006_v36 }
 0x1a4   : > { %v5074_v1 = vpop.permute.xlu0 %1012  ;;  %v5085_v5 = vpop.permute.xlu1 %1032 }
 0x1a5   : > { %1673 = vperm.xlu1 %4361, %v1663_v34   ;;  %2410 = vperm.xlu0 %4360, %v2164_v35   ;;  %v5126_v34 = vmul.f32 0.00390625, %v4996_v32  ;;  %v947_v35 = vsub.f32 %v931_v19, %v939_v23  ;;  %v938_v32 = vmul.f32 %v5121_v30, %v5121_v30 }
 0x1a7   : > { %v937_v44 = vmul.f32 %v5126_v34, %v5126_v34 }
 0x1a8   : > { %v5090_v7 = vpop.permute.xlu0 %1076  ;;  %v5100_v13 = vpop.permute.xlu1 %1091 }
 0x1a9   : > { %1683 = vperm.xlu1 %4361, %v1665_v37   ;;  %2400 = vperm.xlu0 %4360, %v2162_v39   ;;  %v930_v37 = vmul.f32 0.00390625, %v5011_v38  ;;  %v1919_v39 = vld [vmem:[%s7352_s10] sm:$0xff]  ;;  %v5143_v38 = vmul.f32 0.00390625, %v4972_v22  ;;  %v5158_v22 = vmul.f32 0.00390625, %v4944_v10 }
 0x1ab   : > { %v946_v36 = vsub.f32 %v930_v37, %v938_v32 }
 0x1ac   : > { %v5102_v15 = vpop.permute.xlu0 %1156  ;;  %v5115_v27 = vpop.permute.xlu1 %1096 }
 0x1ad   : > { %1742 = vperm.xlu1 %4361, %v1728_v42   ;;  %2390 = vperm.xlu0 %4360, %v2160_v43   ;;  %v2176_v42 = vld [vmem:[%s7355_s13 + $0x1c8] sm:$0xff]  ;;  %v927_v43 = vmul.f32 0.00390625, %v4980_v26  ;;  %v1983_v26 = vld [vmem:[%s7353_s11] sm:$0xff] }
 0x1b0   : > { %v5123_v31 = vpop.permute.xlu0 %1166  ;;  %v5147_v20 = vpop.permute.xlu1 %1017 }
 0x1b1   : > { %1747 = vperm.xlu1 %4361, %v1729_v46   ;;  %2380 = vperm.xlu0 %4360, %v2158_v47   ;;  %v971_v46 = vadd.f32 1e-06, %v947_v35  ;;  %v5150_v47 = vmul.f32 0.00390625, %v5022_v45  ;;  %v2126_v45 = vld [vmem:[%s7355_s13 + $0x38] sm:$0xff] }
 0x1b3   : > { %4414 = vrsqrt.f32 %v971_v46 }
 0x1b5   : > { %1752 = vperm.xlu1 %4361, %v1730_v48   ;;  %2370 = vperm.xlu0 %4360, %v2156_v50   ;;  %v5152_v48 = vpop.permute.xlu0 %1176  ;;  %v935_v50 = vmul.f32 %v5133_v40, %v5133_v40 }
 0x1b9   : > { %1757 = vperm.xlu1 %4361, %v1731_v52   ;;  %2360 = vperm.xlu0 %4360, %v2154_v53   ;;  %v928_v52 = vmul.f32 0.00390625, %v4988_v29  ;;  %v945_v53 = vsub.f32 %v929_v33, %v937_v44  ;;  %v940_v29 = vmul.f32 %v5150_v47, %v5150_v47  ;;  %v2161_v33 = vld [vmem:[%s7355_s13 + $0x150] sm:$0xff] }
 0x1bd   : > { %1762 = vperm.xlu1 %4361, %v1732_v56   ;;  %2350 = vperm.xlu0 %4360, %v2152_v57   ;;  %v925_v56 = vmul.f32 0.00390625, %v4954_v14  ;;  %v943_v57 = vsub.f32 %v927_v43, %v935_v50  ;;  %v2165_v14 = vld [vmem:[%s7355_s13 + $0x170] sm:$0xff]  ;;  %v4570_v43 = vld [vmem:[%s4723_s1 + $0x60] sm:$0xff] }
 0x1be   : > { %v961_v44 = vsub.f32 %v4570_v43, %v5098_v12  ;;  %v2159_v50 = vld [vmem:[%s7355_s13 + $0x140] sm:$0xff] }
 0x1c0   : > { %v4415_v46 = vpop.eup %4414 }
 0x1c1   : > { %1767 = vperm.xlu1 %4361, %v1733_v58   ;;  %2260 = vperm.xlu0 %4360, %v2134_v60   ;;  %v936_v58 = vmul.f32 %v5143_v38, %v5143_v38  ;;  %v5170_v60 = vmul.f32 0.00390625, %v4946_v11  ;;  %v2174_v11 = vld [vmem:[%s7355_s13 + $0x1b8] sm:$0xff] }
 0x1c3   : > { %v934_v19 = vmul.f32 %v5170_v60, %v5170_v60 }
 0x1c5   : > { %1959 = vperm.xlu1 %4361, %v1925_v62   ;;  %2500 = vperm.xlu0 %4360, %v2182_v63   ;;  %v970_v62 = vadd.f32 1e-06, %v946_v36  ;;  %v4571_v36 = vld [vmem:[%s4723_s1 + $0x68] sm:$0xff] }
 0x1c7   : > { %4416 = vrsqrt.f32 %v970_v62 }
 0x1c9   : > { %2023 = vperm.xlu1 %4361, %v1989_v2   ;;  %2250 = vperm.xlu0 %4360, %v2132_v3   ;;  %v933_v2 = vmul.f32 %v5158_v22, %v5158_v22  ;;  %v944_v3 = vsub.f32 %v928_v52, %v936_v58  ;;  %v2122_v52 = vld [vmem:[%s7355_s13 + $0x18] sm:$0xff] }
 0x1cd   : > { %1949 = vperm.xlu1 %4361, %v1923_v4   ;;  %2490 = vperm.xlu0 %4360, %v2180_v6   ;;  %v969_v4 = vadd.f32 1e-06, %v945_v53  ;;  %v926_v6 = vmul.f32 0.00390625, %v4962_v17  ;;  %v2124_v17 = vld [vmem:[%s7355_s13 + $0x28] sm:$0xff] }
 0x1cf   : > { %4418 = vrsqrt.f32 %v969_v4  ;;  %v942_v35 = vsub.f32 %v926_v6, %v934_v19  ;;  %v4574_v4 = vld [vmem:[%s4723_s1 + $0x78] sm:$0xff]  ;;  %v4576_v19 = vld [vmem:[%s4723_s1 + $0x48] sm:$0xff] }
 0x1d1   : > { %2013 = vperm.xlu1 %4361, %v1987_v8   ;;  %2240 = vperm.xlu0 %4360, %v2130_v9   ;;  %v5183_v8 = vpop.permute.xlu0 %1186  ;;  %v966_v32 = vadd.f32 1e-06, %v942_v35 }
 0x1d5   : > { %1939 = vperm.xlu1 %4361, %v1921_v16   ;;  %2480 = vperm.xlu0 %4360, %v2178_v18   ;;  %v941_v16 = vsub.f32 %v925_v56, %v933_v2  ;;  %v967_v18 = vadd.f32 1e-06, %v943_v57  ;;  %v4417_v57 = vpop.eup %4416  ;;  %v4573_v2 = vld [vmem:[%s4723_s1 + $0x70] sm:$0xff] }
 0x1d7   : > { %v965_v37 = vadd.f32 1e-06, %v941_v16  ;;  %v4575_v16 = vld [vmem:[%s4723_s1 + $0x20] sm:$0xff] }
 0x1d9   : > { %2003 = vperm.xlu1 %4361, %v1985_v24   ;;  %2230 = vperm.xlu0 %4360, %v2128_v28   ;;  %v2163_v24 = vld [vmem:[%s7355_s13 + $0x160] sm:$0xff]  ;;  %v968_v28 = vadd.f32 1e-06, %v944_v3  ;;  %v963_v3 = vsub.f32 %v4573_v2, %v5150_v47 }
 0x1dc   : > { %v4419_v62 = vpop.eup %4418 }
 0x1dd   : > { %1929 = vperm.xlu1 %4361, %v1919_v39   ;;  %2470 = vperm.xlu0 %4360, %v2176_v42   ;;  %v5193_v39 = vpop.permute.xlu0 %1422  ;;  %v2172_v42 = vld [vmem:[%s7355_s13 + $0x1a8] sm:$0xff] }
 0x1e1   : > { %1993 = vperm.xlu1 %4361, %v1983_v26   ;;  %v924_v10 = vpop.xlane.xlu1 %923  ;;  %2220 = vperm.xlu0 %4360, %v2126_v45   ;;  %v962_v26 = vsub.f32 %v4571_v36, %v5098_v12  ;;  %v5211_v53 = vpop.permute.xlu0 %1481  ;;  %v993_v45 = vmul.f32 %v4415_v46, %v961_v44  ;;  %v2157_v12 = vld [vmem:[%s7355_s13 + $0x130] sm:$0xff]  ;;  %v4578_v44 = vld [vmem:[%s4723_s1 + $0x38] sm:$0xff] }
 0x1e2   : > { %v932_v63 = vmul.f32 0.00390625, %v924_v10  ;;  %v2170_v10 = vld [vmem:[%s7355_s13 + $0x198] sm:$0xff]  ;;  %v4579_v36 = vld [vmem:[%s4723_s1 + $0x50] sm:$0xff] }
 0x1e3   : > { %v994_v56 = vmul.f32 %v4415_v46, %v962_v26  ;;  %v956_v46 = vsub.f32 %v4578_v44, %v5143_v38 }
 0x1e4   : > { %v948_v9 = vsub.f32 %v932_v63, %v940_v29  ;;  %v950_v63 = vsub.f32 %v4742_v25, %v5158_v22  ;;  %v4572_v29 = vld [vmem:[%s4723_s1 + $0x58] sm:$0xff] }
 0x1e5   : > { %2415 = vperm.xlu1 %4361, %v2165_v14   ;;  %2460 = vperm.xlu0 %4360, %v2174_v11   ;;  %v5216_v58 = vpop.permute.xlu1 %1081  ;;  %v960_v14 = vsub.f32 %v4572_v29, %v5121_v30  ;;  %v964_v11 = vsub.f32 %v4574_v4, %v5150_v47  ;;  %v5237_v35 = vpop.permute.xlu0 %1432 }
 0x1e6   : > { %v972_v23 = vadd.f32 1e-06, %v948_v9  ;;  %v952_v9 = vsub.f32 %v4738_v21, %v5170_v60  ;;  %v2133_v21 = vld [vmem:[%s7355_s13 + $0x70] sm:$0xff] }
 0x1e7   : > { %v992_v47 = vmul.f32 %v4417_v57, %v960_v14 }
 0x1e8   : > { %4420 = vrsqrt.f32 %v972_v23  ;;  %v958_v23 = vsub.f32 %v4576_v19, %v5126_v34  ;;  %v4581_v19 = vld [vmem:[%s4723_s1 + $0x30] sm:$0xff] }
 0x1e9   : > { %4422 = vrsqrt.f32 %v967_v18  ;;  %2405 = vperm.xlu1 %4361, %v2163_v24   ;;  %2210 = vperm.xlu0 %4360, %v2124_v17   ;;  %v953_v18 = vsub.f32 %v4575_v16, %v5133_v40  ;;  %v1057_v24 = vmul.f32 %v5038_v51, %v993_v45  ;;  %v1058_v17 = vmul.f32 %v5038_v51, %v994_v56  ;;  %v4580_v45 = vld [vmem:[%s4723_s1 + $0x40] sm:$0xff] }
 0x1ea   : > { %4424 = vrsqrt.f32 %v968_v28  ;;  %v959_v51 = vsub.f32 %v4579_v36, %v5121_v30  ;;  %v990_v26 = vmul.f32 %v4419_v62, %v958_v23  ;;  %v957_v56 = vsub.f32 %v4580_v45, %v5126_v34 }
 0x1eb   : > { %4426 = vrsqrt.f32 %v965_v37  ;;  %v2155_v37 = vld [vmem:[%s7355_s13 + $0x120] sm:$0xff]  ;;  %v1121_v29 = vadd.f32 %v5046_v54, %v1057_v24 }
 0x1ec   : > { %4428 = vrsqrt.f32 %v966_v32  ;;  %v4577_v32 = vld [vmem:[%s4723_s1 + $0x28] sm:$0xff]  ;;  %v1054_v30 = vmul.f32 %v5072_v0, %v990_v26  ;;  %v991_v14 = vmul.f32 %v4417_v57, %v959_v51  ;;  %v955_v57 = vsub.f32 %v4581_v19, %v5143_v38  ;;  %v4582_v51 = vld [vmem:[%s4723_s1] sm:$0xff]  ;;  %v2150_v26 = vld [vmem:[%s7355_s13 + $0xf8] sm:$0xff] }
 0x1ed   : > { %2395 = vperm.xlu1 %4361, %v2161_v33   ;;  %2450 = vperm.xlu0 %4360, %v2172_v42   ;;  %v954_v43 = vsub.f32 %v4577_v32, %v5133_v40  ;;  %v989_v24 = vmul.f32 %v4419_v62, %v957_v56  ;;  %v2131_v19 = vld [vmem:[%s7355_s13 + $0x60] sm:$0xff] }
 0x1ef   : > { %v1053_v38 = vmul.f32 %v5072_v0, %v989_v24  ;;  %v2151_v0 = vld [vmem:[%s7355_s13 + $0x100] sm:$0xff] }
 0x1f0   : > { %v2179_v24 = vld [vmem:[%s7355_s13 + $0x1e0] sm:$0xff] }
 0x1f1   : > { %2385 = vperm.xlu1 %4361, %v2159_v50   ;;  %2200 = vperm.xlu0 %4360, %v2122_v52   ;;  %v2120_v50 = vld [vmem:[%s7355_s13 + $0x8] sm:$0xff]  ;;  %v1117_v25 = vadd.f32 %v5100_v13, %v1053_v38  ;;  %v2138_v38 = vld [vmem:[%s7355_s13 + $0x98] sm:$0xff] }
 0x1f5   : > { %v4421_v6 = vpop.eup %4420  ;;  %2375 = vperm.xlu1 %4361, %v2157_v12   ;;  %2440 = vperm.xlu0 %4360, %v2170_v10   ;;  %v1056_v12 = vmul.f32 %v5085_v5, %v992_v47  ;;  %v1055_v47 = vmul.f32 %v5085_v5, %v991_v14 }
 0x1f6   : > { %v4423_v28 = vpop.eup %4422  ;;  %v996_v33 = vmul.f32 %v4421_v6, %v964_v11  ;;  %v995_v42 = vmul.f32 %v4421_v6, %v963_v3  ;;  %v1008_v3 = vpop.permute.xlu1 %1007  ;;  %v1122_v11 = vadd.f32 %v5046_v54, %v1058_v17  ;;  %v2153_v6 = vld [vmem:[%s7355_s13 + $0x110] sm:$0xff]  ;;  %v2168_v54 = vld [vmem:[%s7355_s13 + $0x188] sm:$0xff]  ;;  %v1118_v17 = vadd.f32 %v5100_v13, %v1054_v30 }
 0x1f7   : > { %v4425_v52 = vpop.eup %4424  ;;  %v986_v2 = vmul.f32 %v4423_v28, %v954_v43  ;;  %v1120_v34 = vadd.f32 %v5115_v27, %v1056_v12  ;;  %v1119_v62 = vadd.f32 %v5115_v27, %v1055_v47  ;;  %v985_v43 = vmul.f32 %v4423_v28, %v953_v18  ;;  %v2142_v47 = vld [vmem:[%s7355_s13 + $0xb8] sm:$0xff] }
 0x1f8   : > { %v1060_v40 = vmul.f32 %v5033_v49, %v996_v33  ;;  %v1059_v10 = vmul.f32 %v5033_v49, %v995_v42  ;;  %v4427_v4 = vpop.eup %4426  ;;  %v988_v23 = vmul.f32 %v4425_v52, %v956_v46  ;;  %v5273_v33 = vpop.permute.xlu0 %1437  ;;  %v949_v27 = vsub.f32 %v4582_v51, %v5158_v22 }
 0x1f9   : > { %2365 = vperm.xlu1 %4361, %v2155_v37   ;;  %2190 = vperm.xlu0 %4360, %v2120_v50   ;;  %v1050_v37 = vmul.f32 %v5147_v20, %v986_v2  ;;  %v4429_v32 = vpop.eup %4428  ;;  %v982_v5 = vmul.f32 %v4427_v4, %v950_v63  ;;  %v1138_v36 = vpack.c.bf16 %v1120_v34, %v1118_v17  ;;  %v4583_v50 = vld [vmem:[%s4723_s1 + $0x10] sm:$0xff]  ;;  %v4363_v17 = vld [vmem:[%s7346_s4 + $0x8] sm:$0xff]  }
 0x1fa   : > { %v1124_v49 = vadd.f32 %v5059_v59, %v1060_v40  ;;  %v1123_v16 = vadd.f32 %v5059_v59, %v1059_v10  ;;  %v1052_v44 = vmul.f32 %v5048_v55, %v988_v23  ;;  %v987_v18 = vmul.f32 %v4425_v52, %v955_v57  ;;  %v1072_v28 = vpop.permute.xlu1 %1071  ;;  %v4362_v57 = vld [vmem:[%s7346_s4] sm:$0xff]  }
 0x1fb   : > { %v1114_v46 = vadd.f32 %v5216_v58, %v1050_v37  ;;  %v1049_v63 = vmul.f32 %v5147_v20, %v985_v43  ;;  %v951_v45 = vsub.f32 %v4583_v50, %v5170_v60  ;;  %v984_v22 = vmul.f32 %v4429_v32, %v952_v9  ;;  %v2140_v37 = vld [vmem:[%s7355_s13 + $0xa8] sm:$0xff]  ;;  %v2127_v43 = vld [vmem:[%s7355_s13 + $0x40] sm:$0xff] }
 0x1fc   : > { %v1140_v42 = vpack.c.bf16 %v1124_v49, %v1122_v11  ;;  %v1139_v59 = vpack.c.bf16 %v1123_v16, %v1121_v29  ;;  %v1116_v56 = vadd.f32 %v5064_v61, %v1052_v44  ;;  %v1046_v52 = vmul.f32 %v1008_v3, %v982_v5  ;;  %v5301_v29 = vpop.permute.xlu0 %1442  ;;  %v2146_v49 = vld [vmem:[%s7355_s13 + $0xd8] sm:$0xff]  ;;  %v4364_v5 = vld [vmem:[%s7346_s4 + $0x10] sm:$0xff]  }
 0x1fd   : > { %2355 = vperm.xlu1 %4361, %v2153_v6   ;;  %2430 = vperm.xlu0 %4360, %v2168_v54   ;;  %v1051_v13 = vmul.f32 %v5048_v55, %v987_v18  ;;  %v1137_v20 = vpack.c.bf16 %v1119_v62, %v1117_v25  ;;  %v1113_v12 = vadd.f32 %v5216_v58, %v1049_v63  ;;  %v2148_v58 = vld [vmem:[%s7355_s13 + $0xe8] sm:$0xff]  ;;  %v2129_v54 = vld [vmem:[%s7355_s13 + $0x50] sm:$0xff]  ;;  %v4365_v25 = vld [vmem:[%s7346_s4 + $0x18] sm:$0xff]  }
 0x1fe   : > { %1229 = vmatprep.subr.bf16.mxu0 %v1140_v42  ;;  %v981_v40 = vmul.f32 %v4427_v4, %v949_v27  ;;  %v1048_v10 = vmul.f32 %v5074_v1, %v984_v22  ;;  %v1110_v30 = vadd.f32 %v1072_v28, %v1046_v52  ;;  %v1136_v14 = vpack.c.bf16 %v1116_v56, %v1114_v46  ;;  %v2136_v46 = vld [vmem:[%s7355_s13 + $0x88] sm:$0xff]  ;;  %v2125_v18 = vld [vmem:[%s7355_s13 + $0x30] sm:$0xff]  ;;  %v2123_v56 = vld [vmem:[%s7355_s13 + $0x20] sm:$0xff] }
 0x1ff   : > { %1230 = vmatpush1.bf16.msra.mxu0 %v1139_v59  ;;  %v1115_v60 = vadd.f32 %v5064_v61, %v1051_v13  ;;  %v983_v9 = vmul.f32 %v4429_v32, %v951_v45  ;;  %v2181_v61 = vld [vmem:[%s7355_s13 + $0x1f0] sm:$0xff]  ;;  %v5351_v59 = vpop.permute.xlu1 %1151  ;;  %v3797_v63 = vld [vmem:[%s7357_s15 + $0x28] sm:$0xff]  ;;  %v3795_v45 = vld [vmem:[%s7357_s15 + $0x18] sm:$0xff] }
 0x200   : > { %1231 = vmatprep.subr.bf16.mxu0 %v1138_v36  ;;  %v1045_v55 = vmul.f32 %v1008_v3, %v981_v40  ;;  %v1112_v2 = vadd.f32 %v5090_v7, %v1048_v10  ;;  %v5319_v16 = vpop.permute.xlu0 %1447  ;;  %v2177_v32 = vld [vmem:[%s7355_s13 + $0x1d0] sm:$0xff]  ;;  %v2175_v36 = vld [vmem:[%s7355_s13 + $0x1c0] sm:$0xff]  ;;  %v3793_v22 = vld [vmem:[%s7357_s15 + $0x8] sm:$0xff] }
 0x201   : > { %2345 = vperm.xlu1 %4361, %v2151_v0   ;;  %2340 = vperm.xlu0 %4360, %v2150_v26   ;;  %v1047_v4 = vmul.f32 %v5074_v1, %v983_v9  ;;  %v1135_v11 = vpack.c.bf16 %v1115_v60, %v1113_v12  ;;  %v3799_v0 = vld [vmem:[%s7357_s15 + $0x38] sm:$0xff]  ;;  %v2173_v26 = vld [vmem:[%s7355_s13 + $0x1b0] sm:$0xff]  ;;  %v3986_v12 = vld [vmem:[%s7359_s17 + $0x8] sm:$0xff] }
 0x202   : > { %v1109_v34 = vadd.f32 %v1072_v28, %v1045_v55  ;;  %v1134_v6 = vpack.c.bf16 %v1112_v2, %v1110_v30  ;;  %v2121_v10 = vld [vmem:[%s7355_s13 + $0x10] sm:$0xff]  ;;  %v3990_v60 = vld [vmem:[%s7359_s17 + $0x28] sm:$0xff]  ;;  %v3992_v2 = vld [vmem:[%s7359_s17 + $0x38] sm:$0xff] }
 0x203   : > { %1232 = vmatpush1.bf16.msra.mxu0 %v1137_v20  ;;  %v1111_v3 = vadd.f32 %v5090_v7, %v1047_v4  ;;  %v2144_v7 = vld [vmem:[%s7355_s13 + $0xc8] sm:$0xff]  ;;  %v5369_v44 = vpop.permute.xlu1 %1161  ;;  %v2171_v20 = vld [vmem:[%s7355_s13 + $0x1a0] sm:$0xff] }
 0x204   : > { %1233 = vmatprep.subr.bf16.mxu0 %v1136_v14  ;;  %v5330_v23 = vpop.permute.xlu0 %1452  ;;  %v3988_v14 = vld [vmem:[%s7359_s17 + $0x18] sm:$0xff] }
 0x205   : > { %2255 = vperm.xlu1 %4361, %v2133_v21   ;;  %2330 = vperm.xlu0 %4360, %v2148_v58   ;;  %v1133_v1 = vpack.c.bf16 %v1111_v3, %v1109_v34  ;;  %v2169_v21 = vld [vmem:[%s7355_s13 + $0x190] sm:$0xff]  ;;  %v2119_v58 = vld [vmem:[%s7355_s13] sm:$0xff] }
 0x206   : > { %v2147_v3 = vld [vmem:[%s7355_s13 + $0xe0] sm:$0xff] }
 0x207   : > { %1234 = vmatpush1.bf16.msra.mxu0 %v1135_v11  ;;  %v5384_v27 = vpop.permute.xlu1 %1171  ;;  %v2167_v11 = vld [vmem:[%s7355_s13 + $0x180] sm:$0xff] }
 0x208   : > { %1235 = vmatprep.subr.bf16.mxu0 %v1134_v6  ;;  %v5349_v42 = vpop.permute.xlu0 %1516  ;;  %v2149_v6 = vld [vmem:[%s7355_s13 + $0xf0] sm:$0xff] }
 0x209   : > { %2495 = vperm.xlu1 %4361, %v2181_v61   ;;  %2320 = vperm.xlu0 %4360, %v2146_v49   ;;  %v2145_v49 = vld [vmem:[%s7355_s13 + $0xd0] sm:$0xff] }
 0x20b   : > { %1236 = vmatpush1.bf16.msra.mxu0 %v1133_v1  ;;  %v5401_v50 = vpop.permute.xlu1 %1181 }
 0x20c   : > { %v5361_v62 = vpop.permute.xlu0 %1678 }
 0x20d   : > { %2245 = vperm.xlu1 %4361, %v2131_v19   ;;  %2310 = vperm.xlu0 %4360, %v2144_v7   ;;  %v2143_v19 = vld [vmem:[%s7355_s13 + $0xc0] sm:$0xff]  ;;  %v2141_v7 = vld [vmem:[%s7355_s13 + $0xb0] sm:$0xff] }
 0x20e   : > { %4254 = vmatmul.mubr.msk.bf16.vlgmr.msra.gmra.mxu0 %vm601_vm0, %v4362_v57 }
 0x20f   : > { %1263 = vmatprep.mubr.bf16.mxu0 %v7364_v41  ;;  %v5415_v13 = vpop.permute.xlu1 %1417 }
 0x210   : > { %v5382_v51 = vpop.permute.xlu0 %1737 }
 0x211   : > { %2485 = vperm.xlu1 %4361, %v2179_v24   ;;  %2300 = vperm.xlu0 %4360, %v2142_v47   ;;  %v2139_v24 = vld [vmem:[%s7355_s13 + $0xa0] sm:$0xff] }
 0x213   : > { %v5428_v30 = vpop.permute.xlu1 %1427 }
 0x214   : > { %v5395_v28 = vpop.permute.xlu0 %1688 }
 0x215   : > { %2235 = vperm.xlu1 %4361, %v2129_v54   ;;  %2290 = vperm.xlu0 %4360, %v2140_v37   ;;  %v2137_v54 = vld [vmem:[%s7355_s13 + $0x90] sm:$0xff]  ;;  %v2135_v37 = vld [vmem:[%s7355_s13 + $0x80] sm:$0xff] }
 0x216   : > { %4255 = vmatmul.mubr.msk.bf16.gmra.mxu0 %vm601_vm0, %v4363_v17 }
 0x217   : > { %1273 = vmatprep.mubr.bf16.mxu0 %v7364_v41  ;;  %v5441_v55 = vpop.permute.xlu1 %1486 }
 0x218   : > { %v5413_v52 = vpop.permute.xlu0 %1693 }
 0x219   : > { %2475 = vperm.xlu1 %4361, %v2177_v32   ;;  %2280 = vperm.xlu0 %4360, %v2138_v38   ;;  %7460 = vst [vmem:[#allocation2_spill] sm:$0xff] %v5413_v52  ;;  %v3798_v32 = vld [vmem:[%s7357_s15 + $0x30] sm:$0xff] }
 0x21b   : > { %v5454_v34 = vpop.permute.xlu1 %1491 }
 0x21c   : > { %v5423_v40 = vpop.permute.xlu0 %1698 }
 0x21d   : > { %2225 = vperm.xlu1 %4361, %v2127_v43   ;;  %2270 = vperm.xlu0 %4360, %v2136_v46   ;;  %7461 = vst [vmem:[#allocation3_spill] sm:$0xff] %v5423_v40  ;;  %v3796_v43 = vld [vmem:[%s7357_s15 + $0x20] sm:$0xff]  ;;  %v3794_v46 = vld [vmem:[%s7357_s15 + $0x10] sm:$0xff] }
 0x21e   : > { %4256 = vmatmul.mubr.msk.bf16.gmra.mxu0 %vm601_vm0, %v4364_v5 }
 0x21f   : > { %1283 = vmatprep.mubr.bf16.mxu0 %v7364_v41  ;;  %v5459_v61 = vpop.permute.xlu1 %1496 }
 0x220   : > { %v5439_v9 = vpop.permute.xlu0 %1703 }
 0x221   : > { %2465 = vperm.xlu1 %4361, %v2175_v36   ;;  %3837 = vperm.xlu0 %4360, %v3799_v0   ;;  %7462 = vst [vmem:[#allocation4_spill] sm:$0xff] %v5439_v9  ;;  %v3792_v36 = vld [vmem:[%s7357_s15] sm:$0xff] }
 0x223   : > { %v5467_v1 = vpop.permute.xlu1 %1501 }
 0x224   : > { %v5449_v4 = vpop.permute.xlu0 %1708 }
 0x225   : > { %2215 = vperm.xlu1 %4361, %v2125_v18   ;;  %3827 = vperm.xlu0 %4360, %v3797_v63   ;;  %7463 = vst [vmem:[#allocation5_spill] sm:$0xff] %v5449_v4  ;;  %v3985_v18 = vld [vmem:[%s7359_s17] sm:$0xff]  ;;  %v3987_v63 = vld [vmem:[%s7359_s17 + $0x10] sm:$0xff] }
 0x226   : > { %4257 = vmatmul.mubr.msk.bf16.gmra.mxu0 %vm601_vm0, %v4365_v25 }
 0x227   : > { %2791 = vmatprep.mubr.bf16.mxu0 %v7364_v41  ;;  %v5472_v57 = vpop.permute.xlu1 %1506 }
 0x229   : > { %2455 = vperm.xlu1 %4361, %v2173_v26   ;;  %3817 = vperm.xlu0 %4360, %v3795_v45   ;;  %v3989_v26 = vld [vmem:[%s7359_s17 + $0x20] sm:$0xff] }
 0x22b   : > { %v5480_v47 = vpop.permute.xlu1 %1511 }
 0x22d   : > { %2205 = vperm.xlu1 %4361, %v2123_v56   ;;  %3807 = vperm.xlu0 %4360, %v3793_v22   ;;  %v3991_v56 = vld [vmem:[%s7359_s17 + $0x30] sm:$0xff] }
 0x22f   : > { %v5485_v17 = vpop.permute.xlu1 %1673 }
 0x231   : > { %2445 = vperm.xlu1 %4361, %v2171_v20   ;;  %4000 = vperm.xlu0 %4360, %v3986_v12  }
 0x233   : > { %v5493_v38 = vpop.permute.xlu1 %1683 }
 0x235   : > { %2195 = vperm.xlu1 %4361, %v2121_v10   ;;  %4010 = vperm.xlu0 %4360, %v3988_v14  }
 0x237   : > { %v5498_v5 = vpop.permute.xlu1 %1742 }
 0x238   : > { %7464 = vst [vmem:[#allocation6_spill] sm:$0xff] %v5498_v5 }
 0x239   : > { %2435 = vperm.xlu1 %4361, %v2169_v21   ;;  %4020 = vperm.xlu0 %4360, %v3990_v60  }
 0x23b   : > { %v5506_v0 = vpop.permute.xlu1 %1747 }
 0x23c   : > { %7465 = vst [vmem:[#allocation7_spill] sm:$0xff] %v5506_v0 }
 0x23d   : > { %2185 = vperm.xlu1 %4361, %v2119_v58   ;;  %4030 = vperm.xlu0 %4360, %v3992_v2  }
 0x23f   : > { %v5511_v25 = vpop.permute.xlu1 %1752 }
 0x240   : > { %7466 = vst [vmem:[#allocation8_spill] sm:$0xff] %v5511_v25 }
 0x241   : > { %2425 = vperm.xlu1 %4361, %v2167_v11  }
 0x243   : > { %v5519_v45 = vpop.permute.xlu1 %1757 }
 0x244   : > { %7467 = vst [vmem:[#allocation9_spill] sm:$0xff] %v5519_v45 }
 0x245   : > { %2335 = vperm.xlu1 %4361, %v2149_v6  }
 0x247   : > { %v5524_v22 = vpop.permute.xlu1 %1762 }
 0x248   : > { %7468 = vst [vmem:[#allocation10_spill] sm:$0xff] %v5524_v22 }
 0x249   : > { %2325 = vperm.xlu1 %4361, %v2147_v3  }
 0x24d   : > { %2315 = vperm.xlu1 %4361, %v2145_v49  }
 0x251   : > { %2305 = vperm.xlu1 %4361, %v2143_v19  }
 0x255   : > { %2295 = vperm.xlu1 %4361, %v2141_v7  }
 0x259   : > { %2285 = vperm.xlu1 %4361, %v2139_v24  }
 0x25d   : > { %2275 = vperm.xlu1 %4361, %v2137_v54  }
 0x261   : > { %2265 = vperm.xlu1 %4361, %v2135_v37  }
 0x265   : > { %3832 = vperm.xlu1 %4361, %v3798_v32  }
 0x269   : > { %3822 = vperm.xlu1 %4361, %v3796_v43  }
 0x26d   : > { %3812 = vperm.xlu1 %4361, %v3794_v46  }
 0x271   : > { %3802 = vperm.xlu1 %4361, %v3792_v36  }
 0x275   : > { %3995 = vperm.xlu1 %4361, %v3985_v18  }
 0x279   : > { %4005 = vperm.xlu1 %4361, %v3987_v63  }
 0x27d   : > { %4015 = vperm.xlu1 %4361, %v3989_v26  }
 0x281   : > { %4025 = vperm.xlu1 %4361, %v3991_v56  }
 0x2ce   : > { %v1255_v20 = vpop.f32.mrf.mxu0 }
 0x2cf   : > { %v5530_v11 = vadd.f32 %v1255_v20, %v5351_v59 }
 0x2d0   : > { %v1257_v12 = vpop.f32.mrf.mxu0 }
 0x2d1   : > { %v5539_v19 = vadd.f32 %v1257_v12, %v5351_v59 }
 0x2d2   : > { %v1259_v10 = vpop.f32.mrf.mxu0 }
 0x2d3   : > { %v5527_v58 = vadd.f32 %v1259_v10, %v5102_v15  ;;  %v1324_v36 = vmul.f32 %v5539_v19, %v5539_v19 }
 0x2d4   : > { %v1261_v14 = vpop.f32.mrf.mxu0 }
 0x2d5   : > { %v5533_v6 = vadd.f32 %v1261_v14, %v5102_v15  ;;  %v1325_v7 = vmul.f32 %v5527_v58, %v5527_v58  ;;  %v1323_v15 = vmul.f32 %v5530_v11, %v5530_v11  ;;  %v1294_v18 = vadd.f32 %v5527_v58, %v5530_v11 }
 0x2d6   : > { %v1265_v21 = vpop.f32.mrf.mxu0 }
 0x2d7   : > { %v5536_v3 = vadd.f32 %v1265_v21, %v5369_v44  ;;  %v1326_v32 = vmul.f32 %v5533_v6, %v5533_v6  ;;  %v1339_v63 = vadd.f32 %v1325_v7, %v1323_v15  ;;  %v1307_v12 = vadd.f32 %v5533_v6, %v5539_v19 }
 0x2d8   : > { %v1267_v60 = vpop.f32.mrf.mxu0 }
 0x2d9   : > { %v5544_v24 = vadd.f32 %v1267_v60, %v5369_v44  ;;  %v1327_v59 = vmul.f32 %v5536_v3, %v5536_v3  ;;  %v1295_v10 = vadd.f32 %v1294_v18, %v5536_v3  ;;  %v1352_v21 = vadd.f32 %v1326_v32, %v1324_v36 }
 0x2da   : > { %v1269_v2 = vpop.f32.mrf.mxu0 }
 0x2db   : > { %v5547_v54 = vadd.f32 %v1269_v2, %v5123_v31  ;;  %v1328_v26 = vmul.f32 %v5544_v24, %v5544_v24  ;;  %v1340_v60 = vadd.f32 %v1339_v63, %v1327_v59 }
 0x2dc   : > { %v1271_v49 = vpop.f32.mrf.mxu0 }
 0x2dd   : > { %v5556_v43 = vadd.f32 %v1271_v49, %v5123_v31  ;;  %v1329_v56 = vmul.f32 %v5547_v54, %v5547_v54 }
 0x2de   : > { %v1275_v37 = vpop.f32.mrf.mxu0 }
 0x2df   : > { %v5559_v46 = vadd.f32 %v1275_v37, %v5384_v27  ;;  %v1330_v2 = vmul.f32 %v5556_v43, %v5556_v43  ;;  %v1296_v37 = vadd.f32 %v1295_v10, %v5547_v54  ;;  %v1341_v18 = vadd.f32 %v1340_v60, %v1329_v56 }
 0x2e0   : > { %v1277_v44 = vpop.f32.mrf.mxu0 }
 0x2e1   : > { %v5570_v31 = vadd.f32 %v1277_v44, %v5384_v27  ;;  %v1331_v49 = vmul.f32 %v5559_v46, %v5559_v46  ;;  %v1308_v27 = vadd.f32 %v1307_v12, %v5544_v24  ;;  %v1353_v44 = vadd.f32 %v1352_v21, %v1328_v26 }
 0x2e2   : > { %v1279_v20 = vpop.f32.mrf.mxu0 }
 0x2e3   : > { %v5576_v14 = vadd.f32 %v1279_v20, %v5152_v48  ;;  %v1332_v32 = vmul.f32 %v5570_v31, %v5570_v31  ;;  %v1309_v63 = vadd.f32 %v1308_v27, %v5556_v43  ;;  %v1297_v20 = vadd.f32 %v1296_v37, %v5559_v46 }
 0x2e4   : > { %v1281_v7 = vpop.f32.mrf.mxu0  ;;  %v1354_v10 = vadd.f32 %v1353_v44, %v1330_v2  ;;  %v1342_v41 = vadd.f32 %v1341_v18, %v1331_v49 }
 0x2e5   : > { %v5585_v15 = vadd.f32 %v1281_v7, %v5152_v48  ;;  %v1333_v59 = vmul.f32 %v5576_v14, %v5576_v14  ;;  %v1310_v56 = vadd.f32 %v1309_v63, %v5570_v31  ;;  %v1298_v21 = vadd.f32 %v1297_v20, %v5576_v14 }
 0x2e6   : > { %v1285_v36 = vpop.f32.mrf.mxu0  ;;  %v1355_v27 = vadd.f32 %v1354_v10, %v1332_v32 }
 0x2e7   : > { %v5594_v12 = vadd.f32 %v1285_v36, %v5401_v50  ;;  %v1334_v48 = vmul.f32 %v5585_v15, %v5585_v15  ;;  %v1343_v37 = vadd.f32 %v1342_v41, %v1333_v59  ;;  %v1311_v2 = vadd.f32 %v1310_v56, %v5585_v15 }
 0x2e8   : > { %v1287_v26 = vpop.f32.mrf.mxu0 }
 0x2e9   : > { %v1335_v60 = vmul.f32 %v5594_v12, %v5594_v12  ;;  %v5603_v7 = vadd.f32 %v1287_v26, %v5401_v50  ;;  %v1299_v49 = vadd.f32 %v1298_v21, %v5594_v12  ;;  %v1356_v63 = vadd.f32 %v1355_v27, %v1334_v48 }
 0x2ea   : > { %v1289_v36 = vpop.f32.mrf.mxu0 }
 0x2eb   : > { %v1336_v44 = vmul.f32 %v5603_v7, %v5603_v7  ;;  %v5610_v18 = vadd.f32 %v1289_v36, %v5183_v8  ;;  %v1344_v20 = vadd.f32 %v1343_v37, %v1335_v60  ;;  %v1312_v9 = vadd.f32 %v1311_v2, %v5603_v7 }
 0x2ec   : > { %v1291_v4 = vpop.f32.mrf.mxu0 }
 0x2ed   : > { %v1300_v50 = vadd.f32 %v1299_v49, %v5610_v18  ;;  %v1337_v41 = vmul.f32 %v5610_v18, %v5610_v18  ;;  %v5617_v32 = vadd.f32 %v1291_v4, %v5183_v8  ;;  %v1357_v59 = vadd.f32 %v1356_v63, %v1336_v44 }
 0x2ef   : > { %v1301_v10 = vrot.slane %v1300_v50, 4  ;;  %v1345_v26 = vadd.f32 %v1344_v20, %v1337_v41  ;;  %v1313_v56 = vadd.f32 %v1312_v9, %v5617_v32  ;;  %v1338_v48 = vmul.f32 %v5617_v32, %v5617_v32 }
 0x2f1   : > { %v1302_v21 = vadd.f32 %v1301_v10, %v1300_v50  ;;  %v1346_v60 = vrot.slane %v1345_v26, 4  ;;  %v1314_v27 = vrot.slane %v1313_v56, 4  ;;  %v1358_v37 = vadd.f32 %v1357_v59, %v1338_v48 }
 0x2f3   : > { %v1303_v36 = vrot.slane %v1302_v21, 2  ;;  %v1347_v2 = vadd.f32 %v1346_v60, %v1345_v26  ;;  %v1315_v49 = vadd.f32 %v1314_v27, %v1313_v56  ;;  %v1359_v22 = vrot.slane %v1358_v37, 4 }
 0x2f5   : > { %v1304_v45 = vadd.f32 %v1303_v36, %v1302_v21  ;;  %v1348_v25 = vrot.slane %v1347_v2, 2  ;;  %v1316_v8 = vrot.slane %v1315_v49, 2  ;;  %v1360_v4 = vadd.f32 %v1359_v22, %v1358_v37 }
 0x2f7   : > { %v1305_v44 = vrot.slane %v1304_v45, 1  ;;  %v1349_v63 = vadd.f32 %v1348_v25, %v1347_v2  ;;  %v1317_v20 = vadd.f32 %v1316_v8, %v1315_v49  ;;  %v1361_v41 = vrot.slane %v1360_v4, 2 }
 0x2f9   : > { %v1306_v9 = vadd.f32 %v1305_v44, %v1304_v45  ;;  %v1350_v40 = vrot.slane %v1349_v63, 1  ;;  %v1318_v52 = vrot.slane %v1317_v20, 1  ;;  %v1362_v0 = vadd.f32 %v1361_v41, %v1360_v4 }
 0x2fb   : > { %v1321_v50 = vmul.f32 0.015625, %v1306_v9  ;;  %v1351_v10 = vadd.f32 %v1350_v40, %v1349_v63  ;;  %v1319_v5 = vadd.f32 %v1318_v52, %v1317_v20  ;;  %v1363_v59 = vrot.slane %v1362_v0, 1 }
 0x2fd   : > { %v1365_v48 = vmul.f32 0.015625, %v1351_v10  ;;  %v1367_v26 = vmul.f32 %v1321_v50, %v1321_v50  ;;  %v5622_v60 = vmul.f32 0.015625, %v1319_v5  ;;  %v1364_v21 = vadd.f32 %v1363_v59, %v1362_v0 }
 0x2fe   : > { %v1371_v36 = vsub.f32 %v5530_v11, %v1321_v50  ;;  %v1373_v52 = vsub.f32 %v5527_v58, %v1321_v50  ;;  %v1375_v40 = vsub.f32 %v5536_v3, %v1321_v50  ;;  %v1377_v2 = vsub.f32 %v5547_v54, %v1321_v50 }
 0x2ff   : > { %v1369_v56 = vsub.f32 %v1365_v48, %v1367_v26  ;;  %v1368_v25 = vmul.f32 %v5622_v60, %v5622_v60  ;;  %v1366_v22 = vmul.f32 0.015625, %v1364_v21  ;;  %v1379_v5 = vsub.f32 %v5559_v46, %v1321_v50 }
 0x300   : > { %v1381_v49 = vsub.f32 %v5576_v14, %v1321_v50  ;;  %v1383_v8 = vsub.f32 %v5594_v12, %v1321_v50  ;;  %v1385_v4 = vsub.f32 %v5610_v18, %v1321_v50  ;;  %v1372_v44 = vsub.f32 %v5539_v19, %v5622_v60 }
 0x301   : > { %v1387_v27 = vadd.f32 1e-05, %v1369_v56  ;;  %v1370_v45 = vsub.f32 %v1366_v22, %v1368_v25 }
 0x303   : > { %4430 = vrsqrt.f32 %v1387_v27  ;;  %v1388_v37 = vadd.f32 1e-05, %v1370_v45 }
 0x305   : > { %4432 = vrsqrt.f32 %v1388_v37 }
 0x310   : > { %v4431_v0 = vpop.eup %4430 }
 0x311   : > { %v1391_v63 = vmul.f32 %v4431_v0, %v1371_v36  ;;  %v1393_v20 = vmul.f32 %v4431_v0, %v1373_v52  ;;  %v1395_v41 = vmul.f32 %v4431_v0, %v1375_v40  ;;  %v1397_v9 = vmul.f32 %v4431_v0, %v1377_v2 }
 0x312   : > { %v1399_v10 = vmul.f32 %v4431_v0, %v1379_v5  ;;  %v1401_v59 = vmul.f32 %v4431_v0, %v1381_v49  ;;  %v1403_v48 = vmul.f32 %v4431_v0, %v1383_v8  ;;  %v1405_v26 = vmul.f32 %v4431_v0, %v1385_v4 }
 0x313   : > { %v1455_v56 = vmul.f32 %v5415_v13, %v1391_v63  ;;  %v1457_v21 = vmul.f32 %v5193_v39, %v1393_v20  ;;  %v1459_v27 = vmul.f32 %v5428_v30, %v1395_v41  ;;  %v1461_v25 = vmul.f32 %v5237_v35, %v1397_v9  ;;  %v4433_v9 = vpop.eup %4432 }
 0x314   : > { %v1463_v50 = vmul.f32 %v5273_v33, %v1399_v10  ;;  %v1465_v22 = vmul.f32 %v5301_v29, %v1401_v59  ;;  %v1467_v45 = vmul.f32 %v5319_v16, %v1403_v48  ;;  %v1469_v37 = vmul.f32 %v5330_v23, %v1405_v26 }
 0x315   : > { %v1519_v36 = vadd.f32 %v5211_v53, %v1455_v56  ;;  %v1521_v52 = vadd.f32 %v5441_v55, %v1457_v21  ;;  %v1523_v40 = vadd.f32 %v5454_v34, %v1459_v27  ;;  %v1525_v2 = vadd.f32 %v5459_v61, %v1461_v25 }
 0x316   : > { %v1527_v5 = vadd.f32 %v5467_v1, %v1463_v50  ;;  %v1529_v0 = vadd.f32 %v5472_v57, %v1465_v22  ;;  %v1531_v49 = vadd.f32 %v5480_v47, %v1467_v45  ;;  %v1374_v8 = vsub.f32 %v5533_v6, %v5622_v60 }
 0x317   : > { %v5654_v4 = vadd.f32 %v1519_v36, %v5530_v11  ;;  %v5657_v63 = vadd.f32 %v1521_v52, %v5527_v58  ;;  %v5660_v20 = vadd.f32 %v1523_v40, %v5536_v3  ;;  %v1376_v41 = vsub.f32 %v5544_v24, %v5622_v60 }
 0x318   : > { %v1533_v10 = vadd.f32 %v5349_v42, %v1469_v37  ;;  %v1378_v59 = vsub.f32 %v5556_v43, %v5622_v60  ;;  %v1380_v48 = vsub.f32 %v5570_v31, %v5622_v60  ;;  %v1382_v11 = vsub.f32 %v5585_v15, %v5622_v60 }
 0x319   : > { %v5672_v58 = vadd.f32 %v1525_v2, %v5547_v54  ;;  %v1551_v3 = vadd.f32 %v5657_v63, %v5654_v4  ;;  %v1579_v26 = vmul.f32 %v5654_v4, %v5654_v4  ;;  %v1581_v56 = vmul.f32 %v5657_v63, %v5657_v63 }
 0x31a   : > { %v5681_v21 = vadd.f32 %v1527_v5, %v5559_v46  ;;  %v5684_v27 = vadd.f32 %v1529_v0, %v5576_v14  ;;  %v5687_v25 = vadd.f32 %v1531_v49, %v5594_v12  ;;  %v1384_v54 = vsub.f32 %v5603_v7, %v5622_v60 }
 0x31b   : > { %v1552_v50 = vadd.f32 %v1551_v3, %v5660_v20  ;;  %v1583_v22 = vmul.f32 %v5660_v20, %v5660_v20  ;;  %v1595_v45 = vadd.f32 %v1581_v56, %v1579_v26  ;;  %v1392_v37 = vmul.f32 %v4433_v9, %v1372_v44 }
 0x31c   : > { %v1394_v36 = vmul.f32 %v4433_v9, %v1374_v8  ;;  %v1396_v52 = vmul.f32 %v4433_v9, %v1376_v41  ;;  %v1398_v46 = vmul.f32 %v4433_v9, %v1378_v59  ;;  %v1400_v40 = vmul.f32 %v4433_v9, %v1380_v48 }
 0x31d   : > { %v5695_v14 = vadd.f32 %v1533_v10, %v5610_v18  ;;  %v1553_v12 = vadd.f32 %v1552_v50, %v5672_v58  ;;  %v1585_v2 = vmul.f32 %v5672_v58, %v5672_v58  ;;  %v1596_v5 = vadd.f32 %v1595_v45, %v1583_v22 }
 0x31e   : > { %v1402_v0 = vmul.f32 %v4433_v9, %v1382_v11  ;;  %v1456_v49 = vmul.f32 %v5415_v13, %v1392_v37  ;;  %v1458_v3 = vmul.f32 %v5193_v39, %v1394_v36  ;;  %v1460_v44 = vmul.f32 %v5428_v30, %v1396_v52 }
 0x31f   : > { %v1554_v8 = vadd.f32 %v1553_v12, %v5681_v21  ;;  %v1587_v41 = vmul.f32 %v5681_v21, %v5681_v21  ;;  %v1597_v18 = vadd.f32 %v1596_v5, %v1585_v2  ;;  %v1462_v10 = vmul.f32 %v5237_v35, %v1398_v46 }
 0x320   : > { %v1589_v59 = vmul.f32 %v5684_v27, %v5684_v27  ;;  %v1404_v48 = vmul.f32 %v4433_v9, %v1384_v54  ;;  %v1464_v11 = vmul.f32 %v5273_v33, %v1400_v40  ;;  %v1520_v13 = vadd.f32 %v5211_v53, %v1456_v49 }
 0x321   : > { %v1555_v39 = vadd.f32 %v1554_v8, %v5684_v27  ;;  %v1598_v26 = vadd.f32 %v1597_v18, %v1587_v41  ;;  %v1522_v30 = vadd.f32 %v5441_v55, %v1458_v3  ;;  %v1524_v56 = vadd.f32 %v5454_v34, %v1460_v44 }
 0x322   : > { %v1591_v50 = vmul.f32 %v5687_v25, %v5687_v25  ;;  %v1386_v35 = vsub.f32 %v5617_v32, %v5622_v60  ;;  %v1466_v22 = vmul.f32 %v5301_v29, %v1402_v0  ;;  %v1526_v53 = vadd.f32 %v5459_v61, %v1462_v10 }
 0x323   : > { %v1556_v54 = vadd.f32 %v1555_v39, %v5687_v25  ;;  %v1599_v33 = vadd.f32 %v1598_v26, %v1589_v59  ;;  %v5722_v45 = vadd.f32 %v1520_v13, %v5539_v19  ;;  %v1468_v55 = vmul.f32 %v5319_v16, %v1404_v48 }
 0x324   : > { %v1406_v37 = vmul.f32 %v4433_v9, %v1386_v35  ;;  %v1528_v34 = vadd.f32 %v5467_v1, %v1464_v11  ;;  %v5727_v36 = vadd.f32 %v1522_v30, %v5533_v6  ;;  %v1593_v29 = vmul.f32 %v5695_v14, %v5695_v14 }
 0x325   : > { %v1557_v60 = vadd.f32 %v1556_v54, %v5695_v14  ;;  %v1600_v52 = vadd.f32 %v1599_v33, %v1591_v50  ;;  %v5733_v46 = vadd.f32 %v1524_v56, %v5544_v24  ;;  %v1530_v61 = vadd.f32 %v5472_v57, %v1466_v22 }
 0x326   : > { %v1564_v19 = vadd.f32 %v5727_v36, %v5722_v45  ;;  %v1580_v16 = vmul.f32 %v5722_v45, %v5722_v45  ;;  %v1582_v1 = vmul.f32 %v5727_v36, %v5727_v36  ;;  %v5743_v40 = vadd.f32 %v1526_v53, %v5556_v43 }
 0x327   : > { %v1558_v6 = vrot.slane %v1557_v60, 4  ;;  %v1601_v9 = vadd.f32 %v1600_v52, %v1593_v29  ;;  %v1470_v12 = vmul.f32 %v5330_v23, %v1406_v37  ;;  %v1532_v24 = vadd.f32 %v5480_v47, %v1468_v55 }
 0x328   : > { %v5748_v57 = vadd.f32 %v1528_v34, %v5570_v31  ;;  %v1565_v2 = vadd.f32 %v1564_v19, %v5733_v46  ;;  %v1584_v49 = vmul.f32 %v5733_v46, %v5733_v46  ;;  %v1608_v3 = vadd.f32 %v1582_v1, %v1580_v16 }
 0x329   : > { %v1559_v5 = vadd.f32 %v1558_v6, %v1557_v60  ;;  %v1602_v0 = vrot.slane %v1601_v9, 4  ;;  %v5754_v44 = vadd.f32 %v1530_v61, %v5585_v15  ;;  %v1586_v47 = vmul.f32 %v5743_v40, %v5743_v40 }
 0x32a   : > { %v1566_v43 = vadd.f32 %v1565_v2, %v5743_v40  ;;  %v1609_v31 = vadd.f32 %v1608_v3, %v1584_v49  ;;  %v1534_v41 = vadd.f32 %v5349_v42, %v1470_v12  ;;  %v5761_v18 = vadd.f32 %v1532_v24, %v5603_v7 }
 0x32b   : > { %v1560_v8 = vrot.slane %v1559_v5, 2  ;;  %v1603_v23 = vadd.f32 %v1602_v0, %v1601_v9  ;;  %v1588_v15 = vmul.f32 %v5748_v57, %v5748_v57  ;;  %v1590_v30 = vmul.f32 %v5754_v44, %v5754_v44 }
 0x32c   : > { %v1567_v10 = vadd.f32 %v1566_v43, %v5748_v57  ;;  %v1610_v11 = vadd.f32 %v1609_v31, %v1586_v47  ;;  %v5770_v42 = vadd.f32 %v1534_v41, %v5617_v32  ;;  %v1592_v22 = vmul.f32 %v5761_v18, %v5761_v18 }
 0x32d   : > { %v1561_v59 = vadd.f32 %v1560_v8, %v1559_v5  ;;  %v1604_v48 = vrot.slane %v1603_v23, 2 }
 0x32e   : > { %v1568_v13 = vadd.f32 %v1567_v10, %v5754_v44  ;;  %v1611_v56 = vadd.f32 %v1610_v11, %v1588_v15  ;;  %v1594_v32 = vmul.f32 %v5770_v42, %v5770_v42 }
 0x32f   : > { %v1562_v39 = vrot.slane %v1561_v59, 1  ;;  %v1605_v26 = vadd.f32 %v1604_v48, %v1603_v23 }
 0x330   : > { %v1569_v7 = vadd.f32 %v1568_v13, %v5761_v18  ;;  %v1612_v54 = vadd.f32 %v1611_v56, %v1590_v30 }
 0x331   : > { %v1563_v50 = vadd.f32 %v1562_v39, %v1561_v59  ;;  %v1606_v35 = vrot.slane %v1605_v26, 1 }
 0x332   : > { %v1570_v33 = vadd.f32 %v1569_v7, %v5770_v42  ;;  %v1613_v55 = vadd.f32 %v1612_v54, %v1592_v22 }
 0x333   : > { %v1577_v53 = vmul.f32 0.015625, %v1563_v50  ;;  %v1607_v37 = vadd.f32 %v1606_v35, %v1605_v26 }
 0x334   : > { %v1571_v34 = vrot.slane %v1570_v33, 4  ;;  %v1614_v19 = vadd.f32 %v1613_v55, %v1594_v32  ;;  %v7469_v55 = vld [vmem:[#allocation6_spill] sm:$0xff] }
 0x335   : > { %v1621_v60 = vmul.f32 0.015625, %v1607_v37  ;;  %v1623_v29 = vmul.f32 %v1577_v53, %v1577_v53  ;;  %v1627_v47 = vsub.f32 %v5654_v4, %v1577_v53  ;;  %v1629_v31 = vsub.f32 %v5657_v63, %v1577_v53 }
 0x336   : > { %v1572_v61 = vadd.f32 %v1571_v34, %v1570_v33  ;;  %v1615_v6 = vrot.slane %v1614_v19, 4  ;;  %v1631_v41 = vsub.f32 %v5660_v20, %v1577_v53  ;;  %v1633_v10 = vsub.f32 %v5672_v58, %v1577_v53 }
 0x337   : > { %v1625_v52 = vsub.f32 %v1621_v60, %v1623_v29  ;;  %v1635_v26 = vsub.f32 %v5681_v21, %v1577_v53  ;;  %v1637_v30 = vsub.f32 %v5684_v27, %v1577_v53  ;;  %v7470_v60 = vld [vmem:[#allocation7_spill] sm:$0xff]  ;;  %v1639_v32 = vsub.f32 %v5687_v25, %v1577_v53 }
 0x338   : > { %v1573_v1 = vrot.slane %v1572_v61, 2  ;;  %v1616_v12 = vadd.f32 %v1615_v6, %v1614_v19  ;;  %v7473_v19 = vld [vmem:[#allocation2_spill] sm:$0xff] }
 0x339   : > { %v1643_v16 = vadd.f32 1e-05, %v1625_v52 }
 0x33a   : > { %v1574_v9 = vadd.f32 %v1573_v1, %v1572_v61  ;;  %v1617_v2 = vrot.slane %v1616_v12, 2  ;;  %v7474_v1 = vld [vmem:[#allocation3_spill] sm:$0xff] }
 0x33b   : > { %4434 = vrsqrt.f32 %v1643_v16 }
 0x33c   : > { %v1575_v24 = vrot.slane %v1574_v9, 1  ;;  %v1618_v0 = vadd.f32 %v1617_v2, %v1616_v12 }
 0x33e   : > { %v1576_v5 = vadd.f32 %v1575_v24, %v1574_v9  ;;  %v1619_v3 = vrot.slane %v1618_v0, 1  ;;  %v7475_v9 = vld [vmem:[#allocation8_spill] sm:$0xff] }
 0x340   : > { %v5778_v49 = vmul.f32 0.015625, %v1576_v5  ;;  %v1620_v43 = vadd.f32 %v1619_v3, %v1618_v0  ;;  %v1641_v0 = vsub.f32 %v5695_v14, %v1577_v53 }
 0x342   : > { %v1624_v8 = vmul.f32 %v5778_v49, %v5778_v49  ;;  %v1622_v23 = vmul.f32 0.015625, %v1620_v43  ;;  %v1632_v53 = vsub.f32 %v5733_v46, %v5778_v49 }
 0x344   : > { %v1626_v59 = vsub.f32 %v1622_v23, %v1624_v8  ;;  %v7477_v8 = vld [vmem:[#allocation9_spill] sm:$0xff] }
 0x346   : > { %v1644_v56 = vadd.f32 1e-05, %v1626_v59 }
 0x348   : > { %v4435_v48 = vpop.eup %4434  ;;  %4436 = vrsqrt.f32 %v1644_v56  ;;  %v7481_v56 = vld [vmem:[#allocation5_spill] sm:$0xff] }
 0x349   : > { %v1647_v15 = vmul.f32 %v4435_v48, %v1627_v47  ;;  %v1649_v11 = vmul.f32 %v4435_v48, %v1629_v31  ;;  %v1651_v13 = vmul.f32 %v4435_v48, %v1631_v41  ;;  %v1653_v39 = vmul.f32 %v4435_v48, %v1633_v10  ;;  %v7478_v47 = vld [vmem:[#allocation10_spill] sm:$0xff]  ;;  %v7480_v41 = vld [vmem:[#allocation4_spill] sm:$0xff] }
 0x34a   : > { %v1655_v22 = vmul.f32 %v4435_v48, %v1635_v26  ;;  %v1657_v54 = vmul.f32 %v4435_v48, %v1637_v30  ;;  %v1659_v24 = vmul.f32 %v4435_v48, %v1639_v32  ;;  %v1661_v43 = vmul.f32 %v4435_v48, %v1641_v0  ;;  %v1768_v30 = vpop.permute.xlu1 %1767 }
 0x34b   : > { %v1711_v7 = vmul.f32 %v5485_v17, %v1647_v15  ;;  %v1713_v50 = vmul.f32 %v5361_v62, %v1649_v11  ;;  %v1715_v35 = vmul.f32 %v5493_v38, %v1651_v13  ;;  %v1717_v33 = vmul.f32 %v5395_v28, %v1653_v39 }
 0x34c   : > { %v1719_v16 = vmul.f32 %v7473_v19, %v1655_v22  ;;  %v1721_v6 = vmul.f32 %v7474_v1, %v1657_v54  ;;  %v1723_v10 = vmul.f32 %v7480_v41, %v1659_v24  ;;  %v1628_v15 = vsub.f32 %v5722_v45, %v5778_v49 }
 0x34d   : > { %v1775_v37 = vadd.f32 %v5382_v51, %v1711_v7  ;;  %v1777_v34 = vadd.f32 %v7469_v55, %v1713_v50  ;;  %v1779_v29 = vadd.f32 %v7470_v60, %v1715_v35  ;;  %v1781_v12 = vadd.f32 %v7475_v9, %v1717_v33 }
 0x34e   : > { %v1783_v23 = vadd.f32 %v7477_v8, %v1719_v16  ;;  %v1785_v31 = vadd.f32 %v7478_v47, %v1721_v6  ;;  %v1630_v11 = vsub.f32 %v5727_v36, %v5778_v49  ;;  %v1634_v48 = vsub.f32 %v5743_v40, %v5778_v49 }
 0x34f   : > { %v5797_v52 = vadd.f32 %v1775_v37, %v5654_v4  ;;  %v5800_v61 = vadd.f32 %v1777_v34, %v5657_v63  ;;  %v5806_v2 = vadd.f32 %v1779_v29, %v5660_v20  ;;  %v5819_v20 = vadd.f32 %v1781_v12, %v5672_v58 }
 0x350   : > { %v1636_v13 = vsub.f32 %v5748_v57, %v5778_v49  ;;  %v1638_v58 = vsub.f32 %v5754_v44, %v5778_v49  ;;  %v1725_v7 = vmul.f32 %v7481_v56, %v1661_v43  ;;  %v5839_v50 = vadd.f32 %v1783_v23, %v5681_v21 }
 0x351   : > { %7471 = vst [vmem:[#allocation6_spill] sm:$0xff] %v5797_v52  ;;  %7472 = vst [vmem:[#allocation7_spill] sm:$0xff] %v5800_v61  ;;  %v1807_v5 = vadd.f32 %v5800_v61, %v5797_v52  ;;  %v1835_v4 = vmul.f32 %v5797_v52, %v5797_v52  ;;  %v1837_v63 = vmul.f32 %v5800_v61, %v5800_v61 }
 0x352   : > { %7476 = vst [vmem:[#allocation2_spill] sm:$0xff] %v5806_v2  ;;  %7479 = vst [vmem:[#allocation3_spill] sm:$0xff] %v5819_v20  ;;  %v1839_v26 = vmul.f32 %v5806_v2, %v5806_v2  ;;  %v1642_v35 = vsub.f32 %v5770_v42, %v5778_v49  ;;  %v1640_v22 = vsub.f32 %v5761_v18, %v5778_v49 }
 0x353   : > { %v1808_v3 = vadd.f32 %v1807_v5, %v5806_v2  ;;  %v1851_v59 = vadd.f32 %v1837_v63, %v1835_v4  ;;  %7482 = vst [vmem:[#allocation8_spill] sm:$0xff] %v5839_v50  ;;  %v5846_v33 = vadd.f32 %v1785_v31, %v5684_v27  ;;  %v1787_v37 = vadd.f32 %v1768_v30, %v1723_v10  ;;  %v1773_v10 = vpop.permute.xlu0 %1772 }
 0x354   : > { %v1841_v34 = vmul.f32 %v5819_v20, %v5819_v20 }
 0x355   : > { %v1809_v39 = vadd.f32 %v1808_v3, %v5819_v20  ;;  %v4437_v54 = vpop.eup %4436  ;;  %7483 = vst [vmem:[#allocation9_spill] sm:$0xff] %v5846_v33  ;;  %v1852_v29 = vadd.f32 %v1851_v59, %v1839_v26 }
 0x356   : > { %v1648_v32 = vmul.f32 %v4437_v54, %v1628_v15  ;;  %v1650_v16 = vmul.f32 %v4437_v54, %v1630_v11  ;;  %v1652_v6 = vmul.f32 %v4437_v54, %v1632_v53  ;;  %v1654_v21 = vmul.f32 %v4437_v54, %v1634_v48 }
 0x357   : > { %v1656_v12 = vmul.f32 %v4437_v54, %v1636_v13  ;;  %v1658_v24 = vmul.f32 %v4437_v54, %v1638_v58  ;;  %v1660_v5 = vmul.f32 %v4437_v54, %v1640_v22  ;;  %v1810_v4 = vadd.f32 %v1809_v39, %v5839_v50 }
 0x358   : > { %v1712_v49 = vmul.f32 %v5485_v17, %v1648_v32  ;;  %v1714_v63 = vmul.f32 %v5361_v62, %v1650_v16  ;;  %v1716_v27 = vmul.f32 %v5493_v38, %v1652_v6  ;;  %v1718_v0 = vmul.f32 %v5395_v28, %v1654_v21 }
 0x359   : > { %v1662_v3 = vmul.f32 %v4437_v54, %v1642_v35  ;;  %v1720_v43 = vmul.f32 %v7473_v19, %v1656_v12  ;;  %v1722_v23 = vmul.f32 %v7474_v1, %v1658_v24  ;;  %v1853_v31 = vadd.f32 %v1852_v29, %v1841_v34 }
 0x35a   : > { %v1776_v59 = vadd.f32 %v5382_v51, %v1712_v49  ;;  %v1778_v15 = vadd.f32 %v7469_v55, %v1714_v63  ;;  %v1780_v11 = vadd.f32 %v7470_v60, %v1716_v27  ;;  %v1782_v17 = vadd.f32 %v7475_v9, %v1718_v0 }
 0x35b   : > { %v1789_v62 = vadd.f32 %v1773_v10, %v1725_v7  ;;  %v1784_v38 = vadd.f32 %v7477_v8, %v1720_v43  ;;  %v1724_v28 = vmul.f32 %v7480_v41, %v1660_v5  ;;  %v1843_v19 = vmul.f32 %v5839_v50, %v5839_v50 }
 0x35c   : > { %v5866_v1 = vadd.f32 %v1776_v59, %v5722_v45  ;;  %v5869_v53 = vadd.f32 %v1778_v15, %v5727_v36  ;;  %v5872_v51 = vadd.f32 %v1780_v11, %v5733_v46  ;;  %v1811_v55 = vadd.f32 %v1810_v4, %v5846_v33 }
 0x35d   : > { %v1726_v60 = vmul.f32 %v7481_v56, %v1662_v3  ;;  %v1786_v9 = vadd.f32 %v7478_v47, %v1722_v23  ;;  %v5878_v8 = vadd.f32 %v1787_v37, %v5687_v25  ;;  %v1854_v41 = vadd.f32 %v1853_v31, %v1843_v19 }
 0x35e   : > { %7484 = vst [vmem:[#allocation10_spill] sm:$0xff] %v5866_v1  ;;  %7485 = vst [vmem:[#allocation4_spill] sm:$0xff] %v5869_v53  ;;  %v5881_v48 = vadd.f32 %v1782_v17, %v5743_v40  ;;  %v1820_v45 = vadd.f32 %v5869_v53, %v5866_v1  ;;  %v1836_v36 = vmul.f32 %v5866_v1, %v5866_v1 }
 0x35f   : > { %7486 = vst [vmem:[#allocation5_spill] sm:$0xff] %v5872_v51  ;;  %7487 = vst [vmem:[#allocation11_spill] sm:$0xff] %v5878_v8  ;;  %v1838_v46 = vmul.f32 %v5869_v53, %v5869_v53  ;;  %v5890_v13 = vadd.f32 %v1789_v62, %v5695_v14  ;;  %v5893_v47 = vadd.f32 %v1784_v38, %v5748_v57 }
 0x360   : > { %7488 = vst [vmem:[#allocation12_spill] sm:$0xff] %v5881_v48  ;;  %v1788_v25 = vadd.f32 %v1768_v30, %v1724_v28  ;;  %v1845_v40 = vmul.f32 %v5846_v33, %v5846_v33  ;;  %v1821_v58 = vadd.f32 %v1820_v45, %v5872_v51  ;;  %v1840_v39 = vmul.f32 %v5872_v51, %v5872_v51 }
 0x361   : > { %7489 = vst [vmem:[#allocation13_spill] sm:$0xff] %v5890_v13  ;;  %7490 = vst [vmem:[#allocation14_spill] sm:$0xff] %v5893_v47  ;;  %v1864_v26 = vadd.f32 %v1838_v46, %v1836_v36  ;;  %v1812_v56 = vadd.f32 %v1811_v55, %v5878_v8  ;;  %v1790_v7 = vadd.f32 %v1773_v10, %v1726_v60  ;;  %v5930_v60 = vpop.permute.xlu0 %1964 }
 0x362   : > { %v5902_v35 = vadd.f32 %v1786_v9, %v5754_v44  ;;  %v1847_v14 = vmul.f32 %v5878_v8, %v5878_v8  ;;  %v1855_v57 = vadd.f32 %v1854_v41, %v1845_v40  ;;  %v1822_v30 = vadd.f32 %v1821_v58, %v5881_v48  ;;  %v5932_v9 = vpop.permute.xlu1 %1959 }
 0x363   : > { %v1842_v22 = vmul.f32 %v5881_v48, %v5881_v48  ;;  %v1865_v54 = vadd.f32 %v1864_v26, %v1840_v39  ;;  %v1813_v37 = vadd.f32 %v1812_v56, %v5890_v13  ;;  %v1849_v34 = vmul.f32 %v5890_v13, %v5890_v13 }
 0x364   : > { %7491 = vst [vmem:[#allocation15_spill] sm:$0xff] %v5902_v35  ;;  %v5913_v29 = vadd.f32 %v1788_v25, %v5761_v18  ;;  %v1856_v44 = vadd.f32 %v1855_v57, %v1847_v14  ;;  %v1823_v32 = vadd.f32 %v1822_v30, %v5893_v47  ;;  %v1844_v16 = vmul.f32 %v5893_v47, %v5893_v47 }
 0x365   : > { %v1866_v6 = vadd.f32 %v1865_v54, %v1842_v22  ;;  %v1814_v21 = vrot.slane %v1813_v37, 4  ;;  %v5919_v12 = vadd.f32 %v1790_v7, %v5770_v42  ;;  %v1846_v4 = vmul.f32 %v5902_v35, %v5902_v35  ;;  %v5938_v14 = vpop.permute.xlu0 %2028 }
 0x366   : > { %7492 = vst [vmem:[#allocation16_spill] sm:$0xff] %v5913_v29  ;;  %v1857_v24 = vadd.f32 %v1856_v44, %v1849_v34  ;;  %v1824_v5 = vadd.f32 %v1823_v32, %v5902_v35  ;;  %v1848_v0 = vmul.f32 %v5913_v29, %v5913_v29  ;;  %v5940_v57 = vpop.permute.xlu1 %2023 }
 0x367   : > { %7493 = vst [vmem:[#allocation17_spill] sm:$0xff] %v5919_v12  ;;  %v1867_v49 = vadd.f32 %v1866_v6, %v1844_v16  ;;  %v1815_v18 = vadd.f32 %v1814_v21, %v1813_v37  ;;  %v1850_v42 = vmul.f32 %v5919_v12, %v5919_v12 }
 0x368   : > { %v1858_v63 = vrot.slane %v1857_v24, 4  ;;  %v1825_v27 = vadd.f32 %v1824_v5, %v5913_v29 }
 0x369   : > { %v1868_v3 = vadd.f32 %v1867_v49, %v1846_v4  ;;  %v1816_v43 = vrot.slane %v1815_v18, 2  ;;  %v1955_v6 = vpop.permute.xlu0 %1954 }
 0x36a   : > { %v1859_v23 = vadd.f32 %v1858_v63, %v1857_v24  ;;  %v1826_v31 = vadd.f32 %v1825_v27, %v5919_v12  ;;  %v1950_v21 = vpop.permute.xlu1 %1949 }
 0x36b   : > { %v1869_v10 = vadd.f32 %v1868_v3, %v1848_v0  ;;  %v1817_v59 = vadd.f32 %v1816_v43, %v1815_v18 }
 0x36c   : > { %v1860_v15 = vrot.slane %v1859_v23, 2  ;;  %v1827_v11 = vrot.slane %v1826_v31, 4 }
 0x36d   : > { %v1870_v17 = vadd.f32 %v1869_v10, %v1850_v42  ;;  %v1818_v62 = vrot.slane %v1817_v59, 1  ;;  %v5942_v4 = vpop.permute.xlu0 %2018 }
 0x36e   : > { %v1861_v38 = vadd.f32 %v1860_v15, %v1859_v23  ;;  %v1828_v28 = vadd.f32 %v1827_v11, %v1826_v31  ;;  %v2014_v49 = vpop.permute.xlu1 %2013 }
 0x36f   : > { %v1871_v19 = vrot.slane %v1870_v17, 4  ;;  %v1819_v55 = vadd.f32 %v1818_v62, %v1817_v59 }
 0x370   : > { %v1862_v41 = vrot.slane %v1861_v38, 1  ;;  %v1829_v45 = vrot.slane %v1828_v28, 2 }
 0x371   : > { %v1872_v36 = vadd.f32 %v1871_v19, %v1870_v17  ;;  %v5934_v46 = vmul.f32 0.015625, %v1819_v55  ;;  %v1945_v0 = vpop.permute.xlu0 %1944 }
 0x372   : > { %v1863_v25 = vadd.f32 %v1862_v41, %v1861_v38  ;;  %v1830_v40 = vadd.f32 %v1829_v45, %v1828_v28  ;;  %v1940_v3 = vpop.permute.xlu1 %1939 }
 0x373   : > { %v1873_v58 = vrot.slane %v1872_v36, 2  ;;  %v1879_v39 = vmul.f32 %v5934_v46, %v5934_v46  ;;  %v1895_v18 = vsub.f32 %v5878_v8, %v5934_v46  ;;  %v1897_v63 = vsub.f32 %v5890_v13, %v5934_v46 }
 0x374   : > { %v1877_v26 = vmul.f32 0.015625, %v1863_v25  ;;  %v1831_v56 = vrot.slane %v1830_v40, 1  ;;  %v1891_v42 = vsub.f32 %v5839_v50, %v5934_v46  ;;  %v1893_v31 = vsub.f32 %v5846_v33, %v5934_v46 }
 0x375   : > { %v1874_v7 = vadd.f32 %v1873_v58, %v1872_v36  ;;  %v1887_v15 = vsub.f32 %v5806_v2, %v5934_v46  ;;  %v1889_v11 = vsub.f32 %v5819_v20, %v5934_v46  ;;  %v1883_v38 = vsub.f32 %v5797_v52, %v5934_v46 }
 0x376   : > { %v1881_v30 = vsub.f32 %v1877_v26, %v1879_v39  ;;  %v1832_v22 = vadd.f32 %v1831_v56, %v1830_v40  ;;  %v1885_v28 = vsub.f32 %v5800_v61, %v5934_v46  ;;  %v2009_v26 = vpop.permute.xlu0 %2008  ;;  %v2004_v56 = vpop.permute.xlu1 %2003 }
 0x377   : > { %v1875_v54 = vrot.slane %v1874_v7, 1 }
 0x378   : > { %v1899_v37 = vadd.f32 1e-05, %v1881_v30  ;;  %v1834_v34 = vmul.f32 0.015625, %v1832_v22 }
 0x379   : > { %v1876_v44 = vadd.f32 %v1875_v54, %v1874_v7 }
 0x37a   : > { %4438 = vrsqrt.f32 %v1899_v37  ;;  %v1880_v16 = vmul.f32 %v1834_v34, %v1834_v34  ;;  %v1896_v17 = vsub.f32 %v5913_v29, %v1834_v34  ;;  %v1898_v62 = vsub.f32 %v5919_v12, %v1834_v34 }
 0x37b   : > { %v1878_v32 = vmul.f32 0.015625, %v1876_v44  ;;  %v1892_v41 = vsub.f32 %v5893_v47, %v1834_v34  ;;  %v1894_v45 = vsub.f32 %v5902_v35, %v1834_v34  ;;  %v1888_v36 = vsub.f32 %v5872_v51, %v1834_v34 }
 0x37c   : > { %v1890_v25 = vsub.f32 %v5881_v48, %v1834_v34  ;;  %v1884_v40 = vsub.f32 %v5866_v1, %v1834_v34  ;;  %v1886_v58 = vsub.f32 %v5869_v53, %v1834_v34 }
 0x37d   : > { %v1882_v24 = vsub.f32 %v1878_v32, %v1880_v16 }
 0x37f   : > { %v1900_v5 = vadd.f32 1e-05, %v1882_v24 }
 0x381   : > { %4440 = vrsqrt.f32 %v1900_v5 }
 0x387   : > { %v4439_v27 = vpop.eup %4438 }
 0x388   : > { %v1915_v43 = vmul.f32 %v4439_v27, %v1895_v18  ;;  %v1917_v23 = vmul.f32 %v4439_v27, %v1897_v63  ;;  %v1911_v10 = vmul.f32 %v4439_v27, %v1891_v42  ;;  %v1913_v59 = vmul.f32 %v4439_v27, %v1893_v31 }
 0x389   : > { %v1907_v30 = vmul.f32 %v4439_v27, %v1887_v15  ;;  %v1909_v22 = vmul.f32 %v4439_v27, %v1889_v11 }
 0x38a   : > { %v1979_v19 = vmul.f32 %v5932_v9, %v1915_v43  ;;  %v1981_v55 = vmul.f32 %v5930_v60, %v1917_v23  ;;  %v1975_v46 = vmul.f32 %v1950_v21, %v1911_v10  ;;  %v1977_v7 = vmul.f32 %v1955_v6, %v1913_v59 }
 0x38c   : > { %v2043_v16 = vadd.f32 %v5940_v57, %v1979_v19  ;;  %v2045_v24 = vadd.f32 %v5938_v14, %v1981_v55  ;;  %v1935_v19 = vpop.permute.xlu0 %1934  ;;  %v1930_v55 = vpop.permute.xlu1 %1929 }
 0x38e   : > { %v4441_v39 = vpop.eup %4440 }
 0x38f   : > { %v1916_v54 = vmul.f32 %v4441_v39, %v1896_v17  ;;  %v1918_v37 = vmul.f32 %v4441_v39, %v1898_v62  ;;  %v1912_v44 = vmul.f32 %v4441_v39, %v1892_v41  ;;  %v1914_v32 = vmul.f32 %v4441_v39, %v1894_v45 }
 0x390   : > { %v1908_v5 = vmul.f32 %v4441_v39, %v1888_v36  ;;  %v1910_v18 = vmul.f32 %v4441_v39, %v1890_v25  ;;  %v1904_v10 = vmul.f32 %v4441_v39, %v1884_v40  ;;  %v1906_v59 = vmul.f32 %v4441_v39, %v1886_v58 }
 0x391   : > { %v1980_v63 = vmul.f32 %v5932_v9, %v1916_v54  ;;  %v1982_v34 = vmul.f32 %v5930_v60, %v1918_v37  ;;  %v1976_v43 = vmul.f32 %v1950_v21, %v1912_v44  ;;  %v1978_v23 = vmul.f32 %v1955_v6, %v1914_v32 }
 0x392   : > { %v1972_v42 = vmul.f32 %v1940_v3, %v1908_v5  ;;  %v1974_v31 = vmul.f32 %v1945_v0, %v1910_v18  ;;  %v1903_v41 = vmul.f32 %v4439_v27, %v1883_v38  ;;  %v1905_v45 = vmul.f32 %v4439_v27, %v1885_v28  ;;  %v1999_v27 = vpop.permute.xlu0 %1998  ;;  %v1994_v28 = vpop.permute.xlu1 %1993  ;;  %v4369_v5 = vld [vmem:[%s7354_s12 + $0x58] sm:$0xff]   ;;  %v4370_v18 = vld [vmem:[%s7354_s12 + $0x10] sm:$0xff]  }
 0x393   : > { %v2044_v15 = vadd.f32 %v5940_v57, %v1980_v63  ;;  %v2046_v11 = vadd.f32 %v5938_v14, %v1982_v34  ;;  %v2040_v17 = vadd.f32 %v2014_v49, %v1976_v43  ;;  %v2042_v62 = vadd.f32 %v5942_v4, %v1978_v23  ;;  %v4371_v63 = vld [vmem:[%s7354_s12 + $0x60] sm:$0xff]   ;;  %v4372_v34 = vld [vmem:[%s7354_s12 + $0x18] sm:$0xff]   ;;  %v4373_v43 = vld [vmem:[%s7354_s12 + $0x68] sm:$0xff]  }
 0x394   : > { %v2039_v36 = vadd.f32 %v2014_v49, %v1975_v46  ;;  %v1971_v60 = vmul.f32 %v1940_v3, %v1907_v30  ;;  %v1973_v21 = vmul.f32 %v1945_v0, %v1909_v22  ;;  %v2117_v6 = vpack.c.bf16 %v2045_v24, %v2043_v16  ;;  %v4368_v24 = vld [vmem:[%s7354_s12 + $0x8] sm:$0xff]   ;;  %v4374_v23 = vld [vmem:[%s7354_s12 + $0x20] sm:$0xff]  }
 0x395   : > { %v2118_v9 = vpack.c.bf16 %v2046_v11, %v2044_v15  ;;  %v2041_v25 = vadd.f32 %v5942_v4, %v1977_v7  ;;  %v2036_v40 = vadd.f32 %v2004_v56, %v1972_v42  ;;  %v1968_v58 = vmul.f32 %v1930_v55, %v1904_v10  ;;  %v4375_v42 = vld [vmem:[%s7354_s12 + $0x70] sm:$0xff]   ;;  %v4377_v10 = vld [vmem:[%s7354_s12 + $0x78] sm:$0xff]   ;;  %v4379_v15 = vld [vmem:[%s7354_s12 + $0x80] sm:$0xff]  }
 0x396   : > { %v2116_v57 = vpack.c.bf16 %v2042_v62, %v2040_v17  ;;  %v2038_v14 = vadd.f32 %v2009_v26, %v1974_v31  ;;  %v1970_v39 = vmul.f32 %v1935_v19, %v1906_v59  ;;  %v1967_v38 = vmul.f32 %v1930_v55, %v1903_v41  ;;  %v4376_v31 = vld [vmem:[%s7354_s12 + $0x28] sm:$0xff]   ;;  %v4378_v59 = vld [vmem:[%s7354_s12 + $0x30] sm:$0xff]   ;;  %v4380_v11 = vld [vmem:[%s7354_s12 + $0x38] sm:$0xff]   ;;  %v6058_v62 = vpop.permute.xlu1 %2415  ;;  %v6066_v41 = vpop.permute.xlu0 %2420 }
 0x397   : > { %2767 = vmatprep.subr.bf16.mxu0 %v2118_v9  ;;  %4342 = vmatprep.subr.bf16.mxu1 %v2118_v9  ;;  %v2115_v49 = vpack.c.bf16 %v2041_v25, %v2039_v36  ;;  %v2035_v3 = vadd.f32 %v2004_v56, %v1971_v60  ;;  %v2037_v0 = vadd.f32 %v2009_v26, %v1973_v21  ;;  %v4366_v26 = vld [vmem:[%s7354_s12] sm:$0xff]   ;;  %v4367_v56 = vld [vmem:[%s7354_s12 + $0x50] sm:$0xff]   ;;  %v7494_v16 = vmov 0   ;;  %v4381_v17 = vld [vmem:[%s7354_s12 + $0x88] sm:$0xff]  }
 0x398   : > { %2768 = vmatpush1.bf16.msra.mxu0 %v2117_v6  ;;  %4346 = vmatpush1.bf16.msra.mxu1 %v2117_v6  ;;  %v1969_v46 = vmul.f32 %v1935_v19, %v1905_v45  ;;  %v2114_v30 = vpack.c.bf16 %v2038_v14, %v2036_v40  ;;  %v2032_v4 = vadd.f32 %v1994_v28, %v1968_v58  ;;  %v4382_v19 = vld [vmem:[%s7354_s12 + $0x40] sm:$0xff]   ;;  %v4383_v55 = vld [vmem:[%s7354_s12 + $0x90] sm:$0xff]   ;;  %v4384_v36 = vld [vmem:[%s7354_s12 + $0x48] sm:$0xff]  }
 0x399   : > { %2769 = vmatprep.subr.bf16.mxu0 %v2116_v57  ;;  %4343 = vmatprep.subr.bf16.mxu1 %v2116_v57  ;;  %v2034_v7 = vadd.f32 %v1999_v27, %v1970_v39  ;;  %v2113_v22 = vpack.c.bf16 %v2037_v0, %v2035_v3  ;;  %v2031_v54 = vadd.f32 %v1994_v28, %v1967_v38  ;;  %v4385_v60 = vld [vmem:[%s7354_s12 + $0x98] sm:$0xff]   ;;  %v4386_v25 = vld [vmem:[%s7354_s12 + $0xa0] sm:$0xff]   ;;  %v4387_v14 = vld [vmem:[%s7354_s12 + $0xa8] sm:$0xff]  }
 0x39a   : > { %v2033_v37 = vadd.f32 %v1999_v27, %v1969_v46  ;;  %7495 = vst [vmem:[#allocation18_spill] sm:$0xff] %v6058_v62  ;;  %7496 = vst [vmem:[#allocation19_spill] sm:$0xff] %v6066_v41  ;;  %v6070_v45 = vpop.permute.xlu1 %2405  ;;  %v6074_v9 = vpop.permute.xlu0 %2410  ;;  %v4388_v28 = vld [vmem:[%s7354_s12 + $0xb0] sm:$0xff]   ;;  %v4389_v0 = vld [vmem:[%s7354_s12 + $0xb8] sm:$0xff]  }
 0x39b   : > { %v2112_v44 = vpack.c.bf16 %v2034_v7, %v2032_v4  ;;  %7497 = vst [vmem:[#allocation20_spill] sm:$0xff] %v6070_v45  ;;  %7498 = vst [vmem:[#allocation21_spill] sm:$0xff] %v6074_v9  ;;  %v4390_v7 = vld [vmem:[%s7354_s12 + $0xc0] sm:$0xff]  }
 0x39c   : > { %2770 = vmatpush1.bf16.msra.mxu0 %v2115_v49  ;;  %4347 = vmatpush1.bf16.msra.mxu1 %v2115_v49  ;;  %v2111_v32 = vpack.c.bf16 %v2033_v37, %v2031_v54 }
 0x39d   : > { %2771 = vmatprep.subr.bf16.mxu0 %v2114_v30  ;;  %4344 = vmatprep.subr.bf16.mxu1 %v2114_v30 }
 0x39e   : > { %v6082_v21 = vpop.permute.xlu1 %2395  ;;  %v6086_v6 = vpop.permute.xlu0 %2400 }
 0x39f   : > { %7499 = vst [vmem:[#allocation22_spill] sm:$0xff] %v6082_v21  ;;  %7500 = vst [vmem:[#allocation23_spill] sm:$0xff] %v6086_v6 }
 0x3a0   : > { %2772 = vmatpush1.bf16.msra.mxu0 %v2113_v22  ;;  %4348 = vmatpush1.bf16.msra.mxu1 %v2113_v22 }
 0x3a1   : > { %2773 = vmatprep.subr.bf16.mxu0 %v2112_v44  ;;  %4345 = vmatprep.subr.bf16.mxu1 %v2112_v44  ;;  %v4391_v44 = vld [vmem:[%s7354_s12 + $0xc8] sm:$0xff]  }
 0x3a2   : > { %v6092_v40 = vpop.permute.xlu1 %2385  ;;  %v6094_v58 = vpop.permute.xlu0 %2390 }
 0x3a3   : > { %7501 = vst [vmem:[#allocation24_spill] sm:$0xff] %v6092_v40  ;;  %7502 = vst [vmem:[#allocation25_spill] sm:$0xff] %v6094_v58 }
 0x3a4   : > { %2774 = vmatpush1.bf16.msra.mxu0 %v2111_v32  ;;  %4349 = vmatpush1.bf16.msra.mxu1 %v2111_v32 }
 0x3a6   : > { %v6098_v57 = vpop.permute.xlu1 %2375  ;;  %v6103_v39 = vpop.permute.xlu0 %2380 }
 0x3a7   : > { %4290 = vmatmul.mubr.msk.bf16.vlgmr.msra.gmra.mxu0 %vm601_vm0, %v4366_v26  ;;  %4300 = vmatmul.mubr.msk.bf16.vlgmr.msra.gmra.mxu1 %vm601_vm0, %v4367_v56  ;;  %7503 = vst [vmem:[#allocation26_spill] sm:$0xff] %v6098_v57  ;;  %7504 = vst [vmem:[#allocation27_spill] sm:$0xff] %v6103_v39  ;;  %v4392_v56 = vld [vmem:[%s7354_s12 + $0xd0] sm:$0xff]  }
 0x3a8   : > { %2801 = vmatprep.mubr.bf16.mxu0 %v7494_v16  ;;  %2901 = vmatprep.mubr.bf16.mxu1 %v7494_v16 }
 0x3aa   : > { %v6106_v38 = vpop.permute.xlu1 %2365  ;;  %v6109_v27 = vpop.permute.xlu0 %2370 }
 0x3ab   : > { %7505 = vst [vmem:[#allocation28_spill] sm:$0xff] %v6106_v38  ;;  %7506 = vst [vmem:[#allocation29_spill] sm:$0xff] %v6109_v27 }
 0x3ae   : > { %v6114_v49 = vpop.permute.xlu1 %2355  ;;  %v6117_v3 = vpop.permute.xlu0 %2360 }
 0x3af   : > { %4291 = vmatmul.mubr.msk.bf16.gmra.mxu0 %vm601_vm0, %v4368_v24  ;;  %4301 = vmatmul.mubr.msk.bf16.gmra.mxu1 %vm601_vm0, %v4369_v5  ;;  %7507 = vst [vmem:[#allocation30_spill] sm:$0xff] %v6114_v49  ;;  %7508 = vst [vmem:[#allocation31_spill] sm:$0xff] %v6117_v3 }
 0x3b0   : > { %2811 = vmatprep.mubr.bf16.mxu0 %v7494_v16  ;;  %2911 = vmatprep.mubr.bf16.mxu1 %v7494_v16 }
 0x3b2   : > { %v6123_v46 = vpop.permute.xlu1 %2345  ;;  %v6125_v30 = vpop.permute.xlu0 %2350 }
 0x3b3   : > { %7509 = vst [vmem:[#allocation32_spill] sm:$0xff] %v6125_v30 }
 0x3b6   : > { %v6129_v4 = vpop.permute.xlu1 %2255  ;;  %v6134_v22 = vpop.permute.xlu0 %2260 }
 0x3b7   : > { %4292 = vmatmul.mubr.msk.bf16.gmra.mxu0 %vm601_vm0, %v4370_v18  ;;  %4302 = vmatmul.mubr.msk.bf16.gmra.mxu1 %vm601_vm0, %v4371_v63  ;;  %7510 = vst [vmem:[#allocation33_spill] sm:$0xff] %v6129_v4  ;;  %7511 = vst [vmem:[#allocation34_spill] sm:$0xff] %v6134_v22  ;;  %v4393_v63 = vld [vmem:[%s7354_s12 + $0xd8] sm:$0xff]  }
 0x3b8   : > { %2821 = vmatprep.mubr.bf16.mxu0 %v7494_v16  ;;  %2921 = vmatprep.mubr.bf16.mxu1 %v7494_v16 }
 0x3ba   : > { %v6137_v54 = vpop.permute.xlu1 %2495  ;;  %v6140_v37 = vpop.permute.xlu0 %2500 }
 0x3bb   : > { %7512 = vst [vmem:[#allocation35_spill] sm:$0xff] %v6137_v54  ;;  %7513 = vst [vmem:[#allocation36_spill] sm:$0xff] %v6140_v37 }
 0x3be   : > { %v6145_v32 = vpop.permute.xlu1 %2245  ;;  %v6148_v26 = vpop.permute.xlu0 %2250 }
 0x3bf   : > { %4293 = vmatmul.mubr.msk.bf16.gmra.mxu0 %vm601_vm0, %v4372_v34  ;;  %4303 = vmatmul.mubr.msk.bf16.gmra.mxu1 %vm601_vm0, %v4373_v43  ;;  %7514 = vst [vmem:[#allocation37_spill] sm:$0xff] %v6145_v32  ;;  %7515 = vst [vmem:[#allocation38_spill] sm:$0xff] %v6148_v26 }
 0x3c0   : > { %2831 = vmatprep.mubr.bf16.mxu0 %v7494_v16  ;;  %2931 = vmatprep.mubr.bf16.mxu1 %v7494_v16 }
 0x3c2   : > { %v6154_v24 = vpop.permute.xlu1 %2485  ;;  %v6156_v5 = vpop.permute.xlu0 %2490 }
 0x3c3   : > { %7516 = vst [vmem:[#allocation39_spill] sm:$0xff] %v6154_v24  ;;  %7517 = vst [vmem:[#allocation40_spill] sm:$0xff] %v6156_v5 }
 0x3c6   : > { %v6160_v18 = vpop.permute.xlu1 %2235  ;;  %v6165_v34 = vpop.permute.xlu0 %2240 }
 0x3c7   : > { %4294 = vmatmul.mubr.msk.bf16.gmra.mxu0 %vm601_vm0, %v4374_v23  ;;  %4304 = vmatmul.mubr.msk.bf16.gmra.mxu1 %vm601_vm0, %v4375_v42  ;;  %7518 = vst [vmem:[#allocation41_spill] sm:$0xff] %v6160_v18  ;;  %7519 = vst [vmem:[#allocation42_spill] sm:$0xff] %v6165_v34  ;;  %v4394_v42 = vld [vmem:[%s7354_s12 + $0xe0] sm:$0xff]  }
 0x3c8   : > { %2841 = vmatprep.mubr.bf16.mxu0 %v7494_v16  ;;  %2941 = vmatprep.mubr.bf16.mxu1 %v7494_v16 }
 0x3ca   : > { %v6168_v43 = vpop.permute.xlu1 %2475  ;;  %v6171_v23 = vpop.permute.xlu0 %2480 }
 0x3cb   : > { %7520 = vst [vmem:[#allocation43_spill] sm:$0xff] %v6168_v43  ;;  %7521 = vst [vmem:[#allocation44_spill] sm:$0xff] %v6171_v23 }
 0x3cf   : > { %4295 = vmatmul.mubr.msk.bf16.gmra.mxu0 %vm601_vm0, %v4376_v31  ;;  %4305 = vmatmul.mubr.msk.bf16.gmra.mxu1 %vm601_vm0, %v4377_v10  ;;  %v6176_v31 = vpop.permute.xlu1 %2225  ;;  %v6179_v10 = vpop.permute.xlu0 %2230 }
 0x3d0   : > { %2851 = vmatprep.mubr.bf16.mxu0 %v7494_v16  ;;  %2951 = vmatprep.mubr.bf16.mxu1 %v7494_v16  ;;  %7522 = vst [vmem:[#allocation45_spill] sm:$0xff] %v6176_v31  ;;  %7523 = vst [vmem:[#allocation46_spill] sm:$0xff] %v6179_v10 }
 0x3d7   : > { %4296 = vmatmul.mubr.msk.bf16.gmra.mxu0 %vm601_vm0, %v4378_v59  ;;  %4306 = vmatmul.mubr.msk.bf16.gmra.mxu1 %vm601_vm0, %v4379_v15  ;;  %v4395_v59 = vld [vmem:[%s7354_s12 + $0xe8] sm:$0xff]   ;;  %v6185_v15 = vpop.permute.xlu1 %2465 }
 0x3d8   : > { %2861 = vmatprep.mubr.bf16.mxu0 %v7494_v16  ;;  %2961 = vmatprep.mubr.bf16.mxu1 %v7494_v16  ;;  %7524 = vst [vmem:[#allocation47_spill] sm:$0xff] %v6185_v15 }
 0x3df   : > { %4297 = vmatmul.mubr.msk.bf16.gmra.mxu0 %vm601_vm0, %v4380_v11  ;;  %4307 = vmatmul.mubr.msk.bf16.gmra.mxu1 %vm601_vm0, %v4381_v17  ;;  %v6187_v11 = vpop.permute.xlu0 %2470  ;;  %v6191_v17 = vpop.permute.xlu1 %2215 }
 0x3e0   : > { %2871 = vmatprep.mubr.bf16.mxu0 %v7494_v16  ;;  %2971 = vmatprep.mubr.bf16.mxu1 %v7494_v16  ;;  %7525 = vst [vmem:[#allocation48_spill] sm:$0xff] %v6187_v11 }
 0x3e7   : > { %4298 = vmatmul.mubr.msk.bf16.gmra.mxu0 %vm601_vm0, %v4382_v19  ;;  %4308 = vmatmul.mubr.msk.bf16.gmra.mxu1 %vm601_vm0, %v4383_v55  ;;  %v4396_v19 = vld [vmem:[%s7354_s12 + $0xf0] sm:$0xff]   ;;  %v6196_v55 = vpop.permute.xlu0 %2220 }
 0x3e8   : > { %2881 = vmatprep.mubr.bf16.mxu0 %v7494_v16  ;;  %2981 = vmatprep.mubr.bf16.mxu1 %v7494_v16 }
 0x3ef   : > { %4299 = vmatmul.mubr.msk.bf16.gmra.mxu0 %vm601_vm0, %v4384_v36  ;;  %4309 = vmatmul.mubr.msk.bf16.gmra.mxu1 %vm601_vm0, %v4385_v60  ;;  %v6199_v36 = vpop.permute.xlu1 %2455  ;;  %v6202_v60 = vpop.permute.xlu0 %2460 }
 0x3f0   : > { %2991 = vmatprep.mubr.bf16.mxu1 %v7494_v16  ;;  %7526 = vst [vmem:[#allocation49_spill] sm:$0xff] %v6199_v36  ;;  %7527 = vst [vmem:[#allocation50_spill] sm:$0xff] %v6202_v60 }
 0x3f7   : > { %4310 = vmatmul.mubr.msk.bf16.gmra.mxu1 %vm601_vm0, %v4386_v25  ;;  %v4397_v25 = vld [vmem:[%s7354_s12 + $0xf8] sm:$0xff]  }
 0x3f8   : > { %3001 = vmatprep.mubr.bf16.mxu1 %v7494_v16 }
 0x3ff   : > { %4311 = vmatmul.mubr.msk.bf16.gmra.mxu1 %vm601_vm0, %v4387_v14  ;;  %v6207_v14 = vpop.permute.xlu1 %2205 }
 0x400   : > { %3011 = vmatprep.mubr.bf16.mxu1 %v7494_v16 }
 0x407   : > { %4312 = vmatmul.mubr.msk.bf16.gmra.mxu1 %vm601_vm0, %v4388_v28  ;;  %v6210_v28 = vpop.permute.xlu0 %2210 }
 0x408   : > { %3021 = vmatprep.mubr.bf16.mxu1 %v7494_v16 }
 0x40f   : > { %4313 = vmatmul.mubr.msk.bf16.gmra.mxu1 %vm601_vm0, %v4389_v0  ;;  %v6212_v0 = vpop.permute.xlu1 %2445 }
 0x410   : > { %3031 = vmatprep.mubr.bf16.mxu1 %v7494_v16  ;;  %7528 = vst [vmem:[#allocation51_spill] sm:$0xff] %v6212_v0 }
 0x417   : > { %4314 = vmatmul.mubr.msk.bf16.gmra.mxu1 %vm601_vm0, %v4390_v7  ;;  %v6214_v7 = vpop.permute.xlu0 %2450 }
 0x418   : > { %3041 = vmatprep.mubr.bf16.mxu1 %v7494_v16  ;;  %7529 = vst [vmem:[#allocation52_spill] sm:$0xff] %v6214_v7 }
 0x41f   : > { %4315 = vmatmul.mubr.msk.bf16.gmra.mxu1 %vm601_vm0, %v4391_v44  ;;  %v6216_v44 = vpop.permute.xlu1 %2195 }
 0x420   : > { %3051 = vmatprep.mubr.bf16.mxu1 %v7494_v16 }
 0x427   : > { %4316 = vmatmul.mubr.msk.bf16.gmra.mxu1 %vm601_vm0, %v4392_v56  ;;  %v6218_v56 = vpop.permute.xlu0 %2200 }
 0x428   : > { %3061 = vmatprep.mubr.bf16.mxu1 %v7494_v16 }
 0x42f   : > { %4317 = vmatmul.mubr.msk.bf16.gmra.mxu1 %vm601_vm0, %v4393_v63  ;;  %v6220_v63 = vpop.permute.xlu1 %2435 }
 0x430   : > { %3071 = vmatprep.mubr.bf16.mxu1 %v7494_v16  ;;  %7530 = vst [vmem:[#allocation53_spill] sm:$0xff] %v6220_v63 }
 0x437   : > { %4318 = vmatmul.mubr.msk.bf16.gmra.mxu1 %vm601_vm0, %v4394_v42  ;;  %v6222_v42 = vpop.permute.xlu0 %2440 }
 0x438   : > { %3081 = vmatprep.mubr.bf16.mxu1 %v7494_v16  ;;  %7531 = vst [vmem:[#allocation54_spill] sm:$0xff] %v6222_v42 }
 0x43b   : > { %v6224_v61 = vpop.permute.xlu0 %2190 }
 0x43f   : > { %4319 = vmatmul.mubr.msk.bf16.gmra.mxu1 %vm601_vm0, %v4395_v59  ;;  %v2186_v59 = vpop.permute.xlu1 %2185  ;;  %v6228_v48 = vpop.permute.xlu0 %2430 }
 0x440   : > { %3091 = vmatprep.mubr.bf16.mxu1 %v7494_v16  ;;  %7533 = vst [vmem:[#allocation56_spill] sm:$0xff] %v6228_v48 }
 0x443   : > { %v6226_v20 = vpop.permute.xlu1 %2425 }
 0x444   : > { %7532 = vst [vmem:[#allocation55_spill] sm:$0xff] %v6226_v20 }
 0x447   : > { %4320 = vmatmul.mubr.msk.bf16.gmra.mxu1 %vm601_vm0, %v4396_v19  ;;  %v6230_v29 = vpop.permute.xlu1 %2335 }
 0x448   : > { %3101 = vmatprep.mubr.bf16.mxu1 %v7494_v16  ;;  %7534 = vst [vmem:[#allocation57_spill] sm:$0xff] %v6230_v29  ;;  %v6232_v16 = vpop.permute.xlu0 %2340 }
 0x449   : > { %7535 = vst [vmem:[#allocation58_spill] sm:$0xff] %v6232_v16 }
 0x44b   : > { %v6234_v23 = vpop.permute.xlu1 %2325 }
 0x44c   : > { %7536 = vst [vmem:[#allocation59_spill] sm:$0xff] %v6234_v23  ;;  %v6236_v15 = vpop.permute.xlu0 %2330 }
 0x44d   : > { %7537 = vst [vmem:[#allocation60_spill] sm:$0xff] %v6236_v15 }
 0x44f   : > { %4321 = vmatmul.mubr.msk.bf16.gmra.mxu1 %vm601_vm0, %v4397_v25  ;;  %v2316_v42 = vpop.permute.xlu1 %2315 }
 0x450   : > { %v6238_v20 = vpop.permute.xlu0 %2320 }
 0x451   : > { %7538 = vst [vmem:[#allocation61_spill] sm:$0xff] %v6238_v20 }
 0x453   : > { %v2306_v6 = vpop.permute.xlu1 %2305 }
 0x454   : > { %v2311_v40 = vpop.permute.xlu0 %2310 }
 0x457   : > { %v2296_v22 = vpop.permute.xlu1 %2295 }
 0x458   : > { %v2301_v26 = vpop.permute.xlu0 %2300 }
 0x45b   : > { %v2286_v29 = vpop.permute.xlu1 %2285 }
 0x45c   : > { %v2291_v10 = vpop.permute.xlu0 %2290 }
 0x467   : > { %v2793_v19 = vpop.f32.mrf.mxu0  ;;  %v2893_v52 = vpop.f32.mrf.mxu1 }
 0x468   : > { %v6252_v30 = vadd.f32 %v2793_v19, %v2186_v59  ;;  %v6254_v23 = vadd.f32 %v2893_v52, %v2286_v29 }
 0x469   : > { %v2795_v25 = vpop.f32.mrf.mxu0  ;;  %v2895_v1 = vpop.f32.mrf.mxu1 }
 0x46a   : > { %7545 = vst [vmem:[#allocation68_spill] sm:$0xff] %v6252_v30  ;;  %7546 = vst [vmem:[#allocation69_spill] sm:$0xff] %v6254_v23 }
 0x46b   : > { %v2797_v2 = vpop.f32.mrf.mxu0  ;;  %v2897_v53 = vpop.f32.mrf.mxu1 }
 0x46c   : > { %v6261_v31 = vadd.f32 %v2797_v2, %v6224_v61 }
 0x46d   : > { %v2799_v51 = vpop.f32.mrf.mxu0  ;;  %v2899_v50 = vpop.f32.mrf.mxu1 }
 0x46e   : > { %7549 = vst [vmem:[#allocation72_spill] sm:$0xff] %v6261_v31 }
 0x46f   : > { %v2803_v33 = vpop.f32.mrf.mxu0  ;;  %v2903_v47 = vpop.f32.mrf.mxu1 }
 0x470   : > { %v6271_v19 = vadd.f32 %v2803_v33, %v6216_v44  ;;  %v6273_v52 = vadd.f32 %v2903_v47, %v2296_v22 }
 0x471   : > { %v2805_v8 = vpop.f32.mrf.mxu0  ;;  %v2905_v12 = vpop.f32.mrf.mxu1 }
 0x472   : > { %7553 = vst [vmem:[#allocation76_spill] sm:$0xff] %v6271_v19  ;;  %7554 = vst [vmem:[#allocation77_spill] sm:$0xff] %v6273_v52 }
 0x473   : > { %v2807_v35 = vpop.f32.mrf.mxu0  ;;  %v2907_v13 = vpop.f32.mrf.mxu1 }
 0x474   : > { %v6281_v2 = vadd.f32 %v2807_v35, %v6218_v56 }
 0x475   : > { %v2809_v37 = vpop.f32.mrf.mxu0  ;;  %v2909_v54 = vpop.f32.mrf.mxu1 }
 0x476   : > { %7557 = vst [vmem:[#allocation80_spill] sm:$0xff] %v6281_v2  ;;  %v6290_v33 = vadd.f32 %v2909_v54, %v2301_v26 }
 0x477   : > { %v2813_v5 = vpop.f32.mrf.mxu0  ;;  %v2913_v24 = vpop.f32.mrf.mxu1 }
 0x478   : > { %7561 = vst [vmem:[#allocation84_spill] sm:$0xff] %v6290_v33 }
 0x479   : > { %v2815_v43 = vpop.f32.mrf.mxu0  ;;  %v2915_v11 = vpop.f32.mrf.mxu1 }
 0x47a   : > { %v6298_v47 = vadd.f32 %v2815_v43, %v6207_v14  ;;  %v6300_v35 = vadd.f32 %v2915_v11, %v2306_v6 }
 0x47b   : > { %v2817_v60 = vpop.f32.mrf.mxu0  ;;  %v2917_v36 = vpop.f32.mrf.mxu1 }
 0x47c   : > { %7564 = vst [vmem:[#allocation87_spill] sm:$0xff] %v6298_v47  ;;  %7565 = vst [vmem:[#allocation88_spill] sm:$0xff] %v6300_v35 }
 0x47d   : > { %v2819_v7 = vpop.f32.mrf.mxu0  ;;  %v2919_v0 = vpop.f32.mrf.mxu1 }
 0x47e   : > { %v6308_v54 = vadd.f32 %v2819_v7, %v6210_v28 }
 0x47f   : > { %v2823_v63 = vpop.f32.mrf.mxu0  ;;  %v2923_v48 = vpop.f32.mrf.mxu1 }
 0x480   : > { %7568 = vst [vmem:[#allocation91_spill] sm:$0xff] %v6308_v54 }
 0x481   : > { %v2825_v41 = vpop.f32.mrf.mxu0  ;;  %v2925_v62 = vpop.f32.mrf.mxu1 }
 0x482   : > { %v6321_v43 = vadd.f32 %v2825_v41, %v6191_v17  ;;  %v7580_v41 = vld [vmem:[#allocation45_spill] sm:$0xff] }
 0x483   : > { %v2827_v9 = vpop.f32.mrf.mxu0  ;;  %v2927_v45 = vpop.f32.mrf.mxu1 }
 0x484   : > { %7572 = vst [vmem:[#allocation95_spill] sm:$0xff] %v6321_v43  ;;  %v6326_v11 = vadd.f32 %v2827_v9, %v6196_v55 }
 0x485   : > { %v2829_v21 = vpop.f32.mrf.mxu0  ;;  %v2929_v58 = vpop.f32.mrf.mxu1 }
 0x486   : > { %7574 = vst [vmem:[#allocation97_spill] sm:$0xff] %v6326_v11 }
 0x487   : > { %v2833_v39 = vpop.f32.mrf.mxu0  ;;  %v2933_v57 = vpop.f32.mrf.mxu1 }
 0x488   : > { %v6343_v9 = vadd.f32 %v2833_v39, %v7580_v41  ;;  %v7587_v39 = vld [vmem:[#allocation46_spill] sm:$0xff] }
 0x489   : > { %v2835_v27 = vpop.f32.mrf.mxu0  ;;  %v2935_v38 = vpop.f32.mrf.mxu1 }
 0x48a   : > { %7581 = vst [vmem:[#allocation45_spill] sm:$0xff] %v6343_v9 }
 0x48b   : > { %v6240_v4 = vpop.f32.mrf.mxu0  ;;  %v6242_v3 = vpop.f32.mrf.mxu1 }
 0x48c   : > { %7539 = vst [vmem:[#allocation62_spill] sm:$0xff] %v6240_v4  ;;  %7540 = vst [vmem:[#allocation63_spill] sm:$0xff] %v6242_v3  ;;  %v6256_v4 = vadd.f32 %v2795_v25, %v2186_v59  ;;  %v6258_v3 = vadd.f32 %v2895_v1, %v2286_v29  ;;  %v6276_v1 = vadd.f32 %v2805_v8, %v6216_v44  ;;  %v7590_v25 = vld [vmem:[#allocation60_spill] sm:$0xff] }
 0x48d   : > { %v2839_v49 = vpop.f32.mrf.mxu0  ;;  %v2939_v32 = vpop.f32.mrf.mxu1  ;;  %v6278_v29 = vadd.f32 %v2905_v12, %v2296_v22  ;;  %v6295_v8 = vadd.f32 %v2913_v24, %v2306_v6  ;;  %v6305_v12 = vadd.f32 %v2917_v36, %v2311_v40  ;;  %v6313_v24 = vadd.f32 %v2823_v63, %v6191_v17  ;;  %v7582_v17 = vld [vmem:[#allocation59_spill] sm:$0xff] }
 0x48e   : > { %7547 = vst [vmem:[#allocation70_spill] sm:$0xff] %v6256_v4  ;;  %7548 = vst [vmem:[#allocation71_spill] sm:$0xff] %v6258_v3  ;;  %v6318_v6 = vadd.f32 %v2923_v48, %v2316_v42  ;;  %v6346_v7 = vadd.f32 %v2933_v57, %v7582_v17  ;;  %v6352_v44 = vadd.f32 %v2935_v38, %v7582_v17 }
 0x48f   : > { %v6244_v16 = vpop.f32.mrf.mxu0  ;;  %v6246_v34 = vpop.f32.mrf.mxu1  ;;  %7555 = vst [vmem:[#allocation78_spill] sm:$0xff] %v6276_v1  ;;  %7556 = vst [vmem:[#allocation79_spill] sm:$0xff] %v6278_v29  ;;  %v6372_v38 = vadd.f32 %v2939_v32, %v7590_v25 }
 0x490   : > { %7541 = vst [vmem:[#allocation64_spill] sm:$0xff] %v6244_v16  ;;  %7542 = vst [vmem:[#allocation65_spill] sm:$0xff] %v6246_v34  ;;  %v6263_v16 = vadd.f32 %v2897_v53, %v2291_v10  ;;  %v6283_v53 = vadd.f32 %v2907_v13, %v2301_v26  ;;  %v6303_v13 = vadd.f32 %v2817_v60, %v6210_v28 }
 0x491   : > { %v6248_v18 = vpop.f32.mrf.mxu0  ;;  %v6250_v15 = vpop.f32.mrf.mxu1  ;;  %7563 = vst [vmem:[#allocation86_spill] sm:$0xff] %v6295_v8  ;;  %7567 = vst [vmem:[#allocation90_spill] sm:$0xff] %v6305_v12  ;;  %v6310_v26 = vadd.f32 %v2919_v0, %v2311_v40  ;;  %v7575_v40 = vld [vmem:[#allocation61_spill] sm:$0xff]  ;;  %v6332_v28 = vadd.f32 %v2829_v21, %v6196_v55 }
 0x492   : > { %7543 = vst [vmem:[#allocation66_spill] sm:$0xff] %v6248_v18  ;;  %7544 = vst [vmem:[#allocation67_spill] sm:$0xff] %v6250_v15  ;;  %v6266_v18 = vadd.f32 %v2799_v51, %v6224_v61  ;;  %v6268_v15 = vadd.f32 %v2899_v50, %v2291_v10  ;;  %v6288_v50 = vadd.f32 %v2809_v37, %v6218_v56  ;;  %v7586_v56 = vld [vmem:[#allocation32_spill] sm:$0xff]  ;;  %v7611_v8 = vld [vmem:[#allocation33_spill] sm:$0xff] }
 0x493   : > { %7550 = vst [vmem:[#allocation73_spill] sm:$0xff] %v6263_v16  ;;  %v2847_v34 = vpop.f32.mrf.mxu0  ;;  %v2947_v20 = vpop.f32.mrf.mxu1  ;;  %7558 = vst [vmem:[#allocation81_spill] sm:$0xff] %v6283_v53  ;;  %v6293_v51 = vadd.f32 %v2813_v5, %v6207_v14  ;;  %v6323_v10 = vadd.f32 %v2925_v62, %v2316_v42  ;;  %v6329_v14 = vadd.f32 %v2927_v45, %v7575_v40  ;;  %v7588_v42 = vld [vmem:[#allocation62_spill] sm:$0xff] }
 0x494   : > { %7551 = vst [vmem:[#allocation74_spill] sm:$0xff] %v6266_v18  ;;  %7552 = vst [vmem:[#allocation75_spill] sm:$0xff] %v6268_v15  ;;  %v6340_v62 = vadd.f32 %v2929_v58, %v7575_v40  ;;  %v6349_v45 = vadd.f32 %v2835_v27, %v7580_v41  ;;  %v6362_v57 = vadd.f32 %v7588_v42, %v7587_v39  ;;  %v7591_v27 = vld [vmem:[#allocation63_spill] sm:$0xff]  ;;  %v7595_v41 = vld [vmem:[#allocation41_spill] sm:$0xff] }
 0x495   : > { %v2849_v59 = vpop.f32.mrf.mxu0  ;;  %v6285_v61 = vpop.f32.mrf.mxu1  ;;  %7560 = vst [vmem:[#allocation83_spill] sm:$0xff] %v6288_v50  ;;  %7562 = vst [vmem:[#allocation85_spill] sm:$0xff] %v6293_v51 }
 0x496   : > { %7559 = vst [vmem:[#allocation82_spill] sm:$0xff] %v6285_v61  ;;  %7566 = vst [vmem:[#allocation89_spill] sm:$0xff] %v6303_v13 }
 0x497   : > { %v2853_v22 = vpop.f32.mrf.mxu0  ;;  %v2953_v37 = vpop.f32.mrf.mxu1  ;;  %7569 = vst [vmem:[#allocation92_spill] sm:$0xff] %v6310_v26  ;;  %7570 = vst [vmem:[#allocation93_spill] sm:$0xff] %v6313_v24  ;;  %v7596_v17 = vld [vmem:[#allocation64_spill] sm:$0xff]  ;;  %v7598_v3 = vld [vmem:[#allocation65_spill] sm:$0xff] }
 0x498   : > { %v6316_v5 = vadd.f32 %v2953_v37, %v6123_v46  ;;  %7571 = vst [vmem:[#allocation94_spill] sm:$0xff] %v6318_v6  ;;  %7573 = vst [vmem:[#allocation96_spill] sm:$0xff] %v6323_v10  ;;  %v6366_v37 = vadd.f32 %v7591_v27, %v7590_v25  ;;  %v7597_v27 = vld [vmem:[#allocation57_spill] sm:$0xff]  ;;  %v7610_v26 = vld [vmem:[#allocation31_spill] sm:$0xff] }
 0x499   : > { %v2855_v36 = vpop.f32.mrf.mxu0  ;;  %v2955_v60 = vpop.f32.mrf.mxu1  ;;  %7576 = vst [vmem:[#allocation61_spill] sm:$0xff] %v6329_v14  ;;  %7577 = vst [vmem:[#allocation98_spill] sm:$0xff] %v6332_v28  ;;  %v6383_v16 = vadd.f32 %v7598_v3, %v7597_v27 }
 0x49a   : > { %v3112_v48 = vmul.f32 %v6316_v5, %v6316_v5  ;;  %v6337_v0 = vadd.f32 %v2955_v60, %v6123_v46  ;;  %7579 = vst [vmem:[#allocation100_spill] sm:$0xff] %v6340_v62  ;;  %7583 = vst [vmem:[#allocation59_spill] sm:$0xff] %v6346_v7  ;;  %v6369_v60 = vadd.f32 %v2839_v49, %v7587_v39  ;;  %v7600_v49 = vld [vmem:[#allocation66_spill] sm:$0xff] }
 0x49b   : > { %7584 = vst [vmem:[#allocation101_spill] sm:$0xff] %v6349_v45  ;;  %v2857_v21 = vpop.f32.mrf.mxu0  ;;  %v2957_v55 = vpop.f32.mrf.mxu1  ;;  %7585 = vst [vmem:[#allocation102_spill] sm:$0xff] %v6352_v44  ;;  %v6387_v32 = vadd.f32 %v7600_v49, %v7595_v41  ;;  %v7601_v39 = vld [vmem:[#allocation42_spill] sm:$0xff] }
 0x49c   : > { %7578 = vst [vmem:[#allocation99_spill] sm:$0xff] %v6337_v0  ;;  %v3176_v46 = vmul.f32 %v3112_v48, %v6316_v5  ;;  %v3113_v58 = vmul.f32 %v6337_v0, %v6337_v0  ;;  %v6358_v63 = vadd.f32 %v2957_v55, %v7586_v56  ;;  %7589 = vst [vmem:[#allocation32_spill] sm:$0xff] %v6362_v57 }
 0x49d   : > { %7592 = vst [vmem:[#allocation46_spill] sm:$0xff] %v6366_v37  ;;  %7593 = vst [vmem:[#allocation62_spill] sm:$0xff] %v6369_v60  ;;  %v2859_v40 = vpop.f32.mrf.mxu0  ;;  %v2959_v48 = vpop.f32.mrf.mxu1  ;;  %v6376_v55 = vadd.f32 %v7596_v17, %v7595_v41  ;;  %v6390_v25 = vadd.f32 %v2847_v34, %v7601_v39  ;;  %v6401_v27 = vadd.f32 %v2849_v59, %v7601_v39  ;;  %v7606_v41 = vld [vmem:[#allocation37_spill] sm:$0xff]  ;;  %v7608_v59 = vld [vmem:[#allocation38_spill] sm:$0xff] }
 0x49e   : > { %7594 = vst [vmem:[#allocation60_spill] sm:$0xff] %v6372_v38  ;;  %v3240_v61 = vmul.f32 0.044715, %v3176_v46  ;;  %v3177_v42 = vmul.f32 %v3113_v58, %v6337_v0  ;;  %v3114_v15 = vmul.f32 %v6358_v63, %v6358_v63  ;;  %7599 = vst [vmem:[#allocation63_spill] sm:$0xff] %v6383_v16  ;;  %v6393_v17 = vadd.f32 %v2959_v48, %v7586_v56  ;;  %v7603_v58 = vld [vmem:[#allocation58_spill] sm:$0xff] }
 0x49f   : > { %v2863_v46 = vpop.f32.mrf.mxu0  ;;  %v2963_v33 = vpop.f32.mrf.mxu1  ;;  %v6396_v23 = vadd.f32 %v2947_v20, %v7603_v58  ;;  %7605 = vst [vmem:[#allocation65_spill] sm:$0xff] %v6401_v27  ;;  %v6404_v49 = vadd.f32 %v2853_v22, %v7606_v41  ;;  %v7607_v56 = vld [vmem:[#allocation30_spill] sm:$0xff]  ;;  %v6416_v39 = vadd.f32 %v2857_v21, %v7608_v59 }
 0x4a0   : > { %7602 = vst [vmem:[#allocation41_spill] sm:$0xff] %v6393_v17  ;;  %v3304_v29 = vadd.f32 %v3240_v61, %v6316_v5  ;;  %v3241_v38 = vmul.f32 0.044715, %v3177_v42  ;;  %v3178_v3 = vmul.f32 %v3114_v15, %v6358_v63  ;;  %v3115_v34 = vmul.f32 %v6393_v17, %v6393_v17 }
 0x4a1   : > { %7604 = vst [vmem:[#allocation64_spill] sm:$0xff] %v6396_v23  ;;  %v6409_v48 = vadd.f32 %v2963_v33, %v7607_v56  ;;  %v2865_v16 = vpop.f32.mrf.mxu0  ;;  %v2965_v20 = vpop.f32.mrf.mxu1  ;;  %v6412_v61 = vadd.f32 %v2855_v36, %v7606_v41 }
 0x4a2   : > { %v3368_v58 = vmul.f32 0.7978846, %v3304_v29  ;;  %v3305_v15 = vadd.f32 %v3241_v38, %v6337_v0  ;;  %v3242_v42 = vmul.f32 0.044715, %v3178_v3  ;;  %v3179_v22 = vmul.f32 %v3115_v34, %v6393_v17  ;;  %v6424_v29 = vpop.permute.xlu1 %2275 }
 0x4a3   : > { %v3116_v23 = vmul.f32 %v6409_v48, %v6409_v48  ;;  %v6422_v33 = vadd.f32 %v2965_v20, %v7607_v56  ;;  %v2867_v53 = vpop.f32.mrf.mxu0  ;;  %v2967_v52 = vpop.f32.mrf.mxu1  ;;  %v6428_v3 = vadd.f32 %v2859_v40, %v7608_v59 }
 0x4a4   : > { %4442 = vtanh.f32 %v3368_v58  ;;  %v3369_v36 = vmul.f32 0.7978846, %v3305_v15  ;;  %v3306_v38 = vadd.f32 %v3242_v42, %v6358_v63  ;;  %v3243_v21 = vmul.f32 0.044715, %v3179_v22 }
 0x4a5   : > { %7609 = vst [vmem:[#allocation66_spill] sm:$0xff] %v6422_v33  ;;  %v3180_v41 = vmul.f32 %v3116_v23, %v6409_v48  ;;  %v3117_v34 = vmul.f32 %v6422_v33, %v6422_v33  ;;  %v6434_v56 = vadd.f32 %v2967_v52, %v7610_v26  ;;  %v2869_v20 = vpop.f32.mrf.mxu0  ;;  %v2969_v35 = vpop.f32.mrf.mxu1  ;;  %v6437_v58 = vadd.f32 %v2863_v46, %v7611_v8  ;;  %v7613_v46 = vld [vmem:[#allocation34_spill] sm:$0xff] }
 0x4a6   : > { %v3370_v12 = vmul.f32 0.7978846, %v3306_v38  ;;  %v6440_v15 = vadd.f32 %v2865_v16, %v7611_v8  ;;  %v6443_v40 = vadd.f32 %v2969_v35, %v7610_v26  ;;  %v3307_v23 = vadd.f32 %v3243_v21, %v6393_v17  ;;  %v6449_v38 = vpop.permute.xlu0 %2280  ;;  %v7614_v8 = vld [vmem:[#allocation28_spill] sm:$0xff]  ;;  %v6463_v10 = vpop.permute.xlu1 %2265 }
 0x4a7   : > { %v3244_v42 = vmul.f32 0.044715, %v3180_v41  ;;  %v3181_v59 = vmul.f32 %v3117_v34, %v6422_v33  ;;  %v3118_v52 = vmul.f32 %v6434_v56, %v6434_v56  ;;  %v2873_v22 = vpop.f32.mrf.mxu0  ;;  %v2973_v44 = vpop.f32.mrf.mxu1  ;;  %v6452_v62 = vadd.f32 %v2867_v53, %v7613_v46  ;;  %7616 = vst [vmem:[#allocation30_spill] sm:$0xff] %v6463_v10 }
 0x4a8   : > { %7612 = vst [vmem:[#allocation42_spill] sm:$0xff] %v6443_v40  ;;  %4444 = vtanh.f32 %v3370_v12  ;;  %v3119_v16 = vmul.f32 %v6443_v40, %v6443_v40  ;;  %v6457_v35 = vadd.f32 %v2973_v44, %v7614_v8  ;;  %v3371_v12 = vmul.f32 0.7978846, %v3307_v23 }
 0x4a9   : > { %4446 = vtanh.f32 %v3369_v36  ;;  %v3308_v26 = vadd.f32 %v3244_v42, %v6409_v48  ;;  %v3245_v21 = vmul.f32 0.044715, %v3181_v59  ;;  %v3182_v41 = vmul.f32 %v3118_v52, %v6434_v56  ;;  %v6461_v34 = vpop.f32.mrf.mxu0  ;;  %v2975_v37 = vpop.f32.mrf.mxu1 }
 0x4aa   : > { %7615 = vst [vmem:[#allocation37_spill] sm:$0xff] %v6461_v34  ;;  %v3183_v53 = vmul.f32 %v3119_v16, %v6443_v40  ;;  %v3120_v7 = vmul.f32 %v6457_v35, %v6457_v35  ;;  %v6469_v44 = vadd.f32 %v2975_v37, %v7614_v8  ;;  %v6473_v52 = vadd.f32 %v2869_v20, %v7613_v46 }
 0x4ab   : > { %v3372_v36 = vmul.f32 0.7978846, %v3308_v26  ;;  %v3309_v42 = vadd.f32 %v3245_v21, %v6422_v33  ;;  %v3246_v59 = vmul.f32 0.044715, %v3182_v41  ;;  %v2877_v34 = vpop.f32.mrf.mxu0  ;;  %v2977_v14 = vpop.f32.mrf.mxu1  ;;  %v6476_v23 = vadd.f32 %v2873_v22, %v6463_v10  ;;  %v7619_v26 = vld [vmem:[#allocation29_spill] sm:$0xff] }
 0x4ac   : > { %7617 = vst [vmem:[#allocation38_spill] sm:$0xff] %v6469_v44  ;;  %v3247_v6 = vmul.f32 0.044715, %v3183_v53  ;;  %v3184_v16 = vmul.f32 %v3120_v7, %v6457_v35  ;;  %v3121_v18 = vmul.f32 %v6469_v44, %v6469_v44  ;;  %v6483_v21 = vadd.f32 %v2977_v14, %v7619_v26  ;;  %v6487_v41 = vpop.permute.xlu0 %2270 }
 0x4ad   : > { %7618 = vst [vmem:[#allocation31_spill] sm:$0xff] %v6476_v23  ;;  %4448 = vtanh.f32 %v3372_v36  ;;  %v3373_v37 = vmul.f32 0.7978846, %v3309_v42  ;;  %v3310_v8 = vadd.f32 %v3246_v59, %v6434_v56  ;;  %v6485_v20 = vpop.f32.mrf.mxu0  ;;  %v2979_v46 = vpop.f32.mrf.mxu1  ;;  %7621 = vst [vmem:[#allocation34_spill] sm:$0xff] %v6487_v41  ;;  %v6492_v36 = vadd.f32 %v2877_v34, %v6487_v41 }
 0x4ae   : > { %7620 = vst [vmem:[#allocation33_spill] sm:$0xff] %v6485_v20  ;;  %4450 = vtanh.f32 %v3371_v12  ;;  %v3311_v22 = vadd.f32 %v3247_v6, %v6443_v40  ;;  %v3248_v53 = vmul.f32 0.044715, %v3184_v16  ;;  %v3185_v7 = vmul.f32 %v3121_v18, %v6469_v44 }
 0x4af   : > { %v3374_v10 = vmul.f32 0.7978846, %v3310_v8  ;;  %7622 = vst [vmem:[#allocation28_spill] sm:$0xff] %v6492_v36  ;;  %v3122_v42 = vmul.f32 %v6483_v21, %v6483_v21  ;;  %v6497_v14 = vadd.f32 %v2979_v46, %v7619_v26  ;;  %v2883_v59 = vpop.f32.mrf.mxu0  ;;  %v2983_v20 = vpop.f32.mrf.mxu1  ;;  %4452 = vtanh.f32 %v3373_v37  ;;  %v7624_v8 = vld [vmem:[#allocation26_spill] sm:$0xff] }
 0x4b0   : > { %v3375_v23 = vmul.f32 0.7978846, %v3311_v22  ;;  %v3312_v12 = vadd.f32 %v3248_v53, %v6457_v35  ;;  %v3249_v6 = vmul.f32 0.044715, %v3185_v7  ;;  %v6504_v41 = vadd.f32 %v2983_v20, %v7624_v8 }
 0x4b1   : > { %7623 = vst [vmem:[#allocation29_spill] sm:$0xff] %v6497_v14  ;;  %v4443_v16 = vpop.eup %4442  ;;  %4454 = vtanh.f32 %v3374_v10  ;;  %v3186_v18 = vmul.f32 %v3122_v42, %v6483_v21  ;;  %v3123_v34 = vmul.f32 %v6497_v14, %v6497_v14  ;;  %v2885_v36 = vpop.f32.mrf.mxu0  ;;  %v6508_v22 = vadd.f32 %v2883_v59, %v6424_v29 }
 0x4b2   : > { %v2985_v26 = vpop.f32.mrf.mxu1  ;;  %v3496_v46 = vadd.f32 1.0, %v4443_v16  ;;  %v3376_v4 = vmul.f32 0.7978846, %v3312_v12  ;;  %v3313_v37 = vadd.f32 %v3249_v6, %v6469_v44  ;;  %4456 = vtanh.f32 %v3375_v23 }
 0x4b3   : > { %7625 = vst [vmem:[#allocation26_spill] sm:$0xff] %v6508_v22  ;;  %v3250_v53 = vmul.f32 0.044715, %v3186_v18  ;;  %v3187_v10 = vmul.f32 %v3123_v34, %v6497_v14  ;;  %v3124_v7 = vmul.f32 %v6504_v41, %v6504_v41  ;;  %v2887_v42 = vpop.f32.mrf.mxu0  ;;  %v6514_v16 = vadd.f32 %v2985_v26, %v7624_v8 }
 0x4b4   : > { %v2987_v17 = vpop.f32.mrf.mxu1  ;;  %v3560_v20 = vmul.f32 0.5, %v3496_v46  ;;  %4458 = vtanh.f32 %v3376_v4  ;;  %v3377_v31 = vmul.f32 0.7978846, %v3313_v37  ;;  %v6519_v18 = vadd.f32 %v2885_v36, %v6424_v29 }
 0x4b5   : > { %7626 = vst [vmem:[#allocation103_spill] sm:$0xff] %v6514_v16  ;;  %v4445_v12 = vpop.eup %4444  ;;  %v3314_v6 = vadd.f32 %v3250_v53, %v6483_v21  ;;  %v3251_v59 = vmul.f32 0.044715, %v3187_v10  ;;  %v3188_v23 = vmul.f32 %v3124_v7, %v6504_v41  ;;  %v3125_v8 = vmul.f32 %v6514_v16, %v6514_v16  ;;  %v7631_v10 = vld [vmem:[#allocation27_spill] sm:$0xff]  ;;  %v2889_v36 = vpop.f32.mrf.mxu0 }
 0x4b6   : > { %7627 = vst [vmem:[#allocation104_spill] sm:$0xff] %v6519_v18  ;;  %v2989_v34 = vpop.f32.mrf.mxu1  ;;  %v6521_v22 = vpop.eup %4446  ;;  %v6524_v0 = vmul.f32 %v3560_v20, %v6316_v5  ;;  %v3498_v4 = vadd.f32 1.0, %v4445_v12  ;;  %v6529_v26 = vadd.f32 %v2887_v42, %v6449_v38  ;;  %v6533_v29 = vadd.f32 %v2987_v17, %v7631_v10 }
 0x4b7   : > { %7628 = vst [vmem:[#allocation105_spill] sm:$0xff] %v6521_v22  ;;  %v3378_v46 = vmul.f32 0.7978846, %v3314_v6  ;;  %v3315_v37 = vadd.f32 %v3251_v59, %v6497_v14  ;;  %v3252_v53 = vmul.f32 0.044715, %v3188_v23  ;;  %4460 = vtanh.f32 %v3377_v31 }
 0x4b8   : > { %7629 = vst [vmem:[#allocation106_spill] sm:$0xff] %v6524_v0  ;;  %7630 = vst [vmem:[#allocation107_spill] sm:$0xff] %v6529_v26  ;;  %v2993_v7 = vpop.f32.mrf.mxu1  ;;  %v3562_v18 = vmul.f32 0.5, %v3498_v4  ;;  %v3189_v5 = vmul.f32 %v3125_v8, %v6514_v16  ;;  %v6537_v20 = vadd.f32 %v2989_v34, %v7631_v10  ;;  %v3126_v6 = vmul.f32 %v6533_v29, %v6533_v29  ;;  %v7634_v4 = vld [vmem:[#allocation24_spill] sm:$0xff] }
 0x4b9   : > { %4462 = vtanh.f32 %v3378_v46  ;;  %v3379_v12 = vmul.f32 0.7978846, %v3315_v37  ;;  %v3316_v42 = vadd.f32 %v3252_v53, %v6504_v41  ;;  %v6543_v26 = vadd.f32 %v2889_v36, %v6449_v38 }
 0x4ba   : > { %7632 = vst [vmem:[#allocation27_spill] sm:$0xff] %v6537_v20  ;;  %v2995_v59 = vpop.f32.mrf.mxu1  ;;  %v4449_v23 = vpop.eup %4448  ;;  %v3253_v17 = vmul.f32 0.044715, %v3189_v5  ;;  %v3127_v31 = vmul.f32 %v6537_v20, %v6537_v20  ;;  %v6548_v8 = vadd.f32 %v2993_v7, %v7634_v4  ;;  %v3190_v53 = vmul.f32 %v3126_v6, %v6533_v29 }
 0x4bb   : > { %7633 = vst [vmem:[#allocation108_spill] sm:$0xff] %v6543_v26  ;;  %v6550_v34 = vpop.eup %4450  ;;  %v3500_v46 = vadd.f32 1.0, %v4449_v23  ;;  %4464 = vtanh.f32 %v3379_v12  ;;  %v3380_v37 = vmul.f32 0.7978846, %v3316_v42  ;;  %v6558_v36 = vadd.f32 %v2995_v59, %v7634_v4  ;;  %v7639_v42 = vld [vmem:[#allocation25_spill] sm:$0xff] }
 0x4bc   : > { %7635 = vst [vmem:[#allocation24_spill] sm:$0xff] %v6550_v34  ;;  %v2997_v10 = vpop.f32.mrf.mxu1  ;;  %v3317_v0 = vadd.f32 %v3253_v17, %v6514_v16  ;;  %v3191_v5 = vmul.f32 %v3127_v31, %v6537_v20  ;;  %v3128_v38 = vmul.f32 %v6548_v8, %v6548_v8  ;;  %v6560_v7 = vpop.eup %4452  ;;  %v6563_v26 = vmul.f32 %v3562_v18, %v6358_v63 }
 0x4bd   : > { %7636 = vst [vmem:[#allocation109_spill] sm:$0xff] %v6558_v36  ;;  %7637 = vst [vmem:[#allocation110_spill] sm:$0xff] %v6560_v7  ;;  %4466 = vtanh.f32 %v3380_v37  ;;  %v3254_v12 = vmul.f32 0.044715, %v3190_v53  ;;  %v6566_v6 = vadd.f32 %v2997_v10, %v7639_v42  ;;  %v3129_v59 = vmul.f32 %v6558_v36, %v6558_v36 }
 0x4be   : > { %7638 = vst [vmem:[#allocation111_spill] sm:$0xff] %v6563_v26  ;;  %v2999_v23 = vpop.f32.mrf.mxu1  ;;  %v4455_v17 = vpop.eup %4454  ;;  %v3381_v30 = vmul.f32 0.7978846, %v3317_v0  ;;  %v3255_v31 = vmul.f32 0.044715, %v3191_v5  ;;  %v3192_v34 = vmul.f32 %v3128_v38, %v6548_v8  ;;  %v3564_v4 = vmul.f32 0.5, %v3500_v46 }
 0x4bf   : > { %v3502_v22 = vadd.f32 1.0, %v4455_v17  ;;  %v3318_v50 = vadd.f32 %v3254_v12, %v6533_v29  ;;  %v3130_v63 = vmul.f32 %v6566_v6, %v6566_v6  ;;  %v6574_v37 = vpop.eup %4456  ;;  %v3193_v10 = vmul.f32 %v3129_v59, %v6558_v36 }
 0x4c0   : > { %v3003_v18 = vpop.f32.mrf.mxu1  ;;  %7640 = vst [vmem:[#allocation25_spill] sm:$0xff] %v6574_v37  ;;  %4468 = vtanh.f32 %v3381_v30  ;;  %v3319_v53 = vadd.f32 %v3255_v31, %v6537_v20  ;;  %v3256_v0 = vmul.f32 0.044715, %v3192_v34  ;;  %v6580_v17 = vadd.f32 %v2999_v23, %v7639_v42 }
 0x4c1   : > { %v4459_v5 = vpop.eup %4458  ;;  %v3566_v38 = vmul.f32 0.5, %v3502_v22  ;;  %v3382_v26 = vmul.f32 0.7978846, %v3318_v50  ;;  %v3194_v46 = vmul.f32 %v3130_v63, %v6566_v6  ;;  %v3257_v19 = vmul.f32 0.044715, %v3193_v10 }
 0x4c2   : > { %7641 = vst [vmem:[#allocation112_spill] sm:$0xff] %v6580_v17  ;;  %v3005_v12 = vpop.f32.mrf.mxu1  ;;  %v3504_v2 = vadd.f32 1.0, %v4459_v5  ;;  %v3383_v1 = vmul.f32 0.7978846, %v3319_v53  ;;  %v3320_v40 = vadd.f32 %v3256_v0, %v6548_v8  ;;  %v6584_v30 = vmul.f32 %v3564_v4, %v6409_v48  ;;  %v7644_v0 = vld [vmem:[#allocation22_spill] sm:$0xff] }
 0x4c3   : > { %4470 = vtanh.f32 %v3382_v26  ;;  %v3258_v34 = vmul.f32 0.044715, %v3194_v46  ;;  %v3131_v22 = vmul.f32 %v6580_v17, %v6580_v17  ;;  %v3321_v42 = vadd.f32 %v3257_v19, %v6558_v36  ;;  %v7646_v19 = vld [vmem:[#allocation23_spill] sm:$0xff] }
 0x4c4   : > { %7642 = vst [vmem:[#allocation113_spill] sm:$0xff] %v6584_v30  ;;  %v3007_v50 = vpop.f32.mrf.mxu1  ;;  %v3568_v31 = vmul.f32 0.5, %v3504_v2  ;;  %4472 = vtanh.f32 %v3383_v1  ;;  %v3384_v59 = vmul.f32 0.7978846, %v3320_v40  ;;  %v6589_v23 = vpop.eup %4460  ;;  %v6594_v48 = vadd.f32 %v3003_v18, %v7644_v0 }
 0x4c5   : > { %7643 = vst [vmem:[#allocation114_spill] sm:$0xff] %v6589_v23  ;;  %v3322_v63 = vadd.f32 %v3258_v34, %v6566_v6  ;;  %v3195_v53 = vmul.f32 %v3131_v22, %v6580_v17  ;;  %v6597_v26 = vadd.f32 %v3005_v12, %v7644_v0  ;;  %v6600_v2 = vmul.f32 %v3566_v38, %v6434_v56 }
 0x4c6   : > { %v3009_v4 = vpop.f32.mrf.mxu1  ;;  %v4463_v10 = vpop.eup %4462  ;;  %4474 = vtanh.f32 %v3384_v59  ;;  %v3385_v1 = vmul.f32 0.7978846, %v3321_v42  ;;  %v6603_v40 = vadd.f32 %v3007_v50, %v7646_v19  ;;  %v3132_v18 = vmul.f32 %v6594_v48, %v6594_v48 }
 0x4c7   : > { %7645 = vst [vmem:[#allocation22_spill] sm:$0xff] %v6600_v2  ;;  %v3506_v5 = vadd.f32 1.0, %v4463_v10  ;;  %v3386_v46 = vmul.f32 0.7978846, %v3322_v63  ;;  %v3259_v34 = vmul.f32 0.044715, %v3195_v53  ;;  %v6610_v12 = vmul.f32 %v3568_v31, %v6457_v35 }
 0x4c8   : > { %v3013_v22 = vpop.f32.mrf.mxu1  ;;  %v6607_v30 = vpop.eup %4464  ;;  %v3133_v56 = vmul.f32 %v6597_v26, %v6597_v26  ;;  %v3134_v38 = vmul.f32 %v6603_v40, %v6603_v40  ;;  %v6617_v50 = vadd.f32 %v3009_v4, %v7646_v19  ;;  %v3196_v63 = vmul.f32 %v3132_v18, %v6594_v48  ;;  %v7649_v2 = vld [vmem:[#allocation20_spill] sm:$0xff] }
 0x4c9   : > { %7647 = vst [vmem:[#allocation23_spill] sm:$0xff] %v6607_v30  ;;  %7648 = vst [vmem:[#allocation115_spill] sm:$0xff] %v6610_v12  ;;  %v3570_v59 = vmul.f32 0.5, %v3506_v5  ;;  %4476 = vtanh.f32 %v3386_v46  ;;  %v3323_v42 = vadd.f32 %v3259_v34, %v6580_v17  ;;  %v6626_v33 = vadd.f32 %v3013_v22, %v7649_v2 }
 0x4ca   : > { %v3015_v53 = vpop.f32.mrf.mxu1  ;;  %v4467_v0 = vpop.eup %4466  ;;  %v3197_v35 = vmul.f32 %v3133_v56, %v6597_v26  ;;  %v3198_v31 = vmul.f32 %v3134_v38, %v6603_v40  ;;  %v3135_v10 = vmul.f32 %v6617_v50, %v6617_v50  ;;  %4478 = vtanh.f32 %v3385_v1 }
 0x4cb   : > { %v3508_v4 = vadd.f32 1.0, %v4467_v0  ;;  %v3387_v19 = vmul.f32 0.7978846, %v3323_v42  ;;  %v3260_v5 = vmul.f32 0.044715, %v3196_v63  ;;  %v3136_v56 = vmul.f32 %v6626_v33, %v6626_v33 }
 0x4cc   : > { %v3017_v46 = vpop.f32.mrf.mxu1  ;;  %v3261_v34 = vmul.f32 0.044715, %v3197_v35  ;;  %v3262_v37 = vmul.f32 0.044715, %v3198_v31  ;;  %v3199_v18 = vmul.f32 %v3135_v10, %v6617_v50  ;;  %v6634_v38 = vmul.f32 %v3570_v59, %v6483_v21  ;;  %v7652_v59 = vld [vmem:[#allocation21_spill] sm:$0xff] }
 0x4cd   : > { %v6631_v54 = vpop.eup %4468  ;;  %v3572_v7 = vmul.f32 0.5, %v3508_v4  ;;  %v3324_v22 = vadd.f32 %v3260_v5, %v6594_v48  ;;  %v6638_v1 = vadd.f32 %v3015_v53, %v7649_v2  ;;  %v3200_v31 = vmul.f32 %v3136_v56, %v6626_v33 }
 0x4ce   : > { %7650 = vst [vmem:[#allocation20_spill] sm:$0xff] %v6631_v54  ;;  %7651 = vst [vmem:[#allocation116_spill] sm:$0xff] %v6634_v38  ;;  %v3019_v42 = vpop.f32.mrf.mxu1  ;;  %v3325_v63 = vadd.f32 %v3261_v34, %v6597_v26  ;;  %v3326_v0 = vadd.f32 %v3262_v37, %v6603_v40  ;;  %v3263_v35 = vmul.f32 0.044715, %v3199_v18  ;;  %4480 = vtanh.f32 %v3387_v19 }
 0x4cf   : > { %v3388_v10 = vmul.f32 0.7978846, %v3324_v22  ;;  %v3137_v21 = vmul.f32 %v6638_v1, %v6638_v1  ;;  %v6646_v4 = vadd.f32 %v3017_v46, %v7652_v59  ;;  %v3264_v34 = vmul.f32 0.044715, %v3200_v31 }
 0x4d0   : > { %v3023_v5 = vpop.f32.mrf.mxu1  ;;  %v4471_v47 = vpop.eup %4470  ;;  %v3389_v2 = vmul.f32 0.7978846, %v3325_v63  ;;  %v3390_v53 = vmul.f32 0.7978846, %v3326_v0  ;;  %v3327_v38 = vadd.f32 %v3263_v35, %v6617_v50  ;;  %v6656_v63 = vadd.f32 %v3019_v42, %v7652_v59  ;;  %v7655_v59 = vld [vmem:[#allocation18_spill] sm:$0xff] }
 0x4d1   : > { %v6649_v13 = vpop.eup %4472  ;;  %v3510_v37 = vadd.f32 1.0, %v4471_v47  ;;  %4482 = vtanh.f32 %v3388_v10  ;;  %v3201_v19 = vmul.f32 %v3137_v21, %v6638_v1  ;;  %v3138_v18 = vmul.f32 %v6646_v4, %v6646_v4 }
 0x4d2   : > { %7653 = vst [vmem:[#allocation21_spill] sm:$0xff] %v6649_v13  ;;  %v3025_v56 = vpop.f32.mrf.mxu1  ;;  %4484 = vtanh.f32 %v3389_v2  ;;  %v3391_v46 = vmul.f32 0.7978846, %v3327_v38  ;;  %v3328_v22 = vadd.f32 %v3264_v34, %v6626_v33  ;;  %v6659_v35 = vmul.f32 %v3572_v7, %v6504_v41 }
 0x4d3   : > { %v4475_v0 = vpop.eup %4474  ;;  %4486 = vtanh.f32 %v3390_v53  ;;  %v3265_v47 = vmul.f32 0.044715, %v3201_v19  ;;  %v3202_v31 = vmul.f32 %v3138_v18, %v6646_v4  ;;  %v3574_v21 = vmul.f32 0.5, %v3510_v37 }
 0x4d4   : > { %7654 = vst [vmem:[#allocation117_spill] sm:$0xff] %v6659_v35  ;;  %v3027_v10 = vpop.f32.mrf.mxu1  ;;  %v3512_v14 = vadd.f32 1.0, %v4475_v0  ;;  %v3392_v44 = vmul.f32 0.7978846, %v3328_v22  ;;  %v3139_v38 = vmul.f32 %v6656_v63, %v6656_v63  ;;  %4488 = vtanh.f32 %v3391_v46 }
 0x4d5   : > { %v3329_v2 = vadd.f32 %v3265_v47, %v6638_v1  ;;  %v3266_v42 = vmul.f32 0.044715, %v3202_v31  ;;  %v6666_v34 = vadd.f32 %v3023_v5, %v7655_v59  ;;  %v6670_v37 = vadd.f32 %v3025_v56, %v7655_v59 }
 0x4d6   : > { %v3029_v41 = vpop.f32.mrf.mxu1  ;;  %v4477_v7 = vpop.eup %4476  ;;  %v3576_v53 = vmul.f32 0.5, %v3512_v14  ;;  %4490 = vtanh.f32 %v3392_v44  ;;  %v3203_v19 = vmul.f32 %v3139_v38, %v6656_v63  ;;  %v6678_v5 = vmul.f32 %v3574_v21, %v6533_v29  ;;  %v7657_v38 = vld [vmem:[#allocation19_spill] sm:$0xff] }
 0x4d7   : > { %v3514_v18 = vadd.f32 1.0, %v4477_v7  ;;  %v3393_v22 = vmul.f32 0.7978846, %v3329_v2  ;;  %v3330_v0 = vadd.f32 %v3266_v42, %v6646_v4  ;;  %v3140_v46 = vmul.f32 %v6666_v34, %v6666_v34  ;;  %v6675_v31 = vpop.eup %4478 }
 0x4d8   : > { %v3033_v47 = vpop.f32.mrf.mxu1  ;;  %7656 = vst [vmem:[#allocation18_spill] sm:$0xff] %v6678_v5  ;;  %v3267_v14 = vmul.f32 0.044715, %v3203_v19  ;;  %v3141_v44 = vmul.f32 %v6670_v37, %v6670_v37  ;;  %v6683_v56 = vadd.f32 %v3027_v10, %v7657_v38  ;;  %v6691_v21 = vadd.f32 %v3029_v41, %v7657_v38  ;;  %v7663_v38 = vld [vmem:[#allocation56_spill] sm:$0xff] }
 0x4d9   : > { %v3578_v59 = vmul.f32 0.5, %v3514_v18  ;;  %4492 = vtanh.f32 %v3393_v22  ;;  %v3394_v2 = vmul.f32 0.7978846, %v3330_v0  ;;  %v3204_v42 = vmul.f32 %v3140_v46, %v6666_v34  ;;  %v7659_v18 = vld [vmem:[#allocation55_spill] sm:$0xff] }
 0x4da   : > { %v3035_v7 = vpop.f32.mrf.mxu1  ;;  %v3331_v12 = vadd.f32 %v3267_v14, %v6656_v63  ;;  %v3205_v51 = vmul.f32 %v3141_v44, %v6670_v37  ;;  %v3142_v29 = vmul.f32 %v6683_v56, %v6683_v56  ;;  %v6694_v19 = vmul.f32 %v3576_v53, %v6548_v8 }
 0x4db   : > { %4494 = vtanh.f32 %v3394_v2  ;;  %v3268_v10 = vmul.f32 0.044715, %v3204_v42  ;;  %v6697_v22 = vadd.f32 %v3033_v47, %v7659_v18  ;;  %v6699_v46 = vpop.eup %4480  ;;  %v6702_v14 = vmul.f32 %v3578_v59, %v6566_v6 }
 0x4dc   : > { %7658 = vst [vmem:[#allocation19_spill] sm:$0xff] %v6694_v19  ;;  %v3037_v0 = vpop.f32.mrf.mxu1  ;;  %7660 = vst [vmem:[#allocation55_spill] sm:$0xff] %v6699_v46  ;;  %v3269_v44 = vmul.f32 0.044715, %v3205_v51  ;;  %v3206_v30 = vmul.f32 %v3142_v29, %v6683_v56  ;;  %v3143_v41 = vmul.f32 %v6691_v21, %v6691_v21  ;;  %v6711_v47 = vadd.f32 %v3035_v7, %v7659_v18 }
 0x4dd   : > { %7661 = vst [vmem:[#allocation118_spill] sm:$0xff] %v6702_v14  ;;  %v3332_v8 = vadd.f32 %v3268_v10, %v6666_v34  ;;  %v3144_v53 = vmul.f32 %v6697_v22, %v6697_v22  ;;  %v6714_v2 = vadd.f32 %v3037_v0, %v7663_v38  ;;  %v3395_v59 = vmul.f32 0.7978846, %v3331_v12 }
 0x4de   : > { %7662 = vst [vmem:[#allocation119_spill] sm:$0xff] %v6711_v47  ;;  %v3039_v42 = vpop.f32.mrf.mxu1  ;;  %v4483_v6 = vpop.eup %4482  ;;  %v3333_v51 = vadd.f32 %v3269_v44, %v6670_v37  ;;  %v3270_v29 = vmul.f32 0.044715, %v3206_v30  ;;  %v3207_v23 = vmul.f32 %v3143_v41, %v6691_v21  ;;  %v3145_v7 = vmul.f32 %v6711_v47, %v6711_v47 }
 0x4df   : > { %v6718_v28 = vpop.eup %4484  ;;  %v3516_v10 = vadd.f32 1.0, %v4483_v6  ;;  %v3396_v5 = vmul.f32 0.7978846, %v3332_v8  ;;  %v3208_v11 = vmul.f32 %v3144_v53, %v6697_v22  ;;  %v3146_v30 = vmul.f32 %v6714_v2, %v6714_v2 }
 0x4e0   : > { %v3043_v18 = vpop.f32.mrf.mxu1  ;;  %v4487_v0 = vpop.eup %4486  ;;  %v3397_v43 = vmul.f32 0.7978846, %v3333_v51  ;;  %v3334_v35 = vadd.f32 %v3270_v29, %v6683_v56  ;;  %v3271_v12 = vmul.f32 0.044715, %v3207_v23  ;;  %v3209_v16 = vmul.f32 %v3145_v7, %v6711_v47 }
 0x4e1   : > { %v3580_v44 = vmul.f32 0.5, %v3516_v10  ;;  %v3518_v41 = vadd.f32 1.0, %v4487_v0  ;;  %4496 = vtanh.f32 %v3396_v5  ;;  %v3272_v24 = vmul.f32 0.044715, %v3208_v11  ;;  %v6726_v8 = vpop.eup %4488 }
 0x4e2   : > { %v3045_v6 = vpop.f32.mrf.mxu1  ;;  %4498 = vtanh.f32 %v3395_v59  ;;  %v3398_v53 = vmul.f32 0.7978846, %v3334_v35  ;;  %v3335_v20 = vadd.f32 %v3271_v12, %v6691_v21  ;;  %v3210_v29 = vmul.f32 %v3146_v30, %v6714_v2 }
 0x4e3   : > { %v4491_v51 = vpop.eup %4490  ;;  %v3582_v13 = vmul.f32 0.5, %v3518_v41  ;;  %4500 = vtanh.f32 %v3397_v43  ;;  %v3336_v23 = vadd.f32 %v3272_v24, %v6697_v22  ;;  %v3273_v5 = vmul.f32 0.044715, %v3209_v16 }
 0x4e4   : > { %v3047_v10 = vpop.f32.mrf.mxu1  ;;  %v3520_v0 = vadd.f32 1.0, %v4491_v51  ;;  %4502 = vtanh.f32 %v3398_v53  ;;  %v3399_v11 = vmul.f32 0.7978846, %v3335_v20  ;;  %v6733_v60 = vmul.f32 %v3580_v44, %v6594_v48  ;;  %v7665_v53 = vld [vmem:[#allocation53_spill] sm:$0xff]  ;;  %v7667_v51 = vld [vmem:[#allocation54_spill] sm:$0xff] }
 0x4e5   : > { %v3400_v35 = vmul.f32 0.7978846, %v3336_v23  ;;  %v3274_v59 = vmul.f32 0.044715, %v3210_v29  ;;  %v6736_v12 = vadd.f32 %v3039_v42, %v7663_v38  ;;  %v6741_v24 = vmul.f32 %v3582_v13, %v6603_v40 }
 0x4e6   : > { %v3049_v7 = vpop.f32.mrf.mxu1  ;;  %v6738_v41 = vpop.eup %4492  ;;  %v3584_v43 = vmul.f32 0.5, %v3520_v0  ;;  %v3337_v30 = vadd.f32 %v3273_v5, %v6711_v47  ;;  %v6745_v20 = vadd.f32 %v3043_v18, %v7665_v53  ;;  %v6751_v38 = vadd.f32 %v3045_v6, %v7665_v53 }
 0x4e7   : > { %7664 = vst [vmem:[#allocation56_spill] sm:$0xff] %v6736_v12  ;;  %4504 = vtanh.f32 %v3400_v35  ;;  %v3338_v16 = vadd.f32 %v3274_v59, %v6714_v2  ;;  %v3147_v48 = vmul.f32 %v6736_v12, %v6736_v12  ;;  %v6756_v23 = vadd.f32 %v3047_v10, %v7667_v51 }
 0x4e8   : > { %7666 = vst [vmem:[#allocation53_spill] sm:$0xff] %v6751_v38  ;;  %v3053_v42 = vpop.f32.mrf.mxu1  ;;  %v4495_v44 = vpop.eup %4494  ;;  %4506 = vtanh.f32 %v3399_v11  ;;  %v3401_v13 = vmul.f32 0.7978846, %v3337_v30  ;;  %v3148_v40 = vmul.f32 %v6745_v20, %v6745_v20  ;;  %v3149_v5 = vmul.f32 %v6751_v38, %v6751_v38 }
 0x4e9   : > { %v3522_v18 = vadd.f32 1.0, %v4495_v44  ;;  %v3402_v29 = vmul.f32 0.7978846, %v3338_v16  ;;  %v3211_v0 = vmul.f32 %v3147_v48, %v6736_v12  ;;  %v3150_v11 = vmul.f32 %v6756_v23, %v6756_v23 }
 0x4ea   : > { %v3055_v35 = vpop.f32.mrf.mxu1  ;;  %4508 = vtanh.f32 %v3401_v13  ;;  %v3212_v6 = vmul.f32 %v3148_v40, %v6745_v20  ;;  %v6765_v59 = vadd.f32 %v3049_v7, %v7667_v51  ;;  %v6768_v10 = vmul.f32 %v3584_v43, %v6626_v33  ;;  %v7669_v40 = vld [vmem:[#allocation51_spill] sm:$0xff] }
 0x4eb   : > { %4510 = vtanh.f32 %v3402_v29  ;;  %v3275_v30 = vmul.f32 0.044715, %v3211_v0  ;;  %v3213_v53 = vmul.f32 %v3149_v5, %v6751_v38  ;;  %v3214_v44 = vmul.f32 %v3150_v11, %v6756_v23 }
 0x4ec   : > { %7668 = vst [vmem:[#allocation54_spill] sm:$0xff] %v6765_v59  ;;  %v3057_v16 = vpop.f32.mrf.mxu1  ;;  %v3276_v48 = vmul.f32 0.044715, %v3212_v6  ;;  %v3151_v13 = vmul.f32 %v6765_v59, %v6765_v59  ;;  %v6775_v47 = vadd.f32 %v3053_v42, %v7669_v40  ;;  %v3586_v45 = vmul.f32 0.5, %v3522_v18 }
 0x4ed   : > { %v3339_v7 = vadd.f32 %v3275_v30, %v6736_v12  ;;  %v3277_v51 = vmul.f32 0.044715, %v3213_v53  ;;  %v6779_v33 = vadd.f32 %v3055_v35, %v7669_v40  ;;  %v3278_v5 = vmul.f32 0.044715, %v3214_v44 }
 0x4ee   : > { %v3059_v43 = vpop.f32.mrf.mxu1  ;;  %v4497_v29 = vpop.eup %4496  ;;  %v3340_v0 = vadd.f32 %v3276_v48, %v6745_v20  ;;  %v3215_v6 = vmul.f32 %v3151_v13, %v6765_v59  ;;  %v3152_v11 = vmul.f32 %v6775_v47, %v6775_v47  ;;  %v6797_v57 = vmul.f32 %v3586_v45, %v6646_v4 }
 0x4ef   : > { %7670 = vst [vmem:[#allocation51_spill] sm:$0xff] %v6779_v33  ;;  %v6785_v54 = vpop.eup %4498  ;;  %v3524_v42 = vadd.f32 1.0, %v4497_v29  ;;  %v3403_v18 = vmul.f32 0.7978846, %v3339_v7  ;;  %v3341_v30 = vadd.f32 %v3277_v51, %v6751_v38  ;;  %v3153_v35 = vmul.f32 %v6779_v33, %v6779_v33 }
 0x4f0   : > { %v3063_v53 = vpop.f32.mrf.mxu1  ;;  %v6790_v40 = vpop.eup %4500  ;;  %v3404_v12 = vmul.f32 0.7978846, %v3340_v0  ;;  %v3342_v48 = vadd.f32 %v3278_v5, %v6756_v23  ;;  %v3279_v44 = vmul.f32 0.044715, %v3215_v6  ;;  %v3216_v13 = vmul.f32 %v3152_v11, %v6775_v47 }
 0x4f1   : > { %v4503_v19 = vpop.eup %4502  ;;  %v3588_v9 = vmul.f32 0.5, %v3524_v42  ;;  %4512 = vtanh.f32 %v3403_v18  ;;  %v3405_v17 = vmul.f32 0.7978846, %v3341_v30  ;;  %v3217_v7 = vmul.f32 %v3153_v35, %v6779_v33  ;;  %v7671_v18 = vld [vmem:[#allocation52_spill] sm:$0xff] }
 0x4f2   : > { %v3065_v29 = vpop.f32.mrf.mxu1  ;;  %v3526_v51 = vadd.f32 1.0, %v4503_v19  ;;  %4514 = vtanh.f32 %v3404_v12  ;;  %v3406_v38 = vmul.f32 0.7978846, %v3342_v48  ;;  %v3343_v14 = vadd.f32 %v3279_v44, %v6765_v59 }
 0x4f3   : > { %4516 = vtanh.f32 %v3405_v17  ;;  %v3280_v0 = vmul.f32 0.044715, %v3216_v13  ;;  %v3281_v5 = vmul.f32 0.044715, %v3217_v7  ;;  %v6800_v30 = vadd.f32 %v3057_v16, %v7671_v18 }
 0x4f4   : > { %v3067_v6 = vpop.f32.mrf.mxu1  ;;  %v4505_v11 = vpop.eup %4504  ;;  %v3590_v36 = vmul.f32 0.5, %v3526_v51  ;;  %4518 = vtanh.f32 %v3406_v38  ;;  %v3407_v42 = vmul.f32 0.7978846, %v3343_v14  ;;  %v6807_v45 = vadd.f32 %v3059_v43, %v7671_v18  ;;  %v7673_v38 = vld [vmem:[#allocation49_spill] sm:$0xff] }
 0x4f5   : > { %v6802_v35 = vpop.eup %4506  ;;  %v3528_v19 = vadd.f32 1.0, %v4505_v11  ;;  %v3344_v12 = vadd.f32 %v3280_v0, %v6775_v47  ;;  %v3345_v48 = vadd.f32 %v3281_v5, %v6779_v33  ;;  %v6810_v4 = vmul.f32 %v3588_v9, %v6666_v34 }
 0x4f6   : > { %7672 = vst [vmem:[#allocation52_spill] sm:$0xff] %v6807_v45  ;;  %v3069_v17 = vpop.f32.mrf.mxu1  ;;  %4520 = vtanh.f32 %v3407_v42  ;;  %v3154_v14 = vmul.f32 %v6800_v30, %v6800_v30  ;;  %v6815_v16 = vadd.f32 %v3063_v53, %v7673_v38  ;;  %v3155_v43 = vmul.f32 %v6807_v45, %v6807_v45  ;;  %v7675_v53 = vld [vmem:[#allocation50_spill] sm:$0xff] }
 0x4f7   : > { %v6817_v44 = vpop.eup %4508  ;;  %v3592_v13 = vmul.f32 0.5, %v3528_v19  ;;  %v3408_v7 = vmul.f32 0.7978846, %v3344_v12  ;;  %v3409_v51 = vmul.f32 0.7978846, %v3345_v48  ;;  %v6825_v11 = vadd.f32 %v3065_v29, %v7673_v38 }
 0x4f8   : > { %7674 = vst [vmem:[#allocation49_spill] sm:$0xff] %v6817_v44  ;;  %v3073_v0 = vpop.f32.mrf.mxu1  ;;  %v4511_v5 = vpop.eup %4510  ;;  %v3218_v9 = vmul.f32 %v3154_v14, %v6800_v30  ;;  %v3156_v34 = vmul.f32 %v6815_v16, %v6815_v16  ;;  %v6828_v42 = vadd.f32 %v3067_v6, %v7675_v53  ;;  %v6831_v18 = vmul.f32 %v3590_v36, %v6683_v56  ;;  %v4400_v6 = vld [vmem:[%s7356_s14 + $0x4] ss:$8 sps:$4 sm:$0xff]  }
 0x4f9   : > { %v3530_v19 = vadd.f32 1.0, %v4511_v5  ;;  %4522 = vtanh.f32 %v3408_v7  ;;  %v3219_v12 = vmul.f32 %v3155_v43, %v6807_v45  ;;  %v6835_v48 = vmul.f32 %v3592_v13, %v6697_v22  ;;  %v7677_v5 = vld [vmem:[#allocation47_spill] sm:$0xff]  ;;  %3912 = vmatprep.mubr.bf16.mxu0 %v4400_v6 }
 0x4fa   : > { %v3282_v14 = vmul.f32 0.044715, %v3218_v9  ;;  %v3220_v44 = vmul.f32 %v3156_v34, %v6815_v16  ;;  %v3157_v29 = vmul.f32 %v6825_v11, %v6825_v11  ;;  %4524 = vtanh.f32 %v3409_v51  ;;  %v3075_v22 = vpop.f32.mrf.mxu1 }
 0x4fb   : > { %7676 = vst [vmem:[#allocation50_spill] sm:$0xff] %v6835_v48  ;;  %v3283_v36 = vmul.f32 0.044715, %v3219_v12  ;;  %v3158_v56 = vmul.f32 %v6828_v42, %v6828_v42  ;;  %v6846_v38 = vadd.f32 %v3069_v17, %v7675_v53  ;;  %v6851_v9 = vadd.f32 %v3073_v0, %v7677_v5 }
 0x4fc   : > { %v3346_v13 = vadd.f32 %v3282_v14, %v6800_v30  ;;  %v3284_v7 = vmul.f32 0.044715, %v3220_v44  ;;  %v3221_v43 = vmul.f32 %v3157_v29, %v6825_v11  ;;  %v3594_v34 = vmul.f32 0.5, %v3530_v19 }
 0x4fd   : > { %v3347_v51 = vadd.f32 %v3283_v36, %v6807_v45  ;;  %v3222_v12 = vmul.f32 %v3158_v56, %v6828_v42  ;;  %v3159_v48 = vmul.f32 %v6846_v38, %v6846_v38  ;;  %v3160_v29 = vmul.f32 %v6851_v9, %v6851_v9  ;;  %v3077_v56 = vpop.f32.mrf.mxu1 }
 0x4fe   : > { %v6857_v17 = vpop.eup %4512  ;;  %v3410_v53 = vmul.f32 0.7978846, %v3346_v13  ;;  %v3348_v14 = vadd.f32 %v3284_v7, %v6815_v16  ;;  %v3285_v44 = vmul.f32 0.044715, %v3221_v43  ;;  %v6864_v36 = vadd.f32 %v3075_v22, %v7677_v5 }
 0x4ff   : > { %7678 = vst [vmem:[#allocation47_spill] sm:$0xff] %v6857_v17  ;;  %v4515_v0 = vpop.eup %4514  ;;  %v3411_v59 = vmul.f32 0.7978846, %v3347_v51  ;;  %v3286_v6 = vmul.f32 0.044715, %v3222_v12  ;;  %v3223_v19 = vmul.f32 %v3159_v48, %v6846_v38  ;;  %v6870_v17 = vmul.f32 %v3594_v34, %v6714_v2  ;;  %v3079_v2 = vpop.f32.mrf.mxu1 }
 0x500   : > { %v6866_v45 = vpop.eup %4516  ;;  %v3532_v33 = vadd.f32 1.0, %v4515_v0  ;;  %4526 = vtanh.f32 %v3410_v53  ;;  %v3412_v13 = vmul.f32 0.7978846, %v3348_v14  ;;  %v3349_v7 = vadd.f32 %v3285_v44, %v6825_v11 }
 0x501   : > { %v4519_v43 = vpop.eup %4518  ;;  %v3350_v51 = vadd.f32 %v3286_v6, %v6828_v42  ;;  %v3287_v12 = vmul.f32 0.044715, %v3223_v19  ;;  %v3224_v48 = vmul.f32 %v3160_v29, %v6851_v9  ;;  %v3161_v44 = vmul.f32 %v6864_v36, %v6864_v36 }
 0x502   : > { %v3596_v46 = vmul.f32 0.5, %v3532_v33  ;;  %v3534_v22 = vadd.f32 1.0, %v4519_v43  ;;  %4528 = vtanh.f32 %v3412_v13  ;;  %v3413_v5 = vmul.f32 0.7978846, %v3349_v7 }
 0x503   : > { %v6874_v27 = vpop.eup %4520  ;;  %v3414_v0 = vmul.f32 0.7978846, %v3350_v51  ;;  %v3351_v53 = vadd.f32 %v3287_v12, %v6846_v38  ;;  %v3288_v14 = vmul.f32 0.044715, %v3224_v48  ;;  %4530 = vtanh.f32 %v3411_v59  ;;  %v7679_v12 = vld [vmem:[#allocation48_spill] sm:$0xff] }
 0x504   : > { %v6880_v34 = vmul.f32 %v3596_v46, %v6745_v20  ;;  %v3598_v6 = vmul.f32 0.5, %v3534_v22  ;;  %v3525_v33 = vadd.f32 1.0, %v6790_v40  ;;  %v3225_v13 = vmul.f32 %v3161_v44, %v6864_v36  ;;  %v3083_v22 = vpop.f32.mrf.mxu1 }
 0x505   : > { %4532 = vtanh.f32 %v3414_v0  ;;  %v3415_v29 = vmul.f32 0.7978846, %v3351_v53  ;;  %v3352_v19 = vadd.f32 %v3288_v14, %v6851_v9  ;;  %v3527_v43 = vadd.f32 1.0, %v6802_v35 }
 0x506   : > { %v4523_v7 = vpop.eup %4522  ;;  %4534 = vtanh.f32 %v3413_v5  ;;  %v3589_v51 = vmul.f32 0.5, %v3525_v33  ;;  %v6887_v48 = vadd.f32 %v3077_v56, %v7679_v12  ;;  %v6890_v46 = vmul.f32 %v3598_v6, %v6756_v23 }
 0x507   : > { %v3536_v20 = vadd.f32 1.0, %v4523_v7  ;;  %v3416_v59 = vmul.f32 0.7978846, %v3352_v19  ;;  %v3289_v40 = vmul.f32 0.044715, %v3225_v13  ;;  %v6892_v0 = vpop.eup %4524  ;;  %4536 = vtanh.f32 %v3415_v29 }
 0x508   : > { %v3591_v53 = vmul.f32 0.5, %v3527_v43  ;;  %v3653_v14 = vmul.f32 %v3589_v51, %v6670_v37  ;;  %v3162_v35 = vmul.f32 %v6887_v48, %v6887_v48  ;;  %v3718_v23 = vmul.f32 %v6831_v18, %v6452_v62  ;;  %v3085_v43 = vpop.f32.mrf.mxu1 }
 0x509   : > { %v3600_v5 = vmul.f32 0.5, %v3536_v20  ;;  %4538 = vtanh.f32 %v3416_v59  ;;  %v3353_v56 = vadd.f32 %v3289_v40, %v6864_v36  ;;  %v3716_v33 = vmul.f32 %v6810_v4, %v6437_v58  ;;  %v7680_v4 = vld [vmem:[#allocation43_spill] sm:$0xff] }
 0x50a   : > { %v3655_v44 = vmul.f32 %v3591_v53, %v6691_v21  ;;  %v3226_v6 = vmul.f32 %v3162_v35, %v6887_v48  ;;  %v3521_v29 = vadd.f32 1.0, %v6738_v41  ;;  %v3717_v13 = vmul.f32 %v3653_v14, %v6440_v15 }
 0x50b   : > { %v6906_v37 = vmul.f32 %v3600_v5, %v6775_v47  ;;  %v3417_v19 = vmul.f32 0.7978846, %v3353_v56  ;;  %v3523_v7 = vadd.f32 1.0, %v6785_v54  ;;  %v6912_v51 = vadd.f32 %v3079_v2, %v7679_v12 }
 0x50c   : > { %v3719_v62 = vmul.f32 %v3655_v44, %v6473_v52  ;;  %v3290_v18 = vmul.f32 0.044715, %v3226_v6  ;;  %v3585_v21 = vmul.f32 0.5, %v3521_v29  ;;  %v3774_v58 = vpack.c.bf16 %v3718_v23, %v3716_v33 }
 0x50d   : > { %v4527_v20 = vpop.eup %4526  ;;  %4540 = vtanh.f32 %v3417_v19  ;;  %v3587_v41 = vmul.f32 0.5, %v3523_v7  ;;  %v6915_v47 = vadd.f32 %v3083_v22, %v7680_v4  ;;  %v3163_v2 = vmul.f32 %v6912_v51, %v6912_v51  ;;  %v3087_v22 = vpop.f32.mrf.mxu1 }
 0x50e   : > { %v3538_v59 = vadd.f32 1.0, %v4527_v20  ;;  %v3775_v40 = vpack.c.bf16 %v3719_v62, %v3717_v13  ;;  %v3354_v15 = vadd.f32 %v3290_v18, %v6887_v48  ;;  %v3649_v54 = vmul.f32 %v3585_v21, %v6638_v1 }
 0x50f   : > { %v4529_v53 = vpop.eup %4528  ;;  %v3651_v52 = vmul.f32 %v3587_v41, %v6656_v63  ;;  %v3164_v12 = vmul.f32 %v6915_v47, %v6915_v47  ;;  %v3714_v14 = vmul.f32 %v6797_v57, %v6416_v39  ;;  %v3712_v1 = vmul.f32 %v6768_v10, %v6404_v49  ;;  %v3089_v18 = vpop.f32.mrf.mxu1 }
 0x510   : > { %v3602_v35 = vmul.f32 0.5, %v3538_v59  ;;  %v3540_v5 = vadd.f32 1.0, %v4529_v53  ;;  %3880 = vmatprep.subr.bf16.mxu0 %v3775_v40  ;;  %v3418_v56 = vmul.f32 0.7978846, %v3354_v15  ;;  %v6928_v23 = vpop.eup %4530  ;;  %v3713_v63 = vmul.f32 %v3649_v54, %v6412_v61  ;;  %v7681_v40 = vld [vmem:[#allocation44_spill] sm:$0xff] }
 0x511   : > { %3881 = vmatpush1.bf16.msra.mxu0 %v3774_v58  ;;  %v3715_v44 = vmul.f32 %v3651_v52, %v6428_v3  ;;  %v3227_v6 = vmul.f32 %v3163_v2, %v6912_v51  ;;  %v3228_v33 = vmul.f32 %v3164_v12, %v6915_v47  ;;  %v3772_v29 = vpack.c.bf16 %v3714_v14, %v3712_v1  ;;  %v3093_v14 = vpop.f32.mrf.mxu1 }
 0x512   : > { %v4533_v57 = vpop.eup %4532  ;;  %v3604_v39 = vmul.f32 0.5, %v3540_v5  ;;  %4542 = vtanh.f32 %v3418_v56  ;;  %v3517_v19 = vadd.f32 1.0, %v6718_v28  ;;  %v6938_v61 = vmul.f32 %v3602_v35, %v6800_v30 }
 0x513   : > { %v6935_v13 = vpop.eup %4534  ;;  %v3542_v49 = vadd.f32 1.0, %v4533_v57  ;;  %v3773_v10 = vpack.c.bf16 %v3715_v44, %v3713_v63  ;;  %v3291_v7 = vmul.f32 0.044715, %v3227_v6  ;;  %v3292_v62 = vmul.f32 0.044715, %v3228_v33  ;;  %v7683_v33 = vld [vmem:[#allocation55_spill] sm:$0xff] }
 0x514   : > { %v3519_v3 = vadd.f32 1.0, %v6726_v8  ;;  %v3581_v21 = vmul.f32 0.5, %v3517_v19  ;;  %v6942_v20 = vadd.f32 %v3085_v43, %v7680_v4  ;;  %v6944_v58 = vpop.eup %4536  ;;  %v6949_v15 = vadd.f32 %v3087_v22, %v7681_v40 }
 0x515   : > { %v3606_v41 = vmul.f32 0.5, %v3542_v49  ;;  %3882 = vmatprep.subr.bf16.mxu0 %v3773_v10  ;;  %v3355_v28 = vadd.f32 %v3291_v7, %v6912_v51  ;;  %v3356_v59 = vadd.f32 %v3292_v62, %v6915_v47  ;;  %v6952_v30 = vmul.f32 %v3604_v39, %v6815_v16  ;;  %v3095_v39 = vpop.f32.mrf.mxu1  ;;  %v7684_v10 = vld [vmem:[#allocation109_spill] sm:$0xff]  ;;  %v7685_v62 = vld [vmem:[#allocation39_spill] sm:$0xff] }
 0x516   : > { %v4539_v54 = vpop.eup %4538  ;;  %3883 = vmatpush1.bf16.msra.mxu0 %v3772_v29  ;;  %v3583_v8 = vmul.f32 0.5, %v3519_v3  ;;  %v3645_v43 = vmul.f32 %v3581_v21, %v6597_v26  ;;  %v3165_v4 = vmul.f32 %v6942_v20, %v6942_v20  ;;  %v3708_v12 = vmul.f32 %v6733_v60, %v6376_v55  ;;  %v7682_v55 = vld [vmem:[#allocation65_spill] sm:$0xff] }
 0x517   : > { %v3544_v53 = vadd.f32 1.0, %v4539_v54  ;;  %v3419_v52 = vmul.f32 0.7978846, %v3355_v28  ;;  %v3420_v2 = vmul.f32 0.7978846, %v3356_v59  ;;  %v6960_v22 = vmul.f32 %v3606_v41, %v6828_v42  ;;  %v7686_v28 = vld [vmem:[#allocation32_spill] sm:$0xff] }
 0x518   : > { %v3647_v16 = vmul.f32 %v3583_v8, %v6617_v50  ;;  %v3229_v35 = vmul.f32 %v3165_v4, %v6942_v20  ;;  %v3166_v26 = vmul.f32 %v6949_v15, %v6949_v15  ;;  %v3709_v56 = vmul.f32 %v3645_v43, %v6387_v32  ;;  %v7687_v59 = vld [vmem:[#allocation118_spill] sm:$0xff]  ;;  %v7689_v4 = vld [vmem:[#allocation45_spill] sm:$0xff] }
 0x519   : > { %v3608_v5 = vmul.f32 0.5, %v3544_v53  ;;  %v3710_v1 = vmul.f32 %v6741_v24, %v6390_v25  ;;  %v3513_v63 = vadd.f32 1.0, %v6675_v31  ;;  %4544 = vtanh.f32 %v3420_v2  ;;  %v7690_v53 = vld [vmem:[#allocation19_spill] sm:$0xff]  ;;  %v7691_v2 = vld [vmem:[#allocation20_spill] sm:$0xff] }
 0x51a   : > { %v6970_v60 = vpop.eup %4540  ;;  %v3711_v42 = vmul.f32 %v3647_v16, %v7682_v55  ;;  %v3293_v44 = vmul.f32 0.044715, %v3229_v35  ;;  %v3230_v50 = vmul.f32 %v3166_v26, %v6949_v15  ;;  %4546 = vtanh.f32 %v3419_v52  ;;  %v7692_v26 = vld [vmem:[#allocation101_spill] sm:$0xff] }
 0x51b   : > { %v6975_v6 = vmul.f32 %v3608_v5, %v6851_v9  ;;  %v3515_v57 = vadd.f32 1.0, %v7683_v33  ;;  %v3577_v32 = vmul.f32 0.5, %v3513_v63  ;;  %v6980_v24 = vadd.f32 %v3089_v18, %v7681_v40  ;;  %v7688_v18 = vld [vmem:[#allocation112_spill] sm:$0xff] }
 0x51c   : > { %v3771_v29 = vpack.c.bf16 %v3711_v42, %v3709_v56  ;;  %v3357_v25 = vadd.f32 %v3293_v44, %v6942_v20  ;;  %v3294_v31 = vmul.f32 0.044715, %v3230_v50  ;;  %v3770_v19 = vpack.c.bf16 %v3710_v1, %v3708_v12  ;;  %v7693_v1 = vld [vmem:[#allocation62_spill] sm:$0xff]  ;;  %v7694_v42 = vld [vmem:[#allocation21_spill] sm:$0xff] }
 0x51d   : > { %v3579_v49 = vmul.f32 0.5, %v3515_v57  ;;  %v3641_v7 = vmul.f32 %v3577_v32, %v7684_v10  ;;  %v6984_v3 = vadd.f32 %v3093_v14, %v7685_v62  ;;  %v3167_v41 = vmul.f32 %v6980_v24, %v6980_v24  ;;  %v3097_v14 = vpop.f32.mrf.mxu1 }
 0x51e   : > { %3884 = vmatprep.subr.bf16.mxu0 %v3771_v29  ;;  %v3421_v9 = vmul.f32 0.7978846, %v3357_v25  ;;  %v3358_v21 = vadd.f32 %v3294_v31, %v6949_v15  ;;  %v3706_v54 = vmul.f32 %v7687_v59, %v7686_v28  ;;  %v3704_v52 = vmul.f32 %v7690_v53, %v7689_v4  ;;  %v7697_v59 = vld [vmem:[#allocation27_spill] sm:$0xff] }
 0x51f   : > { %v4543_v8 = vpop.eup %4542  ;;  %3885 = vmatpush1.bf16.msra.mxu0 %v3770_v19  ;;  %v3643_v40 = vmul.f32 %v3579_v49, %v7688_v18  ;;  %v3168_v43 = vmul.f32 %v6984_v3, %v6984_v3  ;;  %v3509_v12 = vadd.f32 1.0, %v7691_v2  ;;  %v3705_v5 = vmul.f32 %v3641_v7, %v7692_v26  ;;  %v3099_v19 = vpop.f32.mrf.mxu1  ;;  %v7695_v7 = vld [vmem:[#allocation103_spill] sm:$0xff]  ;;  %v7698_v18 = vld [vmem:[#allocation93_spill] sm:$0xff]  ;;  %v7702_v2 = vld [vmem:[#allocation18_spill] sm:$0xff] }
 0x520   : > { %v3546_v16 = vadd.f32 1.0, %v4543_v8  ;;  %v3422_v35 = vmul.f32 0.7978846, %v3358_v21  ;;  %v3231_v56 = vmul.f32 %v3167_v41, %v6980_v24  ;;  %4548 = vtanh.f32 %v3421_v9  ;;  %v7696_v21 = vld [vmem:[#allocation40_spill] sm:$0xff] }
 0x521   : > { %v3707_v63 = vmul.f32 %v3643_v40, %v7693_v1  ;;  %v3232_v55 = vmul.f32 %v3168_v43, %v6984_v3  ;;  %v3511_v44 = vadd.f32 1.0, %v7694_v42  ;;  %v3768_v33 = vpack.c.bf16 %v3706_v54, %v3704_v52  ;;  %v7700_v43 = vld [vmem:[#allocation95_spill] sm:$0xff]  ;;  %v7701_v52 = vld [vmem:[#allocation97_spill] sm:$0xff] }
 0x522   : > { %4550 = vtanh.f32 %v3422_v35  ;;  %v3295_v50 = vmul.f32 0.044715, %v3231_v56  ;;  %v3573_v57 = vmul.f32 0.5, %v3509_v12  ;;  %v7003_v31 = vadd.f32 %v3095_v39, %v7685_v62  ;;  %v7699_v39 = vld [vmem:[#allocation117_spill] sm:$0xff]  ;;  %v7703_v35 = vld [vmem:[#allocation98_spill] sm:$0xff] }
 0x523   : > { %v3769_v32 = vpack.c.bf16 %v3707_v63, %v3705_v5  ;;  %v3296_v29 = vmul.f32 0.044715, %v3232_v55  ;;  %v3575_v25 = vmul.f32 0.5, %v3511_v44  ;;  %v3610_v49 = vmul.f32 0.5, %v3546_v16  ;;  %v7704_v56 = vld [vmem:[#allocation114_spill] sm:$0xff]  ;;  %v3103_v63 = vpop.f32.mrf.mxu1 }
 0x524   : > { %v3359_v10 = vadd.f32 %v3295_v50, %v6980_v24  ;;  %v3637_v9 = vmul.f32 %v3573_v57, %v7695_v7  ;;  %v7008_v41 = vadd.f32 %v3097_v14, %v7696_v21  ;;  %v3169_v8 = vmul.f32 %v7003_v31, %v7003_v31 }
 0x525   : > { %3886 = vmatprep.subr.bf16.mxu0 %v3769_v32  ;;  %v3360_v28 = vadd.f32 %v3296_v29, %v6984_v3  ;;  %v3639_v54 = vmul.f32 %v3575_v25, %v7697_v59  ;;  %v3700_v62 = vmul.f32 %v7699_v39, %v7698_v18  ;;  %v3702_v12 = vmul.f32 %v7702_v2, %v7701_v52  ;;  %v7705_v32 = vld [vmem:[#allocation23_spill] sm:$0xff]  ;;  %v3105_v39 = vpop.f32.mrf.mxu1 }
 0x526   : > { %v3423_v40 = vmul.f32 0.7978846, %v3359_v10  ;;  %3887 = vmatpush1.bf16.msra.mxu0 %v3768_v33  ;;  %v3701_v4 = vmul.f32 %v3637_v9, %v7700_v43  ;;  %v3170_v53 = vmul.f32 %v7008_v41, %v7008_v41  ;;  %v4545_v14 = vpop.eup %4544  ;;  %v3233_v5 = vmul.f32 %v3169_v8, %v7003_v31  ;;  %v7708_v8 = vld [vmem:[#allocation115_spill] sm:$0xff] }
 0x527   : > { %v3424_v16 = vmul.f32 0.7978846, %v3360_v28  ;;  %v3703_v26 = vmul.f32 %v3639_v54, %v7703_v35  ;;  %v3505_v1 = vadd.f32 1.0, %v7704_v56  ;;  %v7024_v55 = vpop.eup %4546  ;;  %v7027_v42 = vmul.f32 %v3610_v49, %v6887_v48  ;;  %v7706_v49 = vld [vmem:[#allocation35_spill] sm:$0xff]  ;;  %v7707_v54 = vld [vmem:[#allocation85_spill] sm:$0xff] }
 0x528   : > { %v3548_v44 = vadd.f32 1.0, %v4545_v14  ;;  %4552 = vtanh.f32 %v3423_v40  ;;  %v3234_v50 = vmul.f32 %v3170_v53, %v7008_v41  ;;  %v3297_v57 = vmul.f32 0.044715, %v3233_v5  ;;  %v7710_v53 = vld [vmem:[#allocation29_spill] sm:$0xff]  ;;  %v7712_v14 = vld [vmem:[#allocation116_spill] sm:$0xff]  ;;  %v7713_v5 = vld [vmem:[#allocation87_spill] sm:$0xff] }
 0x529   : > { %4554 = vtanh.f32 %v3424_v16  ;;  %v3767_v33 = vpack.c.bf16 %v3703_v26, %v3701_v4  ;;  %v3507_v29 = vadd.f32 1.0, %v7705_v32  ;;  %v3766_v10 = vpack.c.bf16 %v3702_v12, %v3700_v62  ;;  %v7709_v62 = vld [vmem:[#allocation38_spill] sm:$0xff]  ;;  %v7711_v12 = vld [vmem:[#allocation89_spill] sm:$0xff] }
 0x52a   : > { %v3298_v25 = vmul.f32 0.044715, %v3234_v50  ;;  %v3569_v7 = vmul.f32 0.5, %v3505_v1  ;;  %v7032_v9 = vadd.f32 %v3099_v19, %v7696_v21  ;;  %v3361_v28 = vadd.f32 %v3297_v57, %v7003_v31 }
 0x52b   : > { %3888 = vmatprep.subr.bf16.mxu0 %v3767_v33  ;;  %v3571_v48 = vmul.f32 0.5, %v3507_v29  ;;  %v7036_v59 = vadd.f32 %v3103_v63, %v7706_v49  ;;  %v3696_v18 = vmul.f32 %v7708_v8, %v7707_v54  ;;  %v3612_v40 = vmul.f32 0.5, %v3548_v44  ;;  %v7714_v63 = vld [vmem:[#allocation110_spill] sm:$0xff]  ;;  %v7715_v33 = vld [vmem:[#allocation91_spill] sm:$0xff] }
 0x52c   : > { %v3362_v43 = vadd.f32 %v3298_v25, %v7008_v41  ;;  %3889 = vmatpush1.bf16.msra.mxu0 %v3766_v10  ;;  %v3633_v4 = vmul.f32 %v3569_v7, %v7709_v62  ;;  %v3171_v19 = vmul.f32 %v7032_v9, %v7032_v9  ;;  %v3425_v21 = vmul.f32 0.7978846, %v3361_v28  ;;  %v3107_v25 = vpop.f32.mrf.mxu1  ;;  %v7716_v28 = vld [vmem:[#allocation25_spill] sm:$0xff] }
 0x52d   : > { %v3635_v52 = vmul.f32 %v3571_v48, %v7710_v53  ;;  %v3172_v2 = vmul.f32 %v7036_v59, %v7036_v59  ;;  %v3698_v16 = vmul.f32 %v7712_v14, %v7711_v12  ;;  %v7049_v35 = vpop.eup %4548  ;;  %v3501_v44 = vadd.f32 1.0, %v7714_v63  ;;  %v7717_v53 = vld [vmem:[#allocation36_spill] sm:$0xff] }
 0x52e   : > { %v3426_v26 = vmul.f32 0.7978846, %v3362_v43  ;;  %v3697_v56 = vmul.f32 %v3633_v4, %v7713_v5  ;;  %v3235_v1 = vmul.f32 %v3171_v19, %v7032_v9  ;;  %4556 = vtanh.f32 %v3425_v21 }
 0x52f   : > { %v4551_v50 = vpop.eup %4550  ;;  %v3699_v57 = vmul.f32 %v3635_v52, %v7715_v33  ;;  %v3236_v32 = vmul.f32 %v3172_v2, %v7036_v59  ;;  %v3764_v29 = vpack.c.bf16 %v3698_v16, %v3696_v18  ;;  %v3503_v48 = vadd.f32 1.0, %v7716_v28  ;;  %v7718_v2 = vld [vmem:[#allocation66_spill] sm:$0xff]  ;;  %v7719_v16 = vld [vmem:[#allocation76_spill] sm:$0xff]  ;;  %v7725_v28 = vld [vmem:[#allocation83_spill] sm:$0xff] }
 0x530   : > { %v3550_v10 = vadd.f32 1.0, %v4551_v50  ;;  %4558 = vtanh.f32 %v3426_v26  ;;  %v3299_v7 = vmul.f32 0.044715, %v3235_v1  ;;  %v3565_v43 = vmul.f32 0.5, %v3501_v44  ;;  %v7722_v44 = vld [vmem:[#allocation78_spill] sm:$0xff] }
 0x531   : > { %v3765_v54 = vpack.c.bf16 %v3699_v57, %v3697_v56  ;;  %v3300_v8 = vmul.f32 0.044715, %v3236_v32  ;;  %v7058_v62 = vadd.f32 %v3105_v39, %v7706_v49  ;;  %v7061_v4 = vmul.f32 %v3612_v40, %v6915_v47  ;;  %v7720_v49 = vld [vmem:[#allocation113_spill] sm:$0xff]  ;;  %v7721_v40 = vld [vmem:[#allocation42_spill] sm:$0xff]  ;;  %v7723_v57 = vld [vmem:[#allocation80_spill] sm:$0xff] }
 0x532   : > { %v3363_v19 = vadd.f32 %v3299_v7, %v7032_v9  ;;  %v3567_v21 = vmul.f32 0.5, %v3503_v48  ;;  %v7065_v18 = vadd.f32 %v3107_v25, %v7717_v53  ;;  %v3629_v12 = vmul.f32 %v3565_v43, %v7718_v2  ;;  %v7724_v32 = vld [vmem:[#allocation22_spill] sm:$0xff]  ;;  %v7726_v48 = vld [vmem:[#allocation105_spill] sm:$0xff] }
 0x533   : > { %3890 = vmatprep.subr.bf16.mxu0 %v3765_v54  ;;  %v3364_v52 = vadd.f32 %v3300_v8, %v7036_v59  ;;  %v3173_v14 = vmul.f32 %v7058_v62, %v7058_v62  ;;  %v3692_v39 = vmul.f32 %v7720_v49, %v7719_v16  ;;  %v3614_v26 = vmul.f32 0.5, %v3550_v10  ;;  %v3109_v8 = vpop.f32.mrf.mxu1 }
 0x534   : > { %v3427_v47 = vmul.f32 0.7978846, %v3363_v19  ;;  %3891 = vmatpush1.bf16.msra.mxu0 %v3764_v29  ;;  %v3631_v5 = vmul.f32 %v3567_v21, %v7721_v40  ;;  %v3174_v56 = vmul.f32 %v7065_v18, %v7065_v18  ;;  %v3693_v50 = vmul.f32 %v3629_v12, %v7722_v44  ;;  %v7727_v12 = vld [vmem:[#allocation24_spill] sm:$0xff] }
 0x535   : > { %v4553_v1 = vpop.eup %4552  ;;  %v3428_v63 = vmul.f32 0.7978846, %v3364_v52  ;;  %v3237_v33 = vmul.f32 %v3173_v14, %v7058_v62  ;;  %v3694_v25 = vmul.f32 %v7724_v32, %v7723_v57  ;;  %v3497_v54 = vadd.f32 1.0, %v7726_v48  ;;  %v7732_v32 = vld [vmem:[#allocation111_spill] sm:$0xff] }
 0x536   : > { %v4555_v7 = vpop.eup %4554  ;;  %4560 = vtanh.f32 %v3427_v47  ;;  %v3695_v10 = vmul.f32 %v3631_v5, %v7725_v28  ;;  %v3238_v29 = vmul.f32 %v3174_v56, %v7065_v18  ;;  %v3499_v14 = vadd.f32 1.0, %v7727_v12  ;;  %v7728_v5 = vld [vmem:[#allocation68_spill] sm:$0xff]  ;;  %v7729_v56 = vld [vmem:[#allocation106_spill] sm:$0xff] }
 0x537   : > { %v3552_v43 = vadd.f32 1.0, %v4555_v7  ;;  %4562 = vtanh.f32 %v3428_v63  ;;  %v3301_v19 = vmul.f32 0.044715, %v3237_v33  ;;  %v3762_v21 = vpack.c.bf16 %v3694_v25, %v3692_v39  ;;  %v7730_v33 = vld [vmem:[#allocation99_spill] sm:$0xff] }
 0x538   : > { %v3763_v52 = vpack.c.bf16 %v3695_v10, %v3693_v50  ;;  %v3302_v2 = vmul.f32 0.044715, %v3238_v29  ;;  %v3561_v16 = vmul.f32 0.5, %v3497_v54  ;;  %v7086_v47 = vadd.f32 %v3109_v8, %v7717_v53  ;;  %v7731_v50 = vld [vmem:[#allocation72_spill] sm:$0xff]  ;;  %v7733_v54 = vld [vmem:[#allocation41_spill] sm:$0xff] }
 0x539   : > { %v3616_v49 = vmul.f32 0.5, %v3552_v43  ;;  %v3365_v40 = vadd.f32 %v3301_v19, %v7058_v62  ;;  %v3688_v44 = vmul.f32 %v7729_v56, %v7728_v5  ;;  %v3563_v63 = vmul.f32 0.5, %v3499_v14  ;;  %v7734_v43 = vld [vmem:[#allocation70_spill] sm:$0xff] }
 0x53a   : > { %3892 = vmatprep.subr.bf16.mxu0 %v3763_v52  ;;  %v3366_v57 = vadd.f32 %v3302_v2, %v7065_v18  ;;  %v3625_v39 = vmul.f32 %v3561_v16, %v7730_v33  ;;  %v3690_v25 = vmul.f32 %v7732_v32, %v7731_v50  ;;  %v3678_v7 = vmul.f32 %v3614_v26, %v6949_v15  ;;  %v7735_v14 = vld [vmem:[#allocation74_spill] sm:$0xff] }
 0x53b   : > { %v3429_v28 = vmul.f32 0.7978846, %v3365_v40  ;;  %3893 = vmatpush1.bf16.msra.mxu0 %v3762_v21  ;;  %v3175_v53 = vmul.f32 %v7086_v47, %v7086_v47  ;;  %v3549_v10 = vadd.f32 1.0, %v7049_v35  ;;  %v4557_v29 = vpop.eup %4556  ;;  %v3627_v8 = vmul.f32 %v3563_v63, %v7733_v54 }
 0x53c   : > { %v3430_v48 = vmul.f32 0.7978846, %v3366_v57  ;;  %v3689_v19 = vmul.f32 %v3625_v39, %v7734_v43  ;;  %v3760_v52 = vpack.c.bf16 %v3690_v25, %v3688_v44  ;;  %v3680_v12 = vmul.f32 %v3616_v49, %v6984_v3  ;;  %v7736_v57 = vld [vmem:[#allocation94_spill] sm:$0xff]  ;;  %v7737_v3 = vld [vmem:[#allocation61_spill] sm:$0xff] }
 0x53d   : > { %v4559_v2 = vpop.eup %4558  ;;  %4564 = vtanh.f32 %v3429_v28  ;;  %v3239_v15 = vmul.f32 %v3175_v53, %v7086_v47  ;;  %v3553_v26 = vadd.f32 1.0, %v4557_v29  ;;  %v3691_v16 = vmul.f32 %v3627_v8, %v7735_v14  ;;  %v7740_v43 = vld [vmem:[#allocation46_spill] sm:$0xff] }
 0x53e   : > { %v3554_v21 = vadd.f32 1.0, %v4559_v2  ;;  %4566 = vtanh.f32 %v3430_v48  ;;  %v3551_v40 = vadd.f32 1.0, %v4553_v1  ;;  %v3613_v56 = vmul.f32 0.5, %v3549_v10  ;;  %v7738_v48 = vld [vmem:[#allocation59_spill] sm:$0xff] }
 0x53f   : > { %v3303_v35 = vmul.f32 0.044715, %v3239_v15  ;;  %v3617_v5 = vmul.f32 0.5, %v3553_v26  ;;  %v7105_v63 = vmul.f32 %v7061_v4, %v7736_v57  ;;  %v3761_v33 = vpack.c.bf16 %v3691_v16, %v3689_v19  ;;  %v7742_v26 = vld [vmem:[#allocation102_spill] sm:$0xff] }
 0x540   : > { %v3618_v44 = vmul.f32 0.5, %v3554_v21  ;;  %v3615_v39 = vmul.f32 0.5, %v3551_v40  ;;  %v7108_v49 = vmul.f32 %v3678_v7, %v7737_v3  ;;  %v3677_v25 = vmul.f32 %v3613_v56, %v6942_v20  ;;  %v7744_v57 = vld [vmem:[#allocation90_spill] sm:$0xff] }
 0x541   : > { %v3367_v50 = vadd.f32 %v3303_v35, %v7086_v47  ;;  %v3681_v32 = vmul.f32 %v3617_v5, %v7003_v31  ;;  %v3545_v1 = vadd.f32 1.0, %v6970_v60  ;;  %3894 = vmatprep.subr.bf16.mxu0 %v3761_v33  ;;  %v3547_v10 = vadd.f32 1.0, %v7024_v55  ;;  %v7739_v31 = vld [vmem:[#allocation96_spill] sm:$0xff]  ;;  %v7743_v5 = vld [vmem:[#allocation86_spill] sm:$0xff] }
 0x542   : > { %v3682_v28 = vmul.f32 %v3618_v44, %v7008_v41  ;;  %v3679_v4 = vmul.f32 %v3615_v39, %v6980_v24  ;;  %v3786_v53 = vpack.c.bf16 %v7108_v49, %v7105_v63  ;;  %3895 = vmatpush1.bf16.msra.mxu0 %v3760_v52  ;;  %v7120_v54 = vmul.f32 %v3680_v12, %v7738_v48  ;;  %v7741_v24 = vld [vmem:[#allocation100_spill] sm:$0xff] }
 0x543   : > { %v4561_v7 = vpop.eup %4560  ;;  %v3431_v29 = vmul.f32 0.7978846, %v3367_v50  ;;  %v7123_v20 = vmul.f32 %v3677_v25, %v7739_v31  ;;  %v3609_v60 = vmul.f32 0.5, %v3545_v1  ;;  %v3611_v15 = vmul.f32 0.5, %v3547_v10  ;;  %v7745_v39 = vld [vmem:[#allocation88_spill] sm:$0xff]  ;;  %v7747_v1 = vld [vmem:[#allocation77_spill] sm:$0xff] }
 0x544   : > { %v4563_v8 = vpop.eup %4562  ;;  %v3555_v41 = vadd.f32 1.0, %v4561_v7  ;;  %v7126_v19 = vmul.f32 %v3682_v28, %v7740_v43  ;;  %v7129_v2 = vmul.f32 %v3679_v4, %v7741_v24  ;;  %v7132_v52 = vmul.f32 %v3681_v32, %v7742_v26  ;;  %v7746_v50 = vld [vmem:[#allocation92_spill] sm:$0xff]  ;;  %v7748_v28 = vld [vmem:[#allocation81_spill] sm:$0xff] }
 0x545   : > { %v3556_v55 = vadd.f32 1.0, %v4563_v8  ;;  %4568 = vtanh.f32 %v3431_v29  ;;  %v3673_v12 = vmul.f32 %v3609_v60, %v6864_v36  ;;  %v3675_v40 = vmul.f32 %v3611_v15, %v6912_v51  ;;  %v7749_v4 = vld [vmem:[#allocation60_spill] sm:$0xff] }
 0x546   : > { %v3619_v21 = vmul.f32 0.5, %v3555_v41  ;;  %v3788_v14 = vpack.c.bf16 %v7126_v19, %v7120_v54  ;;  %v3787_v16 = vpack.c.bf16 %v7129_v2, %v7123_v20  ;;  %v7142_v56 = vmul.f32 %v6975_v6, %v7743_v5  ;;  %v7753_v5 = vld [vmem:[#allocation73_spill] sm:$0xff]  ;;  %v4406_v54 = vld [vmem:[%s7356_s14 + $0x20] ss:$8 sps:$4 sm:$0xff]  }
 0x547   : > { %v3620_v35 = vmul.f32 0.5, %v3556_v55  ;;  %v7146_v44 = vmul.f32 %v7027_v42, %v7744_v57  ;;  %v3541_v36 = vadd.f32 1.0, %v6935_v13  ;;  %v7151_v3 = vmul.f32 %v3673_v12, %v7745_v39  ;;  %v7750_v55 = vld [vmem:[#allocation79_spill] sm:$0xff]  ;;  %v7751_v12 = vld [vmem:[#allocation69_spill] sm:$0xff] }
 0x548   : > { %v3683_v33 = vmul.f32 %v3619_v21, %v7032_v9  ;;  %v7154_v32 = vmul.f32 %v3675_v40, %v7746_v50  ;;  %v3543_v51 = vadd.f32 1.0, %v6944_v58  ;;  %v7161_v42 = vmul.f32 %v6952_v30, %v7747_v1  ;;  %v7752_v21 = vld [vmem:[#allocation84_spill] sm:$0xff] }
 0x549   : > { %v3784_v6 = vpack.c.bf16 %v7146_v44, %v7142_v56  ;;  %v3605_v25 = vmul.f32 0.5, %v3541_v36  ;;  %v7165_v13 = vmul.f32 %v6960_v22, %v7748_v28  ;;  %v3537_v29 = vadd.f32 1.0, %v6892_v0  ;;  %v4401_v63 = vld [vmem:[%s7356_s14 + $0x14] ss:$8 sps:$4 sm:$0xff]   ;;  %v4403_v49 = vld [vmem:[%s7356_s14 + $0x10] ss:$8 sps:$4 sm:$0xff]  }
 0x54a   : > { %v4565_v9 = vpop.eup %4564  ;;  %v7168_v10 = vmul.f32 %v3683_v33, %v7749_v4  ;;  %v3785_v7 = vpack.c.bf16 %v7154_v32, %v7151_v3  ;;  %v3607_v58 = vmul.f32 0.5, %v3543_v51  ;;  %v3684_v31 = vmul.f32 %v3620_v35, %v7036_v59  ;;  %v4407_v20 = vld [vmem:[%s7356_s14 + $0x34] ss:$8 sps:$4 sm:$0xff]   ;;  %v4409_v19 = vld [vmem:[%s7356_s14 + $0x30] ss:$8 sps:$4 sm:$0xff]  }
 0x54b   : > { %v4567_v48 = vpop.eup %4566  ;;  %v3557_v60 = vadd.f32 1.0, %v4565_v9  ;;  %v3669_v30 = vmul.f32 %v3605_v25, %v6825_v11  ;;  %v3782_v22 = vpack.c.bf16 %v7165_v13, %v7161_v42  ;;  %v3539_v24 = vadd.f32 1.0, %v6928_v23  ;;  %v7757_v9 = vld [vmem:[#allocation71_spill] sm:$0xff] }
 0x54c   : > { %v3558_v8 = vadd.f32 1.0, %v4567_v48  ;;  %v3789_v41 = vpack.c.bf16 %v7168_v10, %v7132_v52  ;;  %v3671_v43 = vmul.f32 %v3607_v58, %v6846_v38  ;;  %v3601_v26 = vmul.f32 0.5, %v3537_v29  ;;  %v7754_v52 = vld [vmem:[#allocation63_spill] sm:$0xff]  ;;  %v7758_v29 = vld [vmem:[#allocation64_spill] sm:$0xff] }
 0x54d   : > { %v3621_v15 = vmul.f32 0.5, %v3557_v60  ;;  %v3733_v0 = vmul.f32 %v3669_v30, %v7750_v55  ;;  %v7184_v59 = vmul.f32 %v6906_v37, %v7751_v12  ;;  %v3603_v35 = vmul.f32 0.5, %v3539_v24  ;;  %v7755_v38 = vld [vmem:[#allocation51_spill] sm:$0xff]  ;;  %v7756_v37 = vld [vmem:[#allocation52_spill] sm:$0xff]  ;;  %v7760_v60 = vld [vmem:[#allocation26_spill] sm:$0xff] }
 0x54e   : > { %v3622_v11 = vmul.f32 0.5, %v3558_v8  ;;  %v3735_v40 = vmul.f32 %v3671_v43, %v7752_v21  ;;  %v3730_v57 = vmul.f32 %v6938_v61, %v7753_v5  ;;  %v3748_v36 = vmul.f32 %v3684_v31, %v7754_v52  ;;  %v7759_v31 = vld [vmem:[#allocation75_spill] sm:$0xff]  ;;  %v7762_v43 = vld [vmem:[#allocation53_spill] sm:$0xff]  ;;  %v7763_v55 = vld [vmem:[#allocation54_spill] sm:$0xff] }
 0x54f   : > { %v3665_v33 = vmul.f32 %v3601_v26, %v7755_v38  ;;  %v3533_v23 = vadd.f32 1.0, %v6866_v45  ;;  %v3535_v39 = vadd.f32 1.0, %v6874_v27  ;;  %v3667_v25 = vmul.f32 %v3603_v35, %v7756_v37  ;;  %v7766_v35 = vld [vmem:[#allocation104_spill] sm:$0xff]  ;;  %v7768_v38 = vld [vmem:[#allocation57_spill] sm:$0xff] }
 0x550   : > { %v3686_v50 = vmul.f32 %v3622_v11, %v7065_v18  ;;  %v3783_v51 = vpack.c.bf16 %v3735_v40, %v3733_v0  ;;  %v3780_v1 = vpack.c.bf16 %v3730_v57, %v7184_v59  ;;  %v3685_v28 = vmul.f32 %v3621_v15, %v7058_v62  ;;  %v7761_v18 = vld [vmem:[#allocation107_spill] sm:$0xff]  ;;  %v7764_v15 = vld [vmem:[#allocation49_spill] sm:$0xff]  ;;  %v7767_v57 = vld [vmem:[#allocation108_spill] sm:$0xff] }
 0x551   : > { %v3729_v4 = vmul.f32 %v3665_v33, %v7757_v9  ;;  %v3597_v61 = vmul.f32 0.5, %v3533_v23  ;;  %v3599_v10 = vmul.f32 0.5, %v3535_v39  ;;  %v3731_v45 = vmul.f32 %v3667_v25, %v7759_v31  ;;  %v7765_v11 = vld [vmem:[#allocation47_spill] sm:$0xff]  ;;  %v7772_v25 = vld [vmem:[#allocation28_spill] sm:$0xff]  ;;  %v7773_v9 = vld [vmem:[#allocation58_spill] sm:$0xff] }
 0x552   : > { %v4569_v58 = vpop.eup %4568  ;;  %v3750_v48 = vmul.f32 %v3686_v50, %v7758_v29  ;;  %v3724_v27 = vmul.f32 %v6880_v34, %v7760_v60  ;;  %v3726_v30 = vmul.f32 %v6890_v46, %v7761_v18  ;;  %v3529_v0 = vadd.f32 1.0, %v7764_v15  ;;  %v7769_v46 = vld [vmem:[#allocation67_spill] sm:$0xff]  ;;  %v7771_v50 = vld [vmem:[#allocation50_spill] sm:$0xff]  ;;  %v7779_v18 = vld [vmem:[#allocation33_spill] sm:$0xff] }
 0x553   : > { %v3559_v8 = vadd.f32 1.0, %v4569_v58  ;;  %v3661_v24 = vmul.f32 %v3597_v61, %v7762_v43  ;;  %v3663_v62 = vmul.f32 %v3599_v10, %v7763_v55  ;;  %v3781_v12 = vpack.c.bf16 %v3731_v45, %v3729_v4  ;;  %v7770_v39 = vld [vmem:[#allocation31_spill] sm:$0xff]  ;;  %v7774_v4 = vld [vmem:[#allocation82_spill] sm:$0xff]  ;;  %v7777_v45 = vld [vmem:[#allocation37_spill] sm:$0xff] }
 0x554   : > { %v3790_v26 = vpack.c.bf16 %v3750_v48, %v3748_v36  ;;  %v3778_v59 = vpack.c.bf16 %v3726_v30, %v3724_v27  ;;  %v3531_v21 = vadd.f32 1.0, %v7765_v11  ;;  %v3593_v52 = vmul.f32 0.5, %v3529_v0  ;;  %v7775_v29 = vld [vmem:[#allocation119_spill] sm:$0xff]  ;;  %v7776_v31 = vld [vmem:[#allocation30_spill] sm:$0xff] }
 0x555   : > { %v3623_v40 = vmul.f32 0.5, %v3559_v8  ;;  %v3725_v5 = vmul.f32 %v3661_v24, %v7766_v35  ;;  %v3727_v34 = vmul.f32 %v3663_v62, %v7767_v57  ;;  %v2946_v33 = vadd.f32 %v7769_v46, %v7768_v38  ;;  %v7778_v27 = vld [vmem:[#allocation34_spill] sm:$0xff]  ;;  %v7780_v8 = vld [vmem:[#allocation56_spill] sm:$0xff] }
 0x556   : > { %v3595_v23 = vmul.f32 0.5, %v3531_v21  ;;  %v3720_v37 = vmul.f32 %v7771_v50, %v7770_v39  ;;  %v3722_v36 = vmul.f32 %v6870_v17, %v7772_v25  ;;  %v2950_v61 = vadd.f32 %v7774_v4, %v7773_v9  ;;  %v7782_v39 = vld [vmem:[#allocation13_spill] sm:$0xff]  ;;  %v7783_v25 = vld [vmem:[#allocation15_spill] sm:$0xff]  ;;  %v7784_v9 = vld [vmem:[#allocation16_spill] sm:$0xff] }
 0x557   : > { %v3687_v10 = vmul.f32 %v3623_v40, %v7086_v47  ;;  %v3779_v58 = vpack.c.bf16 %v3727_v34, %v3725_v5  ;;  %v3657_v48 = vmul.f32 %v3593_v52, %v7775_v29  ;;  %v2876_v60 = vadd.f32 %v7777_v45, %v7776_v31  ;;  %v4398_v47 = vld [vmem:[%s7356_s14] ss:$8 sps:$4 sm:$0xff]  }
 0x558   : > { %v2880_v30 = vadd.f32 %v7779_v18, %v7778_v27  ;;  %v3659_v43 = vmul.f32 %v3595_v23, %v7780_v8  ;;  %v3776_v24 = vpack.c.bf16 %v3722_v36, %v3720_v37  ;;  %v3749_v55 = vmul.f32 %v3685_v28, %v2946_v33  ;;  %v7786_v29 = vld [vmem:[#allocation11_spill] sm:$0xff]  ;;  %v7787_v45 = vld [vmem:[#allocation14_spill] sm:$0xff]  ;;  %v7788_v8 = vld [vmem:[#allocation9_spill] sm:$0xff] }
 0x559   : > { %v3751_v62 = vmul.f32 %v3687_v10, %v2950_v61  ;;  %v3721_v17 = vmul.f32 %v3657_v48, %v2876_v60  ;;  %v7781_v2 = vmov 0   ;;  %v7785_v61 = vld [vmem:[#allocation17_spill] sm:$0xff] }
 0x55a   : > { %v3723_v15 = vmul.f32 %v3659_v43, %v2880_v30 }
 0x55b   : > { %v3791_v0 = vpack.c.bf16 %v3751_v62, %v3749_v55  ;;  %v7789_v62 = vld [vmem:[#allocation12_spill] sm:$0xff] }
 0x55c   : > { %v3777_v11 = vpack.c.bf16 %v3723_v15, %v3721_v17 }
 0x55d   : > { %3896 = vmatprep.subr.bf16.mxu0 %v3791_v0 }
 0x55e   : > { %3897 = vmatpush2.bf16.msra.mxu0 %v3790_v26 }
 0x55f   : > { %3898 = vmatprep.subr.bf16.mxu0 %v3789_v41  ;;  %v3833_v41 = vpop.permute.xlu1 %3832 }
 0x562   : > { %3899 = vmatpush2.bf16.msra.mxu0 %v3788_v14 }
 0x563   : > { %3900 = vmatprep.subr.bf16.mxu0 %v3787_v16 }
 0x566   : > { %3901 = vmatpush2.bf16.msra.mxu0 %v3786_v53  ;;  %v4404_v53 = vld [vmem:[%s7356_s14 + $0x24] ss:$8 sps:$4 sm:$0xff]  }
 0x567   : > { %3902 = vmatprep.subr.bf16.mxu0 %v3785_v7  ;;  %v3838_v7 = vpop.permute.xlu0 %3837 }
 0x56a   : > { %3903 = vmatpush2.bf16.msra.mxu0 %v3784_v6 }
 0x56b   : > { %3904 = vmatprep.subr.bf16.mxu0 %v3783_v51  ;;  %v3828_v28 = vpop.permute.xlu0 %3827 }
 0x56e   : > { %3905 = vmatpush2.bf16.msra.mxu0 %v3782_v22 }
 0x56f   : > { %3906 = vmatprep.subr.bf16.mxu0 %v3781_v12  ;;  %v3823_v12 = vpop.permute.xlu1 %3822  ;;  %v3818_v57 = vpop.permute.xlu0 %3817 }
 0x572   : > { %3907 = vmatpush2.bf16.msra.mxu0 %v3780_v1 }
 0x573   : > { %3908 = vmatprep.subr.bf16.mxu0 %v3779_v58  ;;  %v3813_v33 = vpop.permute.xlu1 %3812  ;;  %v3808_v18 = vpop.permute.xlu0 %3807 }
 0x576   : > { %3909 = vmatpush2.bf16.msra.mxu0 %v3778_v59 }
 0x577   : > { %3910 = vmatprep.subr.bf16.mxu0 %v3777_v11  ;;  %v3803_v0 = vpop.permute.xlu1 %3802 }
 0x57a   : > { %3911 = vmatpush2.bf16.msra.mxu0 %v3776_v24 }
 0x57d   : > { %3913 = vmatmul.mubr.bf16.vlgmr.msra.gmra.mxu0 %v4398_v47  ;;  %v7790_v47 = vld [vmem:[#allocation8_spill] sm:$0xff] }
 0x57e   : > { %3922 = vmatprep.mubr.bf16.mxu0 %v4401_v63 }
 0x585   : > { %3923 = vmatmul.mubr.bf16.gmra.mxu0 %v4403_v49 }
 0x586   : > { %3932 = vmatprep.mubr.bf16.mxu0 %v4404_v53  ;;  %v7791_v53 = vld [vmem:[#allocation5_spill] sm:$0xff] }
 0x58d   : > { %3933 = vmatmul.mubr.bf16.gmra.mxu0 %v4406_v54 }
 0x58e   : > { %3942 = vmatprep.mubr.bf16.mxu0 %v4407_v20 }
 0x595   : > { %3943 = vmatmul.mubr.bf16.gmra.mxu0 %v4409_v19  ;;  %v7792_v19 = vld [vmem:[#allocation3_spill] sm:$0xff] }
 0x596   : > { %4097 = vmatprep.mubr.bf16.mxu0 %v7781_v2 }
 0x63d   : > { %v3914_v14 = vpop.f32.mrf.mxu0 }
 0x63f   : > { %v3916_v16 = vpop.f32.mrf.mxu0 }
 0x640   : > { %v3917_v49 = vadd.f32 %v3916_v16, %v3803_v0 }
 0x641   : > { %v3918_v56 = vpop.f32.mrf.mxu0 }
 0x642   : > { %v3919_v20 = vadd.f32 %v3918_v56, %v3808_v18 }
 0x643   : > { %v3920_v44 = vpop.f32.mrf.mxu0 }
 0x644   : > { %v3921_v55 = vadd.f32 %v3920_v44, %v3808_v18 }
 0x645   : > { %v3924_v3 = vpop.f32.mrf.mxu0 }
 0x646   : > { %v3925_v11 = vadd.f32 %v3924_v3, %v3813_v33 }
 0x647   : > { %v3926_v32 = vpop.f32.mrf.mxu0 }
 0x648   : > { %v3927_v31 = vadd.f32 %v3926_v32, %v3813_v33  ;;  %v4001_v33 = vpop.permute.xlu0 %4000 }
 0x649   : > { %v3928_v6 = vpop.f32.mrf.mxu0 }
 0x64a   : > { %v3929_v30 = vadd.f32 %v3928_v6, %v3818_v57  ;;  %v3958_v54 = vadd.f32 %v3927_v31, %v7791_v53 }
 0x64b   : > { %v3930_v42 = vpop.f32.mrf.mxu0 }
 0x64c   : > { %v3931_v37 = vadd.f32 %v3930_v42, %v3818_v57  ;;  %v3959_v32 = vadd.f32 %v3929_v30, %v7792_v19  ;;  %v7793_v42 = vld [vmem:[#allocation4_spill] sm:$0xff]  ;;  %v4011_v18 = vpop.permute.xlu0 %4010 }
 0x64d   : > { %v3934_v13 = vpop.f32.mrf.mxu0 }
 0x64e   : > { %v3935_v58 = vadd.f32 %v3934_v13, %v3823_v12  ;;  %v3960_v17 = vadd.f32 %v3931_v37, %v7789_v62  ;;  %v3956_v13 = vadd.f32 %v3921_v55, %v7793_v42  ;;  %v4590_v62 = vld [vmem:[%s4723_s1 + $0x30] sm:$0xff]  ;;  %v4593_v42 = vld [vmem:[%s4723_s1 + $0x48] sm:$0xff] }
 0x64f   : > { %v3936_v22 = vpop.f32.mrf.mxu0 }
 0x650   : > { %v3937_v38 = vadd.f32 %v3936_v22, %v3823_v12  ;;  %v3961_v63 = vadd.f32 %v3935_v58, %v7790_v47  ;;  %v3980_v44 = vpack.c.bf16 %v3960_v17, %v3958_v54  ;;  %v7794_v22 = vld [vmem:[#allocation2_spill] sm:$0xff]  ;;  %v4587_v58 = vld [vmem:[%s4723_s1 + $0x18] sm:$0xff] }
 0x651   : > { %v3938_v51 = vpop.f32.mrf.mxu0  ;;  %v7797_v12 = vld [vmem:[#allocation6_spill] sm:$0xff]  ;;  %v4591_v47 = vld [vmem:[%s4723_s1 + $0x38] sm:$0xff] }
 0x652   : > { %v3939_v23 = vadd.f32 %v3938_v51, %v3828_v28  ;;  %v3962_v60 = vadd.f32 %v3937_v38, %v7787_v45  ;;  %v7795_v51 = vld [vmem:[#allocation10_spill] sm:$0xff] }
 0x653   : > { %v3940_v1 = vpop.f32.mrf.mxu0  ;;  %v3954_v3 = vadd.f32 %v3917_v49, %v7795_v51  ;;  %v4588_v45 = vld [vmem:[%s4723_s1 + $0x20] sm:$0xff] }
 0x654   : > { %v3941_v40 = vadd.f32 %v3940_v1, %v3828_v28  ;;  %v3963_v43 = vadd.f32 %v3939_v23, %v7788_v8  ;;  %v7796_v1 = vld [vmem:[#allocation7_spill] sm:$0xff]  ;;  %v4592_v54 = vld [vmem:[%s4723_s1 + $0x40] sm:$0xff] }
 0x655   : > { %v3944_v26 = vpop.f32.mrf.mxu0  ;;  %v3955_v28 = vadd.f32 %v3919_v20, %v7796_v1  ;;  %v4589_v8 = vld [vmem:[%s4723_s1 + $0x28] sm:$0xff] }
 0x656   : > { %v3945_v34 = vadd.f32 %v3944_v26, %v3833_v41  ;;  %v3964_v36 = vadd.f32 %v3941_v40, %v7783_v25  ;;  %v3981_v6 = vpack.c.bf16 %v3963_v43, %v3961_v63  ;;  %v3978_v26 = vpack.c.bf16 %v3956_v13, %v3954_v3  ;;  %v4412_v40 = vld [vmem:[%s7358_s16 + $0x10] sm:$0xff]  }
 0x657   : > { %v3946_v59 = vpop.f32.mrf.mxu0 }
 0x658   : > { %v3947_v35 = vadd.f32 %v3946_v59, %v3833_v41  ;;  %v3965_v48 = vadd.f32 %v3945_v34, %v7786_v29  ;;  %v3982_v15 = vpack.c.bf16 %v3964_v36, %v3962_v60  ;;  %v3957_v41 = vadd.f32 %v3925_v11, %v7794_v22  ;;  %v4586_v36 = vld [vmem:[%s4723_s1 + $0x10] sm:$0xff] }
 0x659   : > { %v3948_v21 = vpop.f32.mrf.mxu0  ;;  %v4594_v22 = vld [vmem:[%s4723_s1 + $0x50] sm:$0xff] }
 0x65a   : > { %v3949_v5 = vadd.f32 %v3948_v21, %v3838_v7  ;;  %v3966_v4 = vadd.f32 %v3947_v35, %v7784_v9  ;;  %v3979_v16 = vpack.c.bf16 %v3959_v32, %v3957_v41  ;;  %v4411_v21 = vld [vmem:[%s7358_s16 + $0x8] sm:$0xff]   ;;  %v4413_v35 = vld [vmem:[%s7358_s16 + $0x18] sm:$0xff]   ;;  %v4021_v32 = vpop.permute.xlu0 %4020 }
 0x65b   : > { %v3950_v52 = vpop.f32.mrf.mxu0 }
 0x65c   : > { %v3951_v46 = vadd.f32 %v3950_v52, %v3838_v7  ;;  %v3967_v50 = vadd.f32 %v3949_v5, %v7782_v39  ;;  %v3915_v7 = vadd.f32 %v3914_v14, %v3803_v0  ;;  %v4410_v14 = vld [vmem:[%s7358_s16] sm:$0xff]   ;;  %v3996_v5 = vpop.permute.xlu1 %3995  ;;  %v4585_v39 = vld [vmem:[%s4723_s1 + $0x8] sm:$0xff] }
 0x65e   : > { %v3968_v10 = vadd.f32 %v3951_v46, %v7785_v61  ;;  %v3983_v24 = vpack.c.bf16 %v3967_v50, %v3965_v48  ;;  %v3953_v59 = vadd.f32 %v3915_v7, %v7797_v12 }
 0x660   : > { %v3984_v27 = vpack.c.bf16 %v3968_v10, %v3966_v4  ;;  %v3977_v56 = vpack.c.bf16 %v3955_v28, %v3953_v59  ;;  %v4006_v61 = vpop.permute.xlu1 %4005  ;;  %v4595_v28 = vld [vmem:[%s4723_s1 + $0x58] sm:$0xff]  ;;  %v4596_v59 = vld [vmem:[%s4723_s1 + $0x60] sm:$0xff] }
 0x662   : > { %4073 = vmatprep.subr.bf16.mxu0 %v3984_v27 }
 0x663   : > { %4074 = vmatpush1.bf16.msra.mxu0 %v3983_v24 }
 0x664   : > { %4075 = vmatprep.subr.bf16.mxu0 %v3982_v15  ;;  %v4016_v0 = vpop.permute.xlu1 %4015 }
 0x667   : > { %4076 = vmatpush1.bf16.msra.mxu0 %v3981_v6 }
 0x668   : > { %4077 = vmatprep.subr.bf16.mxu0 %v3980_v44  ;;  %v4026_v3 = vpop.permute.xlu1 %4025 }
 0x66b   : > { %4078 = vmatpush1.bf16.msra.mxu0 %v3979_v16 }
 0x66c   : > { %4079 = vmatprep.subr.bf16.mxu0 %v3978_v26 }
 0x66f   : > { %4080 = vmatpush1.bf16.msra.mxu0 %v3977_v56 }
 0x672   : > { %4334 = vmatmul.mubr.msk.bf16.vlgmr.msra.gmra.mxu0 %vm601_vm0, %v4410_v14 }
 0x673   : > { %4107 = vmatprep.mubr.bf16.mxu0 %v7781_v2 }
 0x67a   : > { %4335 = vmatmul.mubr.msk.bf16.gmra.mxu0 %vm601_vm0, %v4411_v21  ;;  %v4031_v21 = vpop.permute.xlu0 %4030 }
 0x67b   : > { %4117 = vmatprep.mubr.bf16.mxu0 %v7781_v2 }
 0x682   : > { %4336 = vmatmul.mubr.msk.bf16.gmra.mxu0 %vm601_vm0, %v4412_v40 }
 0x683   : > { %4127 = vmatprep.mubr.bf16.mxu0 %v7781_v2  ;;  %v4584_v2 = vld [vmem:[%s4723_s1] sm:$0xff] }
 0x68a   : > { %4337 = vmatmul.mubr.msk.bf16.gmra.mxu0 %vm601_vm0, %v4413_v35  ;;  %v4597_v35 = vld [vmem:[%s4723_s1 + $0x68] sm:$0xff] }
 0x732   : > { %v4099_v57 = vpop.f32.mrf.mxu0 }
 0x733   : > { %v4100_v34 = vadd.f32 %v4099_v57, %v3996_v5 }
 0x734   : > { %v4101_v52 = vpop.f32.mrf.mxu0 }
 0x735   : > { %v4138_v38 = vadd.f32 %v4584_v2, %v4100_v34  ;;  %v4102_v46 = vadd.f32 %v4101_v52, %v3996_v5  ;;  %v4598_v52 = vld [vmem:[%s4723_s1 + $0x70] sm:$0xff] }
 0x736   : > { %v4103_v23 = vpop.f32.mrf.mxu0 }
 0x737   : > { %4154 = vst [vmem:[%s7305_s20] sm:$0xff] %v4138_v38  ;;  %v4139_v50 = vadd.f32 %v4585_v39, %v4102_v46  ;;  %v4104_v37 = vadd.f32 %v4103_v23, %v4001_v33  ;;  %v4599_v46 = vld [vmem:[%s4723_s1 + $0x78] sm:$0xff] }
 0x738   : > { %v4105_v25 = vpop.f32.mrf.mxu0 }
 0x739   : > { %4155 = vst [vmem:[%s7305_s20 + $0x8] sm:$0xff] %v4139_v50  ;;  %v4140_v9 = vadd.f32 %v4586_v36, %v4104_v37  ;;  %v4106_v4 = vadd.f32 %v4105_v25, %v4001_v33 }
 0x73a   : > { %v4109_v10 = vpop.f32.mrf.mxu0 }
 0x73b   : > { %4156 = vst [vmem:[%s7305_s20 + $0x10] sm:$0xff] %v4140_v9  ;;  %v4141_v29 = vadd.f32 %v4587_v58, %v4106_v4  ;;  %v4110_v48 = vadd.f32 %v4109_v10, %v4006_v61 }
 0x73c   : > { %v4111_v31 = vpop.f32.mrf.mxu0 }
 0x73d   : > { %4157 = vst [vmem:[%s7305_s20 + $0x18] sm:$0xff] %v4141_v29  ;;  %v4142_v60 = vadd.f32 %v4588_v45, %v4110_v48  ;;  %v4112_v27 = vadd.f32 %v4111_v31, %v4006_v61 }
 0x73e   : > { %v4113_v30 = vpop.f32.mrf.mxu0 }
 0x73f   : > { %4158 = vst [vmem:[%s7305_s20 + $0x20] sm:$0xff] %v4142_v60  ;;  %v4143_v43 = vadd.f32 %v4589_v8, %v4112_v27  ;;  %v4114_v24 = vadd.f32 %v4113_v30, %v4011_v18 }
 0x740   : > { %v4115_v55 = vpop.f32.mrf.mxu0 }
 0x741   : > { %4159 = vst [vmem:[%s7305_s20 + $0x28] sm:$0xff] %v4143_v43  ;;  %v4144_v17 = vadd.f32 %v4590_v62, %v4114_v24  ;;  %v4116_v15 = vadd.f32 %v4115_v55, %v4011_v18 }
 0x742   : > { %v4119_v11 = vpop.f32.mrf.mxu0 }
 0x743   : > { %4160 = vst [vmem:[%s7305_s20 + $0x30] sm:$0xff] %v4144_v17  ;;  %v4145_v63 = vadd.f32 %v4591_v47, %v4116_v15  ;;  %v4120_v49 = vadd.f32 %v4119_v11, %v4016_v0 }
 0x744   : > { %v4121_v53 = vpop.f32.mrf.mxu0 }
 0x745   : > { %4161 = vst [vmem:[%s7305_s20 + $0x38] sm:$0xff] %v4145_v63  ;;  %v4146_v20 = vadd.f32 %v4592_v54, %v4120_v49  ;;  %v4122_v19 = vadd.f32 %v4121_v53, %v4016_v0 }
 0x746   : > { %v4123_v6 = vpop.f32.mrf.mxu0 }
 0x747   : > { %4162 = vst [vmem:[%s7305_s20 + $0x40] sm:$0xff] %v4146_v20  ;;  %v4147_v13 = vadd.f32 %v4593_v42, %v4122_v19  ;;  %v4124_v44 = vadd.f32 %v4123_v6, %v4021_v32 }
 0x748   : > { %v4125_v7 = vpop.f32.mrf.mxu0 }
 0x749   : > { %4163 = vst [vmem:[%s7305_s20 + $0x48] sm:$0xff] %v4147_v13  ;;  %v4148_v41 = vadd.f32 %v4594_v22, %v4124_v44  ;;  %v4126_v51 = vadd.f32 %v4125_v7, %v4021_v32 }
 0x74a   : > { %v4129_v1 = vpop.f32.mrf.mxu0 }
 0x74b   : > { %4164 = vst [vmem:[%s7305_s20 + $0x50] sm:$0xff] %v4148_v41  ;;  %v4149_v16 = vadd.f32 %v4595_v28, %v4126_v51  ;;  %v4130_v26 = vadd.f32 %v4129_v1, %v4026_v3 }
 0x74c   : > { %v4131_v12 = vpop.f32.mrf.mxu0 }
 0x74d   : > { %4165 = vst [vmem:[%s7305_s20 + $0x58] sm:$0xff] %v4149_v16  ;;  %v4150_v56 = vadd.f32 %v4596_v59, %v4130_v26  ;;  %v4132_v14 = vadd.f32 %v4131_v12, %v4026_v3 }
 0x74e   : > { %v4133_v40 = vpop.f32.mrf.mxu0 }
 0x74f   : > { %4166 = vst [vmem:[%s7305_s20 + $0x60] sm:$0xff] %v4150_v56  ;;  %v4151_v5 = vadd.f32 %v4597_v35, %v4132_v14  ;;  %v4134_v57 = vadd.f32 %v4133_v40, %v4031_v21 }
 0x750   : > { %v4135_v34 = vpop.f32.mrf.mxu0 }
 0x751   : > { %4167 = vst [vmem:[%s7305_s20 + $0x68] sm:$0xff] %v4151_v5  ;;  %v4152_v2 = vadd.f32 %v4598_v52, %v4134_v57  ;;  %v4136_v38 = vadd.f32 %v4135_v34, %v4031_v21 }
 0x753   : > { %4168 = vst [vmem:[%s7305_s20 + $0x70] sm:$0xff] %v4152_v2  ;;  %v4153_v33 = vadd.f32 %v4599_v46, %v4136_v38 }
 0x755   : > { %4169 = vst [vmem:[%s7305_s20 + $0x78] sm:$0xff] %v4153_v33 }
 0x756 PF: > { %s28_s27 = sadd.s32 1, %s4606_s27  }
 0x757   : > { %p25_p4 = scmp.ge.s32.totalorder %s28_s27, 4  }
 0x759   :  { %27 = sbr.rel (!%p25_p4) target bundleno = 4 (0x4), region = 122 }

</bundles_post_ra>
